<compile_context>
chip_gen: v7x
topology: tpu7x:2x2x1
jax: 0.10.0
libtpu: 0.0.40
codegen_flags: <defaults>
</compile_context>

<pallas_src>
import functools

import jax
import jax.numpy as jnp
import numpy as np
from jax.experimental import pallas as pl
from jax.experimental.pallas import tpu as pltpu

DIM = 8          # channels (dim)
K1, K2 = 1, 7    # strip kernel sizes


def _dw_stage(canvas_ref, w_ref, b_ref, kh, kw, H, Wc, C, pad_r, pad_l,
              bcast_loads, store=True):
    """One depthwise stage on the zero-haloed fused (rows, W*C lanes) canvas.

    Reads the haloed canvas; writes the (H, Wc) center back in place (or returns it as a
    value when store=False).  Taps in w_ref are pre-tiled to the lane layout:
    w_ref[dy*kw + dx, w*C + c] = weight[dy, dx, c].
    """
    Hp, _ = canvas_ref.shape
    ph, pw = kh // 2, kw // 2

    # 8-row sublane-tile-aligned slab window covering every row tap of this stage.
    row0 = ((pad_r - ph) // 8) * 8
    need_rows = (pad_r - ph + kh - 1 + H) - row0
    nrows = min(((need_rows + 7) // 8) * 8, Hp - row0)
    off = pad_r - ph - row0                       # first-tap row offset within the slab

    def rows_bcast(ref, row, n):
        if bcast_loads:
            return ref[pl.ds(row, n, stride=0), :]   # hw sublane-broadcast load (vld slot)
        return ref[row:row + 1, :]                   # (1, Wc); broadcasts in the VALU op

    acc = jnp.zeros((H, Wc), jnp.float32)
    for dx in range(kw):
        lane0 = pad_l + (dx - pw) * C
        # One lane realignment per kernel column, reused by every row tap below.
        slab = canvas_ref[row0:row0 + nrows, lane0:lane0 + Wc]
        for dy in range(kh):
            t = dy * kw + dx
            acc = acc + rows_bcast(w_ref, t, H) * slab[off + dy:off + dy + H, :]

    res = acc + rows_bcast(b_ref, 0, H)
    if store:
        # Aligned, unmasked center store (rows on a sublane tile, lanes on a 128 boundary).
        canvas_ref[pad_r:pad_r + H, pad_l:pad_l + Wc] = res
        return None
    return res


def _strip_block_kernel(x_ref, w0_ref, b0_ref, w1_ref, b1_ref, w2_ref, b2_ref,
                        wp_ref, bp_ref, out_ref, canvas_ref,
                        *, k1, k2, C, pad_r, pad_l, bcast_loads):
    Bn, H, Wc = out_ref.shape
    Hp, Wp = canvas_ref.shape
    L = wp_ref.shape[0]          # lane-group width of the block-diagonal 1x1 weight
    M = Bn * H

    # Zero only the halo bands (the center is fully overwritten per image below).  Runs
    # every grid step on purpose: a program_id==0 guard would be wrong under v7x megacore
    # splitting of the "parallel" grid axis.
    canvas_ref[0:pad_r, :] = jnp.zeros((pad_r, Wp), jnp.float32)
    canvas_ref[pad_r + H:Hp, :] = jnp.zeros((Hp - pad_r - H, Wp), jnp.float32)
    canvas_ref[pad_r:pad_r + H, 0:pad_l] = jnp.zeros((H, pad_l), jnp.float32)
    canvas_ref[pad_r:pad_r + H, pad_l + Wc:Wp] = jnp.zeros((H, Wp - pad_l - Wc), jnp.float32)

    x = x_ref[...].astype(jnp.float32)          # (Bn, H, Wc)

    attn_rows = []
    for bn in range(Bn):
        canvas_ref[pad_r:pad_r + H, pad_l:pad_l + Wc] = x[bn]
        _dw_stage(canvas_ref, w0_ref, b0_ref, 5, 5, H, Wc, C, pad_r, pad_l, bcast_loads)
        _dw_stage(canvas_ref, w1_ref, b1_ref, k1, k2, H, Wc, C, pad_r, pad_l, bcast_loads)
        attn_rows.append(
            _dw_stage(canvas_ref, w2_ref, b2_ref, k2, k1, H, Wc, C, pad_r, pad_l,
                      bcast_loads, store=False))   # last stage stays in registers
    attn = attn_rows[0] if Bn == 1 else jnp.concatenate(attn_rows, axis=0)   # (Bn*H, Wc)

    # 1x1 conv over channels == lane-dense matmul with a block-diagonal weight, one
    # 128-lane group at a time (M = Bn*H rows feed the MXU).
    if Wc == L:
        y = jnp.dot(attn, wp_ref[...], preferred_element_type=jnp.float32)
    else:
        wp = wp_ref[...]
        y = jnp.concatenate(
            [jnp.dot(attn[:, g * L:(g + 1) * L], wp, preferred_element_type=jnp.float32)
             for g in range(Wc // L)], axis=1)
    if bcast_loads:
        y = y + bp_ref[pl.ds(0, M, stride=0), :]
    else:
        y = y + bp_ref[0:1, :]

    out_ref[...] = (x * y.reshape(Bn, H, Wc)).astype(out_ref.dtype)   # x * attn, lane-dense


def strip_block(x_nchw, params, *, k1=K1, k2=K2, batch_block=None):
    """params = (w0 (5,5,C), b0 (C,), w1 (k1,k2,C), b1 (C,), w2 (k2,k1,C), b2 (C,),
                 wpT (Cin,Cout), bp (Cout,)).  x is NCHW, output is NCHW."""
    w0, b0, w1, b1, w2, b2, wpT, bp = params
    N, C, H, W = x_nchw.shape
    Wc = W * C

    # Images per grid step: amortize per-step overhead / fill the MXU M dim, capped so the
    # double-buffered x / out blocks stay VMEM-friendly at larger shapes.
    if batch_block is None:
        per_img = H * Wc * 4
        cap = max(1, min(8, (2 * 1024 * 1024) // max(per_img, 1)))
        batch_block = max(d for d in range(1, N + 1) if N % d == 0 and d <= cap)
    Bn = batch_block
    assert N % Bn == 0, "batch_block must divide N"

    # Halo sized for the largest kernel, rounded so the canvas center is tile-aligned
    # (rows on a sublane-tile boundary, lanes on a 128-lane boundary).
    need = max(2, k1 // 2, k2 // 2)
    pad_r = ((need + 7) // 8) * 8
    pad_l = ((need * C + 127) // 128) * 128
    Hp, Wp = H + 2 * pad_r, Wc + 2 * pad_l

    # Fused lane layout: lane index = w*C + c.  Input stays in its native dtype.
    x_f = jnp.transpose(x_nchw, (0, 2, 3, 1)).reshape(N, H, Wc)

    def lane_tile_w(w):       # (kh, kw, C) -> (kh*kw, W*C): per-channel tap tiled across W
        kh, kw, _ = w.shape
        return jnp.tile(w.reshape(kh * kw, C), (1, W))

    def lane_tile_b(b):       # (C,) -> (1, W*C)
        return jnp.tile(b.reshape(C), W).reshape(1, Wc)

    w0_t, w1_t, w2_t = lane_tile_w(w0), lane_tile_w(w1), lane_tile_w(w2)
    b0_t, b1_t, b2_t = lane_tile_b(b0), lane_tile_b(b1), lane_tile_b(b2)
    bp_t = lane_tile_b(bp)

    # Block-diagonal 1x1 weight over one 128-lane group (reused across groups) instead of
    # the full (W*C)^2 kron: ~64 KiB regardless of W, K/N pinned at 128 for the MXU.
    L = 128 if (Wc % 128 == 0 and 128 % C == 0) else Wc
    wp_big = jnp.kron(jnp.eye(L // C, dtype=wpT.dtype), wpT)   # (L, L)

    def _run(fast):
        kernel = functools.partial(_strip_block_kernel, k1=k1, k2=k2, C=C,
                                   pad_r=pad_r, pad_l=pad_l, bcast_loads=fast)
        if fast:
            # Grid-invariant operands: single-buffer them (no throughput benefit from 2x).
            cspec = lambda shape: pl.BlockSpec(shape, lambda n: (0, 0),
                                               pipeline_mode=pl.Buffered(1))
        else:
            cspec = lambda shape: pl.BlockSpec(shape, lambda n: (0, 0))
        out_f = pl.pallas_call(
            kernel,
            out_shape=jax.ShapeDtypeStruct((N, H, Wc), x_nchw.dtype),
            grid=(N // Bn,),
            in_specs=[
                pl.BlockSpec((Bn, H, Wc), lambda n: (n, 0, 0)),   # x (unpadded, native dtype)
                cspec((5 * 5, Wc)),          # conv0 taps (lane-tiled)
                cspec((1, Wc)),              # conv0 bias
                cspec((k1 * k2, Wc)),        # conv_spatial1 taps
                cspec((1, Wc)),              # conv_spatial1 bias
                cspec((k2 * k1, Wc)),        # conv_spatial2 taps
                cspec((1, Wc)),              # conv_spatial2 bias
                cspec((L, L)),               # block-diagonal 1x1 weight (per lane group)
                cspec((1, Wc)),              # 1x1 bias (lane-tiled)
            ],
            out_specs=pl.BlockSpec((Bn, H, Wc), lambda n: (n, 0, 0)),
            scratch_shapes=[pltpu.VMEM((Hp, Wp), jnp.float32)],   # zero-haloed canvas
            compiler_params=pltpu.CompilerParams(dimension_semantics=("parallel",)),
        )(x_f, w0_t, b0_t, w1_t, b1_t, w2_t, b2_t, wp_big, bp_t)
        return jax.block_until_ready(out_f)

    try:
        out_f = _run(True)
    except Exception:
        # Safety net: if this jax build rejects pipeline_mode=pl.Buffered(1) or stride-0
        # broadcast loads, fall back to the plain (still-correct) variant.
        out_f = _run(False)

    return jnp.transpose(out_f.reshape(N, H, W, C), (0, 3, 1, 2))


def _reference(x_nchw, params, *, k1=K1, k2=K2):
    """Pure-JAX reference matching the PyTorch module semantics (NCHW)."""
    w0, b0, w1, b1, w2, b2, wpT, bp = params
    C = x_nchw.shape[1]
    dn = ('NCHW', 'OIHW', 'NCHW')

    def dw(v, w_khkwc, b, ph, pw):
        w = jnp.transpose(w_khkwc, (2, 0, 1))[:, None, :, :]   # (C, 1, kh, kw)
        y = jax.lax.conv_general_dilated(
            v, w, (1, 1), ((ph, ph), (pw, pw)), dimension_numbers=dn,
            feature_group_count=C, precision=jax.lax.Precision.HIGHEST)
        return y + b.reshape(-1)[None, :, None, None]

    a = dw(x_nchw, w0, b0, 2, 2)
    a = dw(a, w1, b1, k1 // 2, k2 // 2)
    a = dw(a, w2, b2, k2 // 2, k1 // 2)
    wp = jnp.transpose(wpT)[:, :, None, None]                  # (Cout, Cin, 1, 1)
    a = jax.lax.conv_general_dilated(
        a, wp, (1, 1), ((0, 0), (0, 0)), dimension_numbers=dn,
        precision=jax.lax.Precision.HIGHEST) + bp.reshape(-1)[None, :, None, None]
    return x_nchw * a


if __name__ == "__main__":
    N, C, H, W = 2, DIM, 16, 16
    key = jax.random.PRNGKey(0)
    keys = jax.random.split(key, 9)
    s = 0.1
    params = (
        s * jax.random.normal(keys[0], (5, 5, C), jnp.float32),    # conv0 dw weight
        s * jax.random.normal(keys[1], (C,), jnp.float32),         # conv0 bias
        s * jax.random.normal(keys[2], (K1, K2, C), jnp.float32),  # conv_spatial1 dw weight
        s * jax.random.normal(keys[3], (C,), jnp.float32),         # conv_spatial1 bias
        s * jax.random.normal(keys[4], (K2, K1, C), jnp.float32),  # conv_spatial2 dw weight
        s * jax.random.normal(keys[5], (C,), jnp.float32),         # conv_spatial2 bias
        s * jax.random.normal(keys[6], (C, C), jnp.float32),       # 1x1 weight (Cin, Cout)
        s * jax.random.normal(keys[7], (C,), jnp.float32),         # 1x1 bias
    )
    x = jax.random.normal(keys[8], (N, C, H, W), jnp.float32)

    out = jax.block_until_ready(strip_block(x, params))
    ref = jax.block_until_ready(_reference(x, params))
    np.testing.assert_allclose(np.asarray(out), np.asarray(ref), rtol=1e-3, atol=1e-3)
    print("KERNEL_OK")
</pallas_src>

<mosaic_0001>
module attributes {stable_mosaic.version = 11 : i64} {
  func.func @_strip_block_kernel(%arg0: i32, %arg1: memref<2x16x128xf32, #tpu.memory_space<vmem>>, %arg2: memref<25x128xf32, #tpu.memory_space<vmem>>, %arg3: memref<1x128xf32, #tpu.memory_space<vmem>>, %arg4: memref<7x128xf32, #tpu.memory_space<vmem>>, %arg5: memref<1x128xf32, #tpu.memory_space<vmem>>, %arg6: memref<7x128xf32, #tpu.memory_space<vmem>>, %arg7: memref<1x128xf32, #tpu.memory_space<vmem>>, %arg8: memref<128x128xf32, #tpu.memory_space<vmem>>, %arg9: memref<1x128xf32, #tpu.memory_space<vmem>>, %arg10: memref<2x16x128xf32, #tpu.memory_space<vmem>>, %arg11: memref<32x384xf32, #tpu.memory_space<vmem>>) attributes {dimension_semantics = [#tpu.dimension_semantics<parallel>], iteration_bounds = array<i64: 1>, scalar_prefetch = 0 : i64, scratch_operands = 1 : i64, tpu.core_type = #tpu.core_type<tc>, window_params = [{transform_indices = @transform_0, window_bounds = array<i64: 2, 16, 128>}, {pipeline_mode = #tpu.pipeline_mode<synchronous>, transform_indices = @transform_1, window_bounds = array<i64: 25, 128>}, {pipeline_mode = #tpu.pipeline_mode<synchronous>, transform_indices = @transform_2, window_bounds = array<i64: 1, 128>}, {pipeline_mode = #tpu.pipeline_mode<synchronous>, transform_indices = @transform_3, window_bounds = array<i64: 7, 128>}, {pipeline_mode = #tpu.pipeline_mode<synchronous>, transform_indices = @transform_4, window_bounds = array<i64: 1, 128>}, {pipeline_mode = #tpu.pipeline_mode<synchronous>, transform_indices = @transform_5, window_bounds = array<i64: 7, 128>}, {pipeline_mode = #tpu.pipeline_mode<synchronous>, transform_indices = @transform_6, window_bounds = array<i64: 1, 128>}, {pipeline_mode = #tpu.pipeline_mode<synchronous>, transform_indices = @transform_7, window_bounds = array<i64: 128, 128>}, {pipeline_mode = #tpu.pipeline_mode<synchronous>, transform_indices = @transform_8, window_bounds = array<i64: 1, 128>}, {transform_indices = @transform_9, window_bounds = array<i64: 2, 16, 128>}]} {
    %cst = arith.constant 0.000000e+00 : f32
    %0 = vector.broadcast %cst : f32 to vector<8x384xf32>
    %c0 = arith.constant 0 : index
    %c0_0 = arith.constant 0 : index
    %1 = vector.load %arg11[%c0, %c0_0] : memref<32x384xf32, #tpu.memory_space<vmem>>, vector<8x384xf32>
    tpu.vector_store %arg11[%c0, %c0_0], %0 {strides = array<i32>} : memref<32x384xf32, #tpu.memory_space<vmem>>, vector<8x384xf32>,
    %cst_1 = arith.constant 0.000000e+00 : f32
    %2 = vector.broadcast %cst_1 : f32 to vector<8x384xf32>
    %c24 = arith.constant 24 : index
    %c0_2 = arith.constant 0 : index
    %3 = vector.load %arg11[%c24, %c0_2] : memref<32x384xf32, #tpu.memory_space<vmem>>, vector<8x384xf32>
    tpu.vector_store %arg11[%c24, %c0_2], %2 {strides = array<i32>} : memref<32x384xf32, #tpu.memory_space<vmem>>, vector<8x384xf32>,
    %cst_3 = arith.constant 0.000000e+00 : f32
    %4 = vector.broadcast %cst_3 : f32 to vector<16x128xf32>
    %c8 = arith.constant 8 : index
    %c0_4 = arith.constant 0 : index
    %5 = vector.load %arg11[%c8, %c0_4] : memref<32x384xf32, #tpu.memory_space<vmem>>, vector<16x128xf32>
    tpu.vector_store %arg11[%c8, %c0_4], %4 {strides = array<i32>} : memref<32x384xf32, #tpu.memory_space<vmem>>, vector<16x128xf32>,
    %cst_5 = arith.constant 0.000000e+00 : f32
    %6 = vector.broadcast %cst_5 : f32 to vector<16x128xf32>
    %c8_6 = arith.constant 8 : index
    %c256 = arith.constant 256 : index
    %7 = vector.load %arg11[%c8_6, %c256] : memref<32x384xf32, #tpu.memory_space<vmem>>, vector<16x128xf32>
    tpu.vector_store %arg11[%c8_6, %c256], %6 {strides = array<i32>} : memref<32x384xf32, #tpu.memory_space<vmem>>, vector<16x128xf32>,
    %c0_7 = arith.constant 0 : index
    %c0_8 = arith.constant 0 : index
    %c0_9 = arith.constant 0 : index
    %8 = vector.load %arg1[%c0_7, %c0_8, %c0_9] : memref<2x16x128xf32, #tpu.memory_space<vmem>>, vector<2x16x128xf32>
    %9 = vector.extract_strided_slice %8 {offsets = [0, 0, 0], sizes = [1, 16, 128], strides = [1, 1, 1]} : vector<2x16x128xf32> to vector<1x16x128xf32>
    %10 = vector.shape_cast %9 : vector<1x16x128xf32> to vector<16x128xf32>
    %c8_10 = arith.constant 8 : index
    %c128 = arith.constant 128 : index
    %11 = vector.load %arg11[%c8_10, %c128] : memref<32x384xf32, #tpu.memory_space<vmem>>, vector<16x128xf32>
    tpu.vector_store %arg11[%c8_10, %c128], %10 {strides = array<i32>} : memref<32x384xf32, #tpu.memory_space<vmem>>, vector<16x128xf32>,
    %cst_11 = arith.constant 0.000000e+00 : f32
    %12 = vector.broadcast %cst_11 : f32 to vector<16x128xf32>
    %c0_12 = arith.constant 0 : index
    %c112 = arith.constant 112 : index
    %13 = vector.load %arg11[%c0_12, %c112] : memref<32x384xf32, #tpu.memory_space<vmem>>, vector<32x128xf32>
    %c0_13 = arith.constant 0 : index
    %c0_14 = arith.constant 0 : index
    %14 = tpu.strided_load %arg2[%c0_13, %c0_14] {strides = array<i32: 0, 1>} : memref<25x128xf32, #tpu.memory_space<vmem>>, vector<16x128xf32>
    %15 = vector.extract_strided_slice %13 {offsets = [6, 0], sizes = [16, 128], strides = [1, 1]} : vector<32x128xf32> to vector<16x128xf32>
    %16 = arith.mulf %14, %15 : vector<16x128xf32>
    %17 = arith.addf %12, %16 : vector<16x128xf32>
    %c5 = arith.constant 5 : index
    %c0_15 = arith.constant 0 : index
    %18 = tpu.strided_load %arg2[%c5, %c0_15] {strides = array<i32: 0, 1>} : memref<25x128xf32, #tpu.memory_space<vmem>>, vector<16x128xf32>
    %19 = vector.extract_strided_slice %13 {offsets = [7, 0], sizes = [16, 128], strides = [1, 1]} : vector<32x128xf32> to vector<16x128xf32>
    %20 = arith.mulf %18, %19 : vector<16x128xf32>
    %21 = arith.addf %17, %20 : vector<16x128xf32>
    %c10 = arith.constant 10 : index
    %c0_16 = arith.constant 0 : index
    %22 = tpu.strided_load %arg2[%c10, %c0_16] {strides = array<i32: 0, 1>} : memref<25x128xf32, #tpu.memory_space<vmem>>, vector<16x128xf32>
    %23 = vector.extract_strided_slice %13 {offsets = [8, 0], sizes = [16, 128], strides = [1, 1]} : vector<32x128xf32> to vector<16x128xf32>
    %24 = arith.mulf %22, %23 : vector<16x128xf32>
    %25 = arith.addf %21, %24 : vector<16x128xf32>
    %c15 = arith.constant 15 : index
    %c0_17 = arith.constant 0 : index
    %26 = tpu.strided_load %arg2[%c15, %c0_17] {strides = array<i32: 0, 1>} : memref<25x128xf32, #tpu.memory_space<vmem>>, vector<16x128xf32>
    %27 = vector.extract_strided_slice %13 {offsets = [9, 0], sizes = [16, 128], strides = [1, 1]} : vector<32x128xf32> to vector<16x128xf32>
    %28 = arith.mulf %26, %27 : vector<16x128xf32>
    %29 = arith.addf %25, %28 : vector<16x128xf32>
    %c20 = arith.constant 20 : index
    %c0_18 = arith.constant 0 : index
    %30 = tpu.strided_load %arg2[%c20, %c0_18] {strides = array<i32: 0, 1>} : memref<25x128xf32, #tpu.memory_space<vmem>>, vector<16x128xf32>
    %31 = vector.extract_strided_slice %13 {offsets = [10, 0], sizes = [16, 128], strides = [1, 1]} : vector<32x128xf32> to vector<16x128xf32>
    %32 = arith.mulf %30, %31 : vector<16x128xf32>
    %33 = arith.addf %29, %32 : vector<16x128xf32>
    %c0_19 = arith.constant 0 : index
    %c120 = arith.constant 120 : index
    %34 = vector.load %arg11[%c0_19, %c120] : memref<32x384xf32, #tpu.memory_space<vmem>>, vector<32x128xf32>
    %c1 = arith.constant 1 : index
    %c0_20 = arith.constant 0 : index
    %35 = tpu.strided_load %arg2[%c1, %c0_20] {strides = array<i32: 0, 1>} : memref<25x128xf32, #tpu.memory_space<vmem>>, vector<16x128xf32>
    %36 = vector.extract_strided_slice %34 {offsets = [6, 0], sizes = [16, 128], strides = [1, 1]} : vector<32x128xf32> to vector<16x128xf32>
    %37 = arith.mulf %35, %36 : vector<16x128xf32>
    %38 = arith.addf %33, %37 : vector<16x128xf32>
    %c6 = arith.constant 6 : index
    %c0_21 = arith.constant 0 : index
    %39 = tpu.strided_load %arg2[%c6, %c0_21] {strides = array<i32: 0, 1>} : memref<25x128xf32, #tpu.memory_space<vmem>>, vector<16x128xf32>
    %40 = vector.extract_strided_slice %34 {offsets = [7, 0], sizes = [16, 128], strides = [1, 1]} : vector<32x128xf32> to vector<16x128xf32>
    %41 = arith.mulf %39, %40 : vector<16x128xf32>
    %42 = arith.addf %38, %41 : vector<16x128xf32>
    %c11 = arith.constant 11 : index
    %c0_22 = arith.constant 0 : index
    %43 = tpu.strided_load %arg2[%c11, %c0_22] {strides = array<i32: 0, 1>} : memref<25x128xf32, #tpu.memory_space<vmem>>, vector<16x128xf32>
    %44 = vector.extract_strided_slice %34 {offsets = [8, 0], sizes = [16, 128], strides = [1, 1]} : vector<32x128xf32> to vector<16x128xf32>
    %45 = arith.mulf %43, %44 : vector<16x128xf32>
    %46 = arith.addf %42, %45 : vector<16x128xf32>
    %c16 = arith.constant 16 : index
    %c0_23 = arith.constant 0 : index
    %47 = tpu.strided_load %arg2[%c16, %c0_23] {strides = array<i32: 0, 1>} : memref<25x128xf32, #tpu.memory_space<vmem>>, vector<16x128xf32>
    %48 = vector.extract_strided_slice %34 {offsets = [9, 0], sizes = [16, 128], strides = [1, 1]} : vector<32x128xf32> to vector<16x128xf32>
    %49 = arith.mulf %47, %48 : vector<16x128xf32>
    %50 = arith.addf %46, %49 : vector<16x128xf32>
    %c21 = arith.constant 21 : index
    %c0_24 = arith.constant 0 : index
    %51 = tpu.strided_load %arg2[%c21, %c0_24] {strides = array<i32: 0, 1>} : memref<25x128xf32, #tpu.memory_space<vmem>>, vector<16x128xf32>
    %52 = vector.extract_strided_slice %34 {offsets = [10, 0], sizes = [16, 128], strides = [1, 1]} : vector<32x128xf32> to vector<16x128xf32>
    %53 = arith.mulf %51, %52 : vector<16x128xf32>
    %54 = arith.addf %50, %53 : vector<16x128xf32>
    %c0_25 = arith.constant 0 : index
    %c128_26 = arith.constant 128 : index
    %55 = vector.load %arg11[%c0_25, %c128_26] : memref<32x384xf32, #tpu.memory_space<vmem>>, vector<32x128xf32>
    %c2 = arith.constant 2 : index
    %c0_27 = arith.constant 0 : index
    %56 = tpu.strided_load %arg2[%c2, %c0_27] {strides = array<i32: 0, 1>} : memref<25x128xf32, #tpu.memory_space<vmem>>, vector<16x128xf32>
    %57 = vector.extract_strided_slice %55 {offsets = [6, 0], sizes = [16, 128], strides = [1, 1]} : vector<32x128xf32> to vector<16x128xf32>
    %58 = arith.mulf %56, %57 : vector<16x128xf32>
    %59 = arith.addf %54, %58 : vector<16x128xf32>
    %c7 = arith.constant 7 : index
    %c0_28 = arith.constant 0 : index
    %60 = tpu.strided_load %arg2[%c7, %c0_28] {strides = array<i32: 0, 1>} : memref<25x128xf32, #tpu.memory_space<vmem>>, vector<16x128xf32>
    %61 = vector.extract_strided_slice %55 {offsets = [7, 0], sizes = [16, 128], strides = [1, 1]} : vector<32x128xf32> to vector<16x128xf32>
    %62 = arith.mulf %60, %61 : vector<16x128xf32>
    %63 = arith.addf %59, %62 : vector<16x128xf32>
    %c12 = arith.constant 12 : index
    %c0_29 = arith.constant 0 : index
    %64 = tpu.strided_load %arg2[%c12, %c0_29] {strides = array<i32: 0, 1>} : memref<25x128xf32, #tpu.memory_space<vmem>>, vector<16x128xf32>
    %65 = vector.extract_strided_slice %55 {offsets = [8, 0], sizes = [16, 128], strides = [1, 1]} : vector<32x128xf32> to vector<16x128xf32>
    %66 = arith.mulf %64, %65 : vector<16x128xf32>
    %67 = arith.addf %63, %66 : vector<16x128xf32>
    %c17 = arith.constant 17 : index
    %c0_30 = arith.constant 0 : index
    %68 = tpu.strided_load %arg2[%c17, %c0_30] {strides = array<i32: 0, 1>} : memref<25x128xf32, #tpu.memory_space<vmem>>, vector<16x128xf32>
    %69 = vector.extract_strided_slice %55 {offsets = [9, 0], sizes = [16, 128], strides = [1, 1]} : vector<32x128xf32> to vector<16x128xf32>
    %70 = arith.mulf %68, %69 : vector<16x128xf32>
    %71 = arith.addf %67, %70 : vector<16x128xf32>
    %c22 = arith.constant 22 : index
    %c0_31 = arith.constant 0 : index
    %72 = tpu.strided_load %arg2[%c22, %c0_31] {strides = array<i32: 0, 1>} : memref<25x128xf32, #tpu.memory_space<vmem>>, vector<16x128xf32>
    %73 = vector.extract_strided_slice %55 {offsets = [10, 0], sizes = [16, 128], strides = [1, 1]} : vector<32x128xf32> to vector<16x128xf32>
    %74 = arith.mulf %72, %73 : vector<16x128xf32>
    %75 = arith.addf %71, %74 : vector<16x128xf32>
    %c0_32 = arith.constant 0 : index
    %c136 = arith.constant 136 : index
    %76 = vector.load %arg11[%c0_32, %c136] : memref<32x384xf32, #tpu.memory_space<vmem>>, vector<32x128xf32>
    %c3 = arith.constant 3 : index
    %c0_33 = arith.constant 0 : index
    %77 = tpu.strided_load %arg2[%c3, %c0_33] {strides = array<i32: 0, 1>} : memref<25x128xf32, #tpu.memory_space<vmem>>, vector<16x128xf32>
    %78 = vector.extract_strided_slice %76 {offsets = [6, 0], sizes = [16, 128], strides = [1, 1]} : vector<32x128xf32> to vector<16x128xf32>
    %79 = arith.mulf %77, %78 : vector<16x128xf32>
    %80 = arith.addf %75, %79 : vector<16x128xf32>
    %c8_34 = arith.constant 8 : index
    %c0_35 = arith.constant 0 : index
    %81 = tpu.strided_load %arg2[%c8_34, %c0_35] {strides = array<i32: 0, 1>} : memref<25x128xf32, #tpu.memory_space<vmem>>, vector<16x128xf32>
    %82 = vector.extract_strided_slice %76 {offsets = [7, 0], sizes = [16, 128], strides = [1, 1]} : vector<32x128xf32> to vector<16x128xf32>
    %83 = arith.mulf %81, %82 : vector<16x128xf32>
    %84 = arith.addf %80, %83 : vector<16x128xf32>
    %c13 = arith.constant 13 : index
    %c0_36 = arith.constant 0 : index
    %85 = tpu.strided_load %arg2[%c13, %c0_36] {strides = array<i32: 0, 1>} : memref<25x128xf32, #tpu.memory_space<vmem>>, vector<16x128xf32>
    %86 = vector.extract_strided_slice %76 {offsets = [8, 0], sizes = [16, 128], strides = [1, 1]} : vector<32x128xf32> to vector<16x128xf32>
    %87 = arith.mulf %85, %86 : vector<16x128xf32>
    %88 = arith.addf %84, %87 : vector<16x128xf32>
    %c18 = arith.constant 18 : index
    %c0_37 = arith.constant 0 : index
    %89 = tpu.strided_load %arg2[%c18, %c0_37] {strides = array<i32: 0, 1>} : memref<25x128xf32, #tpu.memory_space<vmem>>, vector<16x128xf32>
    %90 = vector.extract_strided_slice %76 {offsets = [9, 0], sizes = [16, 128], strides = [1, 1]} : vector<32x128xf32> to vector<16x128xf32>
    %91 = arith.mulf %89, %90 : vector<16x128xf32>
    %92 = arith.addf %88, %91 : vector<16x128xf32>
    %c23 = arith.constant 23 : index
    %c0_38 = arith.constant 0 : index
    %93 = tpu.strided_load %arg2[%c23, %c0_38] {strides = array<i32: 0, 1>} : memref<25x128xf32, #tpu.memory_space<vmem>>, vector<16x128xf32>
    %94 = vector.extract_strided_slice %76 {offsets = [10, 0], sizes = [16, 128], strides = [1, 1]} : vector<32x128xf32> to vector<16x128xf32>
    %95 = arith.mulf %93, %94 : vector<16x128xf32>
    %96 = arith.addf %92, %95 : vector<16x128xf32>
    %c0_39 = arith.constant 0 : index
    %c144 = arith.constant 144 : index
    %97 = vector.load %arg11[%c0_39, %c144] : memref<32x384xf32, #tpu.memory_space<vmem>>, vector<32x128xf32>
    %c4 = arith.constant 4 : index
    %c0_40 = arith.constant 0 : index
    %98 = tpu.strided_load %arg2[%c4, %c0_40] {strides = array<i32: 0, 1>} : memref<25x128xf32, #tpu.memory_space<vmem>>, vector<16x128xf32>
    %99 = vector.extract_strided_slice %97 {offsets = [6, 0], sizes = [16, 128], strides = [1, 1]} : vector<32x128xf32> to vector<16x128xf32>
    %100 = arith.mulf %98, %99 : vector<16x128xf32>
    %101 = arith.addf %96, %100 : vector<16x128xf32>
    %c9 = arith.constant 9 : index
    %c0_41 = arith.constant 0 : index
    %102 = tpu.strided_load %arg2[%c9, %c0_41] {strides = array<i32: 0, 1>} : memref<25x128xf32, #tpu.memory_space<vmem>>, vector<16x128xf32>
    %103 = vector.extract_strided_slice %97 {offsets = [7, 0], sizes = [16, 128], strides = [1, 1]} : vector<32x128xf32> to vector<16x128xf32>
    %104 = arith.mulf %102, %103 : vector<16x128xf32>
    %105 = arith.addf %101, %104 : vector<16x128xf32>
    %c14 = arith.constant 14 : index
    %c0_42 = arith.constant 0 : index
    %106 = tpu.strided_load %arg2[%c14, %c0_42] {strides = array<i32: 0, 1>} : memref<25x128xf32, #tpu.memory_space<vmem>>, vector<16x128xf32>
    %107 = vector.extract_strided_slice %97 {offsets = [8, 0], sizes = [16, 128], strides = [1, 1]} : vector<32x128xf32> to vector<16x128xf32>
    %108 = arith.mulf %106, %107 : vector<16x128xf32>
    %109 = arith.addf %105, %108 : vector<16x128xf32>
    %c19 = arith.constant 19 : index
    %c0_43 = arith.constant 0 : index
    %110 = tpu.strided_load %arg2[%c19, %c0_43] {strides = array<i32: 0, 1>} : memref<25x128xf32, #tpu.memory_space<vmem>>, vector<16x128xf32>
    %111 = vector.extract_strided_slice %97 {offsets = [9, 0], sizes = [16, 128], strides = [1, 1]} : vector<32x128xf32> to vector<16x128xf32>
    %112 = arith.mulf %110, %111 : vector<16x128xf32>
    %113 = arith.addf %109, %112 : vector<16x128xf32>
    %c24_44 = arith.constant 24 : index
    %c0_45 = arith.constant 0 : index
    %114 = tpu.strided_load %arg2[%c24_44, %c0_45] {strides = array<i32: 0, 1>} : memref<25x128xf32, #tpu.memory_space<vmem>>, vector<16x128xf32>
    %115 = vector.extract_strided_slice %97 {offsets = [10, 0], sizes = [16, 128], strides = [1, 1]} : vector<32x128xf32> to vector<16x128xf32>
    %116 = arith.mulf %114, %115 : vector<16x128xf32>
    %117 = arith.addf %113, %116 : vector<16x128xf32>
    %c0_46 = arith.constant 0 : index
    %c0_47 = arith.constant 0 : index
    %118 = tpu.strided_load %arg3[%c0_46, %c0_47] {strides = array<i32: 0, 1>} : memref<1x128xf32, #tpu.memory_space<vmem>>, vector<16x128xf32>
    %119 = arith.addf %117, %118 : vector<16x128xf32>
    %c8_48 = arith.constant 8 : index
    %c128_49 = arith.constant 128 : index
    %120 = vector.load %arg11[%c8_48, %c128_49] : memref<32x384xf32, #tpu.memory_space<vmem>>, vector<16x128xf32>
    tpu.vector_store %arg11[%c8_48, %c128_49], %119 {strides = array<i32>} : memref<32x384xf32, #tpu.memory_space<vmem>>, vector<16x128xf32>,
    %cst_50 = arith.constant 0.000000e+00 : f32
    %121 = vector.broadcast %cst_50 : f32 to vector<16x128xf32>
    %c8_51 = arith.constant 8 : index
    %c104 = arith.constant 104 : index
    %122 = vector.load %arg11[%c8_51, %c104] : memref<32x384xf32, #tpu.memory_space<vmem>>, vector<16x128xf32>
    %c0_52 = arith.constant 0 : index
    %c0_53 = arith.constant 0 : index
    %123 = tpu.strided_load %arg4[%c0_52, %c0_53] {strides = array<i32: 0, 1>} : memref<7x128xf32, #tpu.memory_space<vmem>>, vector<16x128xf32>
    %124 = arith.mulf %123, %122 : vector<16x128xf32>
    %125 = arith.addf %121, %124 : vector<16x128xf32>
    %c8_54 = arith.constant 8 : index
    %c112_55 = arith.constant 112 : index
    %126 = vector.load %arg11[%c8_54, %c112_55] : memref<32x384xf32, #tpu.memory_space<vmem>>, vector<16x128xf32>
    %c1_56 = arith.constant 1 : index
    %c0_57 = arith.constant 0 : index
    %127 = tpu.strided_load %arg4[%c1_56, %c0_57] {strides = array<i32: 0, 1>} : memref<7x128xf32, #tpu.memory_space<vmem>>, vector<16x128xf32>
    %128 = arith.mulf %127, %126 : vector<16x128xf32>
    %129 = arith.addf %125, %128 : vector<16x128xf32>
    %c8_58 = arith.constant 8 : index
    %c120_59 = arith.constant 120 : index
    %130 = vector.load %arg11[%c8_58, %c120_59] : memref<32x384xf32, #tpu.memory_space<vmem>>, vector<16x128xf32>
    %c2_60 = arith.constant 2 : index
    %c0_61 = arith.constant 0 : index
    %131 = tpu.strided_load %arg4[%c2_60, %c0_61] {strides = array<i32: 0, 1>} : memref<7x128xf32, #tpu.memory_space<vmem>>, vector<16x128xf32>
    %132 = arith.mulf %131, %130 : vector<16x128xf32>
    %133 = arith.addf %129, %132 : vector<16x128xf32>
    %c8_62 = arith.constant 8 : index
    %c128_63 = arith.constant 128 : index
    %134 = vector.load %arg11[%c8_62, %c128_63] : memref<32x384xf32, #tpu.memory_space<vmem>>, vector<16x128xf32>
    %c3_64 = arith.constant 3 : index
    %c0_65 = arith.constant 0 : index
    %135 = tpu.strided_load %arg4[%c3_64, %c0_65] {strides = array<i32: 0, 1>} : memref<7x128xf32, #tpu.memory_space<vmem>>, vector<16x128xf32>
    %136 = arith.mulf %135, %134 : vector<16x128xf32>
    %137 = arith.addf %133, %136 : vector<16x128xf32>
    %c8_66 = arith.constant 8 : index
    %c136_67 = arith.constant 136 : index
    %138 = vector.load %arg11[%c8_66, %c136_67] : memref<32x384xf32, #tpu.memory_space<vmem>>, vector<16x128xf32>
    %c4_68 = arith.constant 4 : index
    %c0_69 = arith.constant 0 : index
    %139 = tpu.strided_load %arg4[%c4_68, %c0_69] {strides = array<i32: 0, 1>} : memref<7x128xf32, #tpu.memory_space<vmem>>, vector<16x128xf32>
    %140 = arith.mulf %139, %138 : vector<16x128xf32>
    %141 = arith.addf %137, %140 : vector<16x128xf32>
    %c8_70 = arith.constant 8 : index
    %c144_71 = arith.constant 144 : index
    %142 = vector.load %arg11[%c8_70, %c144_71] : memref<32x384xf32, #tpu.memory_space<vmem>>, vector<16x128xf32>
    %c5_72 = arith.constant 5 : index
    %c0_73 = arith.constant 0 : index
    %143 = tpu.strided_load %arg4[%c5_72, %c0_73] {strides = array<i32: 0, 1>} : memref<7x128xf32, #tpu.memory_space<vmem>>, vector<16x128xf32>
    %144 = arith.mulf %143, %142 : vector<16x128xf32>
    %145 = arith.addf %141, %144 : vector<16x128xf32>
    %c8_74 = arith.constant 8 : index
    %c152 = arith.constant 152 : index
    %146 = vector.load %arg11[%c8_74, %c152] : memref<32x384xf32, #tpu.memory_space<vmem>>, vector<16x128xf32>
    %c6_75 = arith.constant 6 : index
    %c0_76 = arith.constant 0 : index
    %147 = tpu.strided_load %arg4[%c6_75, %c0_76] {strides = array<i32: 0, 1>} : memref<7x128xf32, #tpu.memory_space<vmem>>, vector<16x128xf32>
    %148 = arith.mulf %147, %146 : vector<16x128xf32>
    %149 = arith.addf %145, %148 : vector<16x128xf32>
    %c0_77 = arith.constant 0 : index
    %c0_78 = arith.constant 0 : index
    %150 = tpu.strided_load %arg5[%c0_77, %c0_78] {strides = array<i32: 0, 1>} : memref<1x128xf32, #tpu.memory_space<vmem>>, vector<16x128xf32>
    %151 = arith.addf %149, %150 : vector<16x128xf32>
    %c8_79 = arith.constant 8 : index
    %c128_80 = arith.constant 128 : index
    %152 = vector.load %arg11[%c8_79, %c128_80] : memref<32x384xf32, #tpu.memory_space<vmem>>, vector<16x128xf32>
    tpu.vector_store %arg11[%c8_79, %c128_80], %151 {strides = array<i32>} : memref<32x384xf32, #tpu.memory_space<vmem>>, vector<16x128xf32>,
    %cst_81 = arith.constant 0.000000e+00 : f32
    %153 = vector.broadcast %cst_81 : f32 to vector<16x128xf32>
    %c0_82 = arith.constant 0 : index
    %c128_83 = arith.constant 128 : index
    %154 = vector.load %arg11[%c0_82, %c128_83] : memref<32x384xf32, #tpu.memory_space<vmem>>, vector<32x128xf32>
    %c0_84 = arith.constant 0 : index
    %c0_85 = arith.constant 0 : index
    %155 = tpu.strided_load %arg6[%c0_84, %c0_85] {strides = array<i32: 0, 1>} : memref<7x128xf32, #tpu.memory_space<vmem>>, vector<16x128xf32>
    %156 = vector.extract_strided_slice %154 {offsets = [5, 0], sizes = [16, 128], strides = [1, 1]} : vector<32x128xf32> to vector<16x128xf32>
    %157 = arith.mulf %155, %156 : vector<16x128xf32>
    %158 = arith.addf %153, %157 : vector<16x128xf32>
    %c1_86 = arith.constant 1 : index
    %c0_87 = arith.constant 0 : index
    %159 = tpu.strided_load %arg6[%c1_86, %c0_87] {strides = array<i32: 0, 1>} : memref<7x128xf32, #tpu.memory_space<vmem>>, vector<16x128xf32>
    %160 = vector.extract_strided_slice %154 {offsets = [6, 0], sizes = [16, 128], strides = [1, 1]} : vector<32x128xf32> to vector<16x128xf32>
    %161 = arith.mulf %159, %160 : vector<16x128xf32>
    %162 = arith.addf %158, %161 : vector<16x128xf32>
    %c2_88 = arith.constant 2 : index
    %c0_89 = arith.constant 0 : index
    %163 = tpu.strided_load %arg6[%c2_88, %c0_89] {strides = array<i32: 0, 1>} : memref<7x128xf32, #tpu.memory_space<vmem>>, vector<16x128xf32>
    %164 = vector.extract_strided_slice %154 {offsets = [7, 0], sizes = [16, 128], strides = [1, 1]} : vector<32x128xf32> to vector<16x128xf32>
    %165 = arith.mulf %163, %164 : vector<16x128xf32>
    %166 = arith.addf %162, %165 : vector<16x128xf32>
    %c3_90 = arith.constant 3 : index
    %c0_91 = arith.constant 0 : index
    %167 = tpu.strided_load %arg6[%c3_90, %c0_91] {strides = array<i32: 0, 1>} : memref<7x128xf32, #tpu.memory_space<vmem>>, vector<16x128xf32>
    %168 = vector.extract_strided_slice %154 {offsets = [8, 0], sizes = [16, 128], strides = [1, 1]} : vector<32x128xf32> to vector<16x128xf32>
    %169 = arith.mulf %167, %168 : vector<16x128xf32>
    %170 = arith.addf %166, %169 : vector<16x128xf32>
    %c4_92 = arith.constant 4 : index
    %c0_93 = arith.constant 0 : index
    %171 = tpu.strided_load %arg6[%c4_92, %c0_93] {strides = array<i32: 0, 1>} : memref<7x128xf32, #tpu.memory_space<vmem>>, vector<16x128xf32>
    %172 = vector.extract_strided_slice %154 {offsets = [9, 0], sizes = [16, 128], strides = [1, 1]} : vector<32x128xf32> to vector<16x128xf32>
    %173 = arith.mulf %171, %172 : vector<16x128xf32>
    %174 = arith.addf %170, %173 : vector<16x128xf32>
    %c5_94 = arith.constant 5 : index
    %c0_95 = arith.constant 0 : index
    %175 = tpu.strided_load %arg6[%c5_94, %c0_95] {strides = array<i32: 0, 1>} : memref<7x128xf32, #tpu.memory_space<vmem>>, vector<16x128xf32>
    %176 = vector.extract_strided_slice %154 {offsets = [10, 0], sizes = [16, 128], strides = [1, 1]} : vector<32x128xf32> to vector<16x128xf32>
    %177 = arith.mulf %175, %176 : vector<16x128xf32>
    %178 = arith.addf %174, %177 : vector<16x128xf32>
    %c6_96 = arith.constant 6 : index
    %c0_97 = arith.constant 0 : index
    %179 = tpu.strided_load %arg6[%c6_96, %c0_97] {strides = array<i32: 0, 1>} : memref<7x128xf32, #tpu.memory_space<vmem>>, vector<16x128xf32>
    %180 = vector.extract_strided_slice %154 {offsets = [11, 0], sizes = [16, 128], strides = [1, 1]} : vector<32x128xf32> to vector<16x128xf32>
    %181 = arith.mulf %179, %180 : vector<16x128xf32>
    %182 = arith.addf %178, %181 : vector<16x128xf32>
    %c0_98 = arith.constant 0 : index
    %c0_99 = arith.constant 0 : index
    %183 = tpu.strided_load %arg7[%c0_98, %c0_99] {strides = array<i32: 0, 1>} : memref<1x128xf32, #tpu.memory_space<vmem>>, vector<16x128xf32>
    %184 = arith.addf %182, %183 : vector<16x128xf32>
    %185 = vector.extract_strided_slice %8 {offsets = [1, 0, 0], sizes = [1, 16, 128], strides = [1, 1, 1]} : vector<2x16x128xf32> to vector<1x16x128xf32>
    %186 = vector.shape_cast %185 : vector<1x16x128xf32> to vector<16x128xf32>
    %c8_100 = arith.constant 8 : index
    %c128_101 = arith.constant 128 : index
    %187 = vector.load %arg11[%c8_100, %c128_101] : memref<32x384xf32, #tpu.memory_space<vmem>>, vector<16x128xf32>
    tpu.vector_store %arg11[%c8_100, %c128_101], %186 {strides = array<i32>} : memref<32x384xf32, #tpu.memory_space<vmem>>, vector<16x128xf32>,
    %cst_102 = arith.constant 0.000000e+00 : f32
    %188 = vector.broadcast %cst_102 : f32 to vector<16x128xf32>
    %c0_103 = arith.constant 0 : index
    %c112_104 = arith.constant 112 : index
    %189 = vector.load %arg11[%c0_103, %c112_104] : memref<32x384xf32, #tpu.memory_space<vmem>>, vector<32x128xf32>
    %c0_105 = arith.constant 0 : index
    %c0_106 = arith.constant 0 : index
    %190 = tpu.strided_load %arg2[%c0_105, %c0_106] {strides = array<i32: 0, 1>} : memref<25x128xf32, #tpu.memory_space<vmem>>, vector<16x128xf32>
    %191 = vector.extract_strided_slice %189 {offsets = [6, 0], sizes = [16, 128], strides = [1, 1]} : vector<32x128xf32> to vector<16x128xf32>
    %192 = arith.mulf %190, %191 : vector<16x128xf32>
    %193 = arith.addf %188, %192 : vector<16x128xf32>
    %c5_107 = arith.constant 5 : index
    %c0_108 = arith.constant 0 : index
    %194 = tpu.strided_load %arg2[%c5_107, %c0_108] {strides = array<i32: 0, 1>} : memref<25x128xf32, #tpu.memory_space<vmem>>, vector<16x128xf32>
    %195 = vector.extract_strided_slice %189 {offsets = [7, 0], sizes = [16, 128], strides = [1, 1]} : vector<32x128xf32> to vector<16x128xf32>
    %196 = arith.mulf %194, %195 : vector<16x128xf32>
    %197 = arith.addf %193, %196 : vector<16x128xf32>
    %c10_109 = arith.constant 10 : index
    %c0_110 = arith.constant 0 : index
    %198 = tpu.strided_load %arg2[%c10_109, %c0_110] {strides = array<i32: 0, 1>} : memref<25x128xf32, #tpu.memory_space<vmem>>, vector<16x128xf32>
    %199 = vector.extract_strided_slice %189 {offsets = [8, 0], sizes = [16, 128], strides = [1, 1]} : vector<32x128xf32> to vector<16x128xf32>
    %200 = arith.mulf %198, %199 : vector<16x128xf32>
    %201 = arith.addf %197, %200 : vector<16x128xf32>
    %c15_111 = arith.constant 15 : index
    %c0_112 = arith.constant 0 : index
    %202 = tpu.strided_load %arg2[%c15_111, %c0_112] {strides = array<i32: 0, 1>} : memref<25x128xf32, #tpu.memory_space<vmem>>, vector<16x128xf32>
    %203 = vector.extract_strided_slice %189 {offsets = [9, 0], sizes = [16, 128], strides = [1, 1]} : vector<32x128xf32> to vector<16x128xf32>
    %204 = arith.mulf %202, %203 : vector<16x128xf32>
    %205 = arith.addf %201, %204 : vector<16x128xf32>
    %c20_113 = arith.constant 20 : index
    %c0_114 = arith.constant 0 : index
    %206 = tpu.strided_load %arg2[%c20_113, %c0_114] {strides = array<i32: 0, 1>} : memref<25x128xf32, #tpu.memory_space<vmem>>, vector<16x128xf32>
    %207 = vector.extract_strided_slice %189 {offsets = [10, 0], sizes = [16, 128], strides = [1, 1]} : vector<32x128xf32> to vector<16x128xf32>
    %208 = arith.mulf %206, %207 : vector<16x128xf32>
    %209 = arith.addf %205, %208 : vector<16x128xf32>
    %c0_115 = arith.constant 0 : index
    %c120_116 = arith.constant 120 : index
    %210 = vector.load %arg11[%c0_115, %c120_116] : memref<32x384xf32, #tpu.memory_space<vmem>>, vector<32x128xf32>
    %c1_117 = arith.constant 1 : index
    %c0_118 = arith.constant 0 : index
    %211 = tpu.strided_load %arg2[%c1_117, %c0_118] {strides = array<i32: 0, 1>} : memref<25x128xf32, #tpu.memory_space<vmem>>, vector<16x128xf32>
    %212 = vector.extract_strided_slice %210 {offsets = [6, 0], sizes = [16, 128], strides = [1, 1]} : vector<32x128xf32> to vector<16x128xf32>
    %213 = arith.mulf %211, %212 : vector<16x128xf32>
    %214 = arith.addf %209, %213 : vector<16x128xf32>
    %c6_119 = arith.constant 6 : index
    %c0_120 = arith.constant 0 : index
    %215 = tpu.strided_load %arg2[%c6_119, %c0_120] {strides = array<i32: 0, 1>} : memref<25x128xf32, #tpu.memory_space<vmem>>, vector<16x128xf32>
    %216 = vector.extract_strided_slice %210 {offsets = [7, 0], sizes = [16, 128], strides = [1, 1]} : vector<32x128xf32> to vector<16x128xf32>
    %217 = arith.mulf %215, %216 : vector<16x128xf32>
    %218 = arith.addf %214, %217 : vector<16x128xf32>
    %c11_121 = arith.constant 11 : index
    %c0_122 = arith.constant 0 : index
    %219 = tpu.strided_load %arg2[%c11_121, %c0_122] {strides = array<i32: 0, 1>} : memref<25x128xf32, #tpu.memory_space<vmem>>, vector<16x128xf32>
    %220 = vector.extract_strided_slice %210 {offsets = [8, 0], sizes = [16, 128], strides = [1, 1]} : vector<32x128xf32> to vector<16x128xf32>
    %221 = arith.mulf %219, %220 : vector<16x128xf32>
    %222 = arith.addf %218, %221 : vector<16x128xf32>
    %c16_123 = arith.constant 16 : index
    %c0_124 = arith.constant 0 : index
    %223 = tpu.strided_load %arg2[%c16_123, %c0_124] {strides = array<i32: 0, 1>} : memref<25x128xf32, #tpu.memory_space<vmem>>, vector<16x128xf32>
    %224 = vector.extract_strided_slice %210 {offsets = [9, 0], sizes = [16, 128], strides = [1, 1]} : vector<32x128xf32> to vector<16x128xf32>
    %225 = arith.mulf %223, %224 : vector<16x128xf32>
    %226 = arith.addf %222, %225 : vector<16x128xf32>
    %c21_125 = arith.constant 21 : index
    %c0_126 = arith.constant 0 : index
    %227 = tpu.strided_load %arg2[%c21_125, %c0_126] {strides = array<i32: 0, 1>} : memref<25x128xf32, #tpu.memory_space<vmem>>, vector<16x128xf32>
    %228 = vector.extract_strided_slice %210 {offsets = [10, 0], sizes = [16, 128], strides = [1, 1]} : vector<32x128xf32> to vector<16x128xf32>
    %229 = arith.mulf %227, %228 : vector<16x128xf32>
    %230 = arith.addf %226, %229 : vector<16x128xf32>
    %c0_127 = arith.constant 0 : index
    %c128_128 = arith.constant 128 : index
    %231 = vector.load %arg11[%c0_127, %c128_128] : memref<32x384xf32, #tpu.memory_space<vmem>>, vector<32x128xf32>
    %c2_129 = arith.constant 2 : index
    %c0_130 = arith.constant 0 : index
    %232 = tpu.strided_load %arg2[%c2_129, %c0_130] {strides = array<i32: 0, 1>} : memref<25x128xf32, #tpu.memory_space<vmem>>, vector<16x128xf32>
    %233 = vector.extract_strided_slice %231 {offsets = [6, 0], sizes = [16, 128], strides = [1, 1]} : vector<32x128xf32> to vector<16x128xf32>
    %234 = arith.mulf %232, %233 : vector<16x128xf32>
    %235 = arith.addf %230, %234 : vector<16x128xf32>
    %c7_131 = arith.constant 7 : index
    %c0_132 = arith.constant 0 : index
    %236 = tpu.strided_load %arg2[%c7_131, %c0_132] {strides = array<i32: 0, 1>} : memref<25x128xf32, #tpu.memory_space<vmem>>, vector<16x128xf32>
    %237 = vector.extract_strided_slice %231 {offsets = [7, 0], sizes = [16, 128], strides = [1, 1]} : vector<32x128xf32> to vector<16x128xf32>
    %238 = arith.mulf %236, %237 : vector<16x128xf32>
    %239 = arith.addf %235, %238 : vector<16x128xf32>
    %c12_133 = arith.constant 12 : index
    %c0_134 = arith.constant 0 : index
    %240 = tpu.strided_load %arg2[%c12_133, %c0_134] {strides = array<i32: 0, 1>} : memref<25x128xf32, #tpu.memory_space<vmem>>, vector<16x128xf32>
    %241 = vector.extract_strided_slice %231 {offsets = [8, 0], sizes = [16, 128], strides = [1, 1]} : vector<32x128xf32> to vector<16x128xf32>
    %242 = arith.mulf %240, %241 : vector<16x128xf32>
    %243 = arith.addf %239, %242 : vector<16x128xf32>
    %c17_135 = arith.constant 17 : index
    %c0_136 = arith.constant 0 : index
    %244 = tpu.strided_load %arg2[%c17_135, %c0_136] {strides = array<i32: 0, 1>} : memref<25x128xf32, #tpu.memory_space<vmem>>, vector<16x128xf32>
    %245 = vector.extract_strided_slice %231 {offsets = [9, 0], sizes = [16, 128], strides = [1, 1]} : vector<32x128xf32> to vector<16x128xf32>
    %246 = arith.mulf %244, %245 : vector<16x128xf32>
    %247 = arith.addf %243, %246 : vector<16x128xf32>
    %c22_137 = arith.constant 22 : index
    %c0_138 = arith.constant 0 : index
    %248 = tpu.strided_load %arg2[%c22_137, %c0_138] {strides = array<i32: 0, 1>} : memref<25x128xf32, #tpu.memory_space<vmem>>, vector<16x128xf32>
    %249 = vector.extract_strided_slice %231 {offsets = [10, 0], sizes = [16, 128], strides = [1, 1]} : vector<32x128xf32> to vector<16x128xf32>
    %250 = arith.mulf %248, %249 : vector<16x128xf32>
    %251 = arith.addf %247, %250 : vector<16x128xf32>
    %c0_139 = arith.constant 0 : index
    %c136_140 = arith.constant 136 : index
    %252 = vector.load %arg11[%c0_139, %c136_140] : memref<32x384xf32, #tpu.memory_space<vmem>>, vector<32x128xf32>
    %c3_141 = arith.constant 3 : index
    %c0_142 = arith.constant 0 : index
    %253 = tpu.strided_load %arg2[%c3_141, %c0_142] {strides = array<i32: 0, 1>} : memref<25x128xf32, #tpu.memory_space<vmem>>, vector<16x128xf32>
    %254 = vector.extract_strided_slice %252 {offsets = [6, 0], sizes = [16, 128], strides = [1, 1]} : vector<32x128xf32> to vector<16x128xf32>
    %255 = arith.mulf %253, %254 : vector<16x128xf32>
    %256 = arith.addf %251, %255 : vector<16x128xf32>
    %c8_143 = arith.constant 8 : index
    %c0_144 = arith.constant 0 : index
    %257 = tpu.strided_load %arg2[%c8_143, %c0_144] {strides = array<i32: 0, 1>} : memref<25x128xf32, #tpu.memory_space<vmem>>, vector<16x128xf32>
    %258 = vector.extract_strided_slice %252 {offsets = [7, 0], sizes = [16, 128], strides = [1, 1]} : vector<32x128xf32> to vector<16x128xf32>
    %259 = arith.mulf %257, %258 : vector<16x128xf32>
    %260 = arith.addf %256, %259 : vector<16x128xf32>
    %c13_145 = arith.constant 13 : index
    %c0_146 = arith.constant 0 : index
    %261 = tpu.strided_load %arg2[%c13_145, %c0_146] {strides = array<i32: 0, 1>} : memref<25x128xf32, #tpu.memory_space<vmem>>, vector<16x128xf32>
    %262 = vector.extract_strided_slice %252 {offsets = [8, 0], sizes = [16, 128], strides = [1, 1]} : vector<32x128xf32> to vector<16x128xf32>
    %263 = arith.mulf %261, %262 : vector<16x128xf32>
    %264 = arith.addf %260, %263 : vector<16x128xf32>
    %c18_147 = arith.constant 18 : index
    %c0_148 = arith.constant 0 : index
    %265 = tpu.strided_load %arg2[%c18_147, %c0_148] {strides = array<i32: 0, 1>} : memref<25x128xf32, #tpu.memory_space<vmem>>, vector<16x128xf32>
    %266 = vector.extract_strided_slice %252 {offsets = [9, 0], sizes = [16, 128], strides = [1, 1]} : vector<32x128xf32> to vector<16x128xf32>
    %267 = arith.mulf %265, %266 : vector<16x128xf32>
    %268 = arith.addf %264, %267 : vector<16x128xf32>
    %c23_149 = arith.constant 23 : index
    %c0_150 = arith.constant 0 : index
    %269 = tpu.strided_load %arg2[%c23_149, %c0_150] {strides = array<i32: 0, 1>} : memref<25x128xf32, #tpu.memory_space<vmem>>, vector<16x128xf32>
    %270 = vector.extract_strided_slice %252 {offsets = [10, 0], sizes = [16, 128], strides = [1, 1]} : vector<32x128xf32> to vector<16x128xf32>
    %271 = arith.mulf %269, %270 : vector<16x128xf32>
    %272 = arith.addf %268, %271 : vector<16x128xf32>
    %c0_151 = arith.constant 0 : index
    %c144_152 = arith.constant 144 : index
    %273 = vector.load %arg11[%c0_151, %c144_152] : memref<32x384xf32, #tpu.memory_space<vmem>>, vector<32x128xf32>
    %c4_153 = arith.constant 4 : index
    %c0_154 = arith.constant 0 : index
    %274 = tpu.strided_load %arg2[%c4_153, %c0_154] {strides = array<i32: 0, 1>} : memref<25x128xf32, #tpu.memory_space<vmem>>, vector<16x128xf32>
    %275 = vector.extract_strided_slice %273 {offsets = [6, 0], sizes = [16, 128], strides = [1, 1]} : vector<32x128xf32> to vector<16x128xf32>
    %276 = arith.mulf %274, %275 : vector<16x128xf32>
    %277 = arith.addf %272, %276 : vector<16x128xf32>
    %c9_155 = arith.constant 9 : index
    %c0_156 = arith.constant 0 : index
    %278 = tpu.strided_load %arg2[%c9_155, %c0_156] {strides = array<i32: 0, 1>} : memref<25x128xf32, #tpu.memory_space<vmem>>, vector<16x128xf32>
    %279 = vector.extract_strided_slice %273 {offsets = [7, 0], sizes = [16, 128], strides = [1, 1]} : vector<32x128xf32> to vector<16x128xf32>
    %280 = arith.mulf %278, %279 : vector<16x128xf32>
    %281 = arith.addf %277, %280 : vector<16x128xf32>
    %c14_157 = arith.constant 14 : index
    %c0_158 = arith.constant 0 : index
    %282 = tpu.strided_load %arg2[%c14_157, %c0_158] {strides = array<i32: 0, 1>} : memref<25x128xf32, #tpu.memory_space<vmem>>, vector<16x128xf32>
    %283 = vector.extract_strided_slice %273 {offsets = [8, 0], sizes = [16, 128], strides = [1, 1]} : vector<32x128xf32> to vector<16x128xf32>
    %284 = arith.mulf %282, %283 : vector<16x128xf32>
    %285 = arith.addf %281, %284 : vector<16x128xf32>
    %c19_159 = arith.constant 19 : index
    %c0_160 = arith.constant 0 : index
    %286 = tpu.strided_load %arg2[%c19_159, %c0_160] {strides = array<i32: 0, 1>} : memref<25x128xf32, #tpu.memory_space<vmem>>, vector<16x128xf32>
    %287 = vector.extract_strided_slice %273 {offsets = [9, 0], sizes = [16, 128], strides = [1, 1]} : vector<32x128xf32> to vector<16x128xf32>
    %288 = arith.mulf %286, %287 : vector<16x128xf32>
    %289 = arith.addf %285, %288 : vector<16x128xf32>
    %c24_161 = arith.constant 24 : index
    %c0_162 = arith.constant 0 : index
    %290 = tpu.strided_load %arg2[%c24_161, %c0_162] {strides = array<i32: 0, 1>} : memref<25x128xf32, #tpu.memory_space<vmem>>, vector<16x128xf32>
    %291 = vector.extract_strided_slice %273 {offsets = [10, 0], sizes = [16, 128], strides = [1, 1]} : vector<32x128xf32> to vector<16x128xf32>
    %292 = arith.mulf %290, %291 : vector<16x128xf32>
    %293 = arith.addf %289, %292 : vector<16x128xf32>
    %c0_163 = arith.constant 0 : index
    %c0_164 = arith.constant 0 : index
    %294 = tpu.strided_load %arg3[%c0_163, %c0_164] {strides = array<i32: 0, 1>} : memref<1x128xf32, #tpu.memory_space<vmem>>, vector<16x128xf32>
    %295 = arith.addf %293, %294 : vector<16x128xf32>
    %c8_165 = arith.constant 8 : index
    %c128_166 = arith.constant 128 : index
    %296 = vector.load %arg11[%c8_165, %c128_166] : memref<32x384xf32, #tpu.memory_space<vmem>>, vector<16x128xf32>
    tpu.vector_store %arg11[%c8_165, %c128_166], %295 {strides = array<i32>} : memref<32x384xf32, #tpu.memory_space<vmem>>, vector<16x128xf32>,
    %cst_167 = arith.constant 0.000000e+00 : f32
    %297 = vector.broadcast %cst_167 : f32 to vector<16x128xf32>
    %c8_168 = arith.constant 8 : index
    %c104_169 = arith.constant 104 : index
    %298 = vector.load %arg11[%c8_168, %c104_169] : memref<32x384xf32, #tpu.memory_space<vmem>>, vector<16x128xf32>
    %c0_170 = arith.constant 0 : index
    %c0_171 = arith.constant 0 : index
    %299 = tpu.strided_load %arg4[%c0_170, %c0_171] {strides = array<i32: 0, 1>} : memref<7x128xf32, #tpu.memory_space<vmem>>, vector<16x128xf32>
    %300 = arith.mulf %299, %298 : vector<16x128xf32>
    %301 = arith.addf %297, %300 : vector<16x128xf32>
    %c8_172 = arith.constant 8 : index
    %c112_173 = arith.constant 112 : index
    %302 = vector.load %arg11[%c8_172, %c112_173] : memref<32x384xf32, #tpu.memory_space<vmem>>, vector<16x128xf32>
    %c1_174 = arith.constant 1 : index
    %c0_175 = arith.constant 0 : index
    %303 = tpu.strided_load %arg4[%c1_174, %c0_175] {strides = array<i32: 0, 1>} : memref<7x128xf32, #tpu.memory_space<vmem>>, vector<16x128xf32>
    %304 = arith.mulf %303, %302 : vector<16x128xf32>
    %305 = arith.addf %301, %304 : vector<16x128xf32>
    %c8_176 = arith.constant 8 : index
    %c120_177 = arith.constant 120 : index
    %306 = vector.load %arg11[%c8_176, %c120_177] : memref<32x384xf32, #tpu.memory_space<vmem>>, vector<16x128xf32>
    %c2_178 = arith.constant 2 : index
    %c0_179 = arith.constant 0 : index
    %307 = tpu.strided_load %arg4[%c2_178, %c0_179] {strides = array<i32: 0, 1>} : memref<7x128xf32, #tpu.memory_space<vmem>>, vector<16x128xf32>
    %308 = arith.mulf %307, %306 : vector<16x128xf32>
    %309 = arith.addf %305, %308 : vector<16x128xf32>
    %c8_180 = arith.constant 8 : index
    %c128_181 = arith.constant 128 : index
    %310 = vector.load %arg11[%c8_180, %c128_181] : memref<32x384xf32, #tpu.memory_space<vmem>>, vector<16x128xf32>
    %c3_182 = arith.constant 3 : index
    %c0_183 = arith.constant 0 : index
    %311 = tpu.strided_load %arg4[%c3_182, %c0_183] {strides = array<i32: 0, 1>} : memref<7x128xf32, #tpu.memory_space<vmem>>, vector<16x128xf32>
    %312 = arith.mulf %311, %310 : vector<16x128xf32>
    %313 = arith.addf %309, %312 : vector<16x128xf32>
    %c8_184 = arith.constant 8 : index
    %c136_185 = arith.constant 136 : index
    %314 = vector.load %arg11[%c8_184, %c136_185] : memref<32x384xf32, #tpu.memory_space<vmem>>, vector<16x128xf32>
    %c4_186 = arith.constant 4 : index
    %c0_187 = arith.constant 0 : index
    %315 = tpu.strided_load %arg4[%c4_186, %c0_187] {strides = array<i32: 0, 1>} : memref<7x128xf32, #tpu.memory_space<vmem>>, vector<16x128xf32>
    %316 = arith.mulf %315, %314 : vector<16x128xf32>
    %317 = arith.addf %313, %316 : vector<16x128xf32>
    %c8_188 = arith.constant 8 : index
    %c144_189 = arith.constant 144 : index
    %318 = vector.load %arg11[%c8_188, %c144_189] : memref<32x384xf32, #tpu.memory_space<vmem>>, vector<16x128xf32>
    %c5_190 = arith.constant 5 : index
    %c0_191 = arith.constant 0 : index
    %319 = tpu.strided_load %arg4[%c5_190, %c0_191] {strides = array<i32: 0, 1>} : memref<7x128xf32, #tpu.memory_space<vmem>>, vector<16x128xf32>
    %320 = arith.mulf %319, %318 : vector<16x128xf32>
    %321 = arith.addf %317, %320 : vector<16x128xf32>
    %c8_192 = arith.constant 8 : index
    %c152_193 = arith.constant 152 : index
    %322 = vector.load %arg11[%c8_192, %c152_193] : memref<32x384xf32, #tpu.memory_space<vmem>>, vector<16x128xf32>
    %c6_194 = arith.constant 6 : index
    %c0_195 = arith.constant 0 : index
    %323 = tpu.strided_load %arg4[%c6_194, %c0_195] {strides = array<i32: 0, 1>} : memref<7x128xf32, #tpu.memory_space<vmem>>, vector<16x128xf32>
    %324 = arith.mulf %323, %322 : vector<16x128xf32>
    %325 = arith.addf %321, %324 : vector<16x128xf32>
    %c0_196 = arith.constant 0 : index
    %c0_197 = arith.constant 0 : index
    %326 = tpu.strided_load %arg5[%c0_196, %c0_197] {strides = array<i32: 0, 1>} : memref<1x128xf32, #tpu.memory_space<vmem>>, vector<16x128xf32>
    %327 = arith.addf %325, %326 : vector<16x128xf32>
    %c8_198 = arith.constant 8 : index
    %c128_199 = arith.constant 128 : index
    %328 = vector.load %arg11[%c8_198, %c128_199] : memref<32x384xf32, #tpu.memory_space<vmem>>, vector<16x128xf32>
    tpu.vector_store %arg11[%c8_198, %c128_199], %327 {strides = array<i32>} : memref<32x384xf32, #tpu.memory_space<vmem>>, vector<16x128xf32>,
    %cst_200 = arith.constant 0.000000e+00 : f32
    %329 = vector.broadcast %cst_200 : f32 to vector<16x128xf32>
    %c0_201 = arith.constant 0 : index
    %c128_202 = arith.constant 128 : index
    %330 = vector.load %arg11[%c0_201, %c128_202] : memref<32x384xf32, #tpu.memory_space<vmem>>, vector<32x128xf32>
    %c0_203 = arith.constant 0 : index
    %c0_204 = arith.constant 0 : index
    %331 = tpu.strided_load %arg6[%c0_203, %c0_204] {strides = array<i32: 0, 1>} : memref<7x128xf32, #tpu.memory_space<vmem>>, vector<16x128xf32>
    %332 = vector.extract_strided_slice %330 {offsets = [5, 0], sizes = [16, 128], strides = [1, 1]} : vector<32x128xf32> to vector<16x128xf32>
    %333 = arith.mulf %331, %332 : vector<16x128xf32>
    %334 = arith.addf %329, %333 : vector<16x128xf32>
    %c1_205 = arith.constant 1 : index
    %c0_206 = arith.constant 0 : index
    %335 = tpu.strided_load %arg6[%c1_205, %c0_206] {strides = array<i32: 0, 1>} : memref<7x128xf32, #tpu.memory_space<vmem>>, vector<16x128xf32>
    %336 = vector.extract_strided_slice %330 {offsets = [6, 0], sizes = [16, 128], strides = [1, 1]} : vector<32x128xf32> to vector<16x128xf32>
    %337 = arith.mulf %335, %336 : vector<16x128xf32>
    %338 = arith.addf %334, %337 : vector<16x128xf32>
    %c2_207 = arith.constant 2 : index
    %c0_208 = arith.constant 0 : index
    %339 = tpu.strided_load %arg6[%c2_207, %c0_208] {strides = array<i32: 0, 1>} : memref<7x128xf32, #tpu.memory_space<vmem>>, vector<16x128xf32>
    %340 = vector.extract_strided_slice %330 {offsets = [7, 0], sizes = [16, 128], strides = [1, 1]} : vector<32x128xf32> to vector<16x128xf32>
    %341 = arith.mulf %339, %340 : vector<16x128xf32>
    %342 = arith.addf %338, %341 : vector<16x128xf32>
    %c3_209 = arith.constant 3 : index
    %c0_210 = arith.constant 0 : index
    %343 = tpu.strided_load %arg6[%c3_209, %c0_210] {strides = array<i32: 0, 1>} : memref<7x128xf32, #tpu.memory_space<vmem>>, vector<16x128xf32>
    %344 = vector.extract_strided_slice %330 {offsets = [8, 0], sizes = [16, 128], strides = [1, 1]} : vector<32x128xf32> to vector<16x128xf32>
    %345 = arith.mulf %343, %344 : vector<16x128xf32>
    %346 = arith.addf %342, %345 : vector<16x128xf32>
    %c4_211 = arith.constant 4 : index
    %c0_212 = arith.constant 0 : index
    %347 = tpu.strided_load %arg6[%c4_211, %c0_212] {strides = array<i32: 0, 1>} : memref<7x128xf32, #tpu.memory_space<vmem>>, vector<16x128xf32>
    %348 = vector.extract_strided_slice %330 {offsets = [9, 0], sizes = [16, 128], strides = [1, 1]} : vector<32x128xf32> to vector<16x128xf32>
    %349 = arith.mulf %347, %348 : vector<16x128xf32>
    %350 = arith.addf %346, %349 : vector<16x128xf32>
    %c5_213 = arith.constant 5 : index
    %c0_214 = arith.constant 0 : index
    %351 = tpu.strided_load %arg6[%c5_213, %c0_214] {strides = array<i32: 0, 1>} : memref<7x128xf32, #tpu.memory_space<vmem>>, vector<16x128xf32>
    %352 = vector.extract_strided_slice %330 {offsets = [10, 0], sizes = [16, 128], strides = [1, 1]} : vector<32x128xf32> to vector<16x128xf32>
    %353 = arith.mulf %351, %352 : vector<16x128xf32>
    %354 = arith.addf %350, %353 : vector<16x128xf32>
    %c6_215 = arith.constant 6 : index
    %c0_216 = arith.constant 0 : index
    %355 = tpu.strided_load %arg6[%c6_215, %c0_216] {strides = array<i32: 0, 1>} : memref<7x128xf32, #tpu.memory_space<vmem>>, vector<16x128xf32>
    %356 = vector.extract_strided_slice %330 {offsets = [11, 0], sizes = [16, 128], strides = [1, 1]} : vector<32x128xf32> to vector<16x128xf32>
    %357 = arith.mulf %355, %356 : vector<16x128xf32>
    %358 = arith.addf %354, %357 : vector<16x128xf32>
    %c0_217 = arith.constant 0 : index
    %c0_218 = arith.constant 0 : index
    %359 = tpu.strided_load %arg7[%c0_217, %c0_218] {strides = array<i32: 0, 1>} : memref<1x128xf32, #tpu.memory_space<vmem>>, vector<16x128xf32>
    %360 = arith.addf %358, %359 : vector<16x128xf32>
    %361 = tpu.concatenate %184, %360 in 0 : vector<16x128xf32>, vector<16x128xf32> -> vector<32x128xf32>
    %c0_219 = arith.constant 0 : index
    %c0_220 = arith.constant 0 : index
    %362 = vector.load %arg8[%c0_219, %c0_220] : memref<128x128xf32, #tpu.memory_space<vmem>>, vector<128x128xf32>
    %cst_221 = arith.constant dense<0.000000e+00> : vector<32x128xf32>
    %363 = tpu.matmul %361, %362, %cst_221 {dimension_numbers = #tpu.dot_dimension_numbers<[1], [0], [0], [1], [0, 0, 1, 1], [], []>} : vector<32x128xf32>, vector<128x128xf32>, vector<32x128xf32> -> vector<32x128xf32>
    %c0_222 = arith.constant 0 : index
    %c0_223 = arith.constant 0 : index
    %364 = tpu.strided_load %arg9[%c0_222, %c0_223] {strides = array<i32: 0, 1>} : memref<1x128xf32, #tpu.memory_space<vmem>>, vector<32x128xf32>
    %365 = arith.addf %363, %364 : vector<32x128xf32>
    %366 = vector.shape_cast %365 : vector<32x128xf32> to vector<2x16x128xf32>
    %367 = arith.mulf %8, %366 : vector<2x16x128xf32>
    %c0_224 = arith.constant 0 : index
    %c0_225 = arith.constant 0 : index
    %c0_226 = arith.constant 0 : index
    %368 = vector.load %arg10[%c0_224, %c0_225, %c0_226] : memref<2x16x128xf32, #tpu.memory_space<vmem>>, vector<2x16x128xf32>
    tpu.vector_store %arg10[%c0_224, %c0_225, %c0_226], %367 {strides = array<i32>} : memref<2x16x128xf32, #tpu.memory_space<vmem>>, vector<2x16x128xf32>,
    return
  }
  func.func @transform_0(%arg0: i32) -> (i32, i32, i32) {
    %c0_i32 = arith.constant 0 : i32
    %c0_i32_0 = arith.constant 0 : i32
    %c0_i32_1 = arith.constant 0 : i32
    return %arg0, %c0_i32, %c0_i32_0 : i32, i32, i32
  }
  func.func @transform_1(%arg0: i32) -> (i32, i32) {
    %c0_i32 = arith.constant 0 : i32
    %c0_i32_0 = arith.constant 0 : i32
    %c0_i32_1 = arith.constant 0 : i32
    return %c0_i32, %c0_i32_0 : i32, i32
  }
  func.func @transform_2(%arg0: i32) -> (i32, i32) {
    %c0_i32 = arith.constant 0 : i32
    %c0_i32_0 = arith.constant 0 : i32
    %c0_i32_1 = arith.constant 0 : i32
    return %c0_i32, %c0_i32_0 : i32, i32
  }
  func.func @transform_3(%arg0: i32) -> (i32, i32) {
    %c0_i32 = arith.constant 0 : i32
    %c0_i32_0 = arith.constant 0 : i32
    %c0_i32_1 = arith.constant 0 : i32
    return %c0_i32, %c0_i32_0 : i32, i32
  }
  func.func @transform_4(%arg0: i32) -> (i32, i32) {
    %c0_i32 = arith.constant 0 : i32
    %c0_i32_0 = arith.constant 0 : i32
    %c0_i32_1 = arith.constant 0 : i32
    return %c0_i32, %c0_i32_0 : i32, i32
  }
  func.func @transform_5(%arg0: i32) -> (i32, i32) {
    %c0_i32 = arith.constant 0 : i32
    %c0_i32_0 = arith.constant 0 : i32
    %c0_i32_1 = arith.constant 0 : i32
    return %c0_i32, %c0_i32_0 : i32, i32
  }
  func.func @transform_6(%arg0: i32) -> (i32, i32) {
    %c0_i32 = arith.constant 0 : i32
    %c0_i32_0 = arith.constant 0 : i32
    %c0_i32_1 = arith.constant 0 : i32
    return %c0_i32, %c0_i32_0 : i32, i32
  }
  func.func @transform_7(%arg0: i32) -> (i32, i32) {
    %c0_i32 = arith.constant 0 : i32
    %c0_i32_0 = arith.constant 0 : i32
    %c0_i32_1 = arith.constant 0 : i32
    return %c0_i32, %c0_i32_0 : i32, i32
  }
  func.func @transform_8(%arg0: i32) -> (i32, i32) {
    %c0_i32 = arith.constant 0 : i32
    %c0_i32_0 = arith.constant 0 : i32
    %c0_i32_1 = arith.constant 0 : i32
    return %c0_i32, %c0_i32_0 : i32, i32
  }
  func.func @transform_9(%arg0: i32) -> (i32, i32, i32) {
    %c0_i32 = arith.constant 0 : i32
    %c0_i32_0 = arith.constant 0 : i32
    %c0_i32_1 = arith.constant 0 : i32
    return %arg0, %c0_i32, %c0_i32_0 : i32, i32, i32
  }
}

module attributes {stable_mosaic.version = 11 : i64} {
  func.func @_strip_block_kernel(%arg0: i32, %arg1: memref<2x16x128xf32, #tpu.memory_space<vmem>>, %arg2: memref<25x128xf32, #tpu.memory_space<vmem>>, %arg3: memref<1x128xf32, #tpu.memory_space<vmem>>, %arg4: memref<7x128xf32, #tpu.memory_space<vmem>>, %arg5: memref<1x128xf32, #tpu.memory_space<vmem>>, %arg6: memref<7x128xf32, #tpu.memory_space<vmem>>, %arg7: memref<1x128xf32, #tpu.memory_space<vmem>>, %arg8: memref<128x128xf32, #tpu.memory_space<vmem>>, %arg9: memref<1x128xf32, #tpu.memory_space<vmem>>, %arg10: memref<2x16x128xf32, #tpu.memory_space<vmem>>, %arg11: memref<32x384xf32, #tpu.memory_space<vmem>>) attributes {dimension_semantics = [#tpu.dimension_semantics<parallel>], iteration_bounds = array<i64: 1>, scalar_prefetch = 0 : i64, scratch_operands = 1 : i64, tpu.core_type = #tpu.core_type<tc>, window_params = [{transform_indices = @transform_0, window_bounds = array<i64: 2, 16, 128>}, {pipeline_mode = #tpu.pipeline_mode<synchronous>, transform_indices = @transform_1, window_bounds = array<i64: 25, 128>}, {pipeline_mode = #tpu.pipeline_mode<synchronous>, transform_indices = @transform_2, window_bounds = array<i64: 1, 128>}, {pipeline_mode = #tpu.pipeline_mode<synchronous>, transform_indices = @transform_3, window_bounds = array<i64: 7, 128>}, {pipeline_mode = #tpu.pipeline_mode<synchronous>, transform_indices = @transform_4, window_bounds = array<i64: 1, 128>}, {pipeline_mode = #tpu.pipeline_mode<synchronous>, transform_indices = @transform_5, window_bounds = array<i64: 7, 128>}, {pipeline_mode = #tpu.pipeline_mode<synchronous>, transform_indices = @transform_6, window_bounds = array<i64: 1, 128>}, {pipeline_mode = #tpu.pipeline_mode<synchronous>, transform_indices = @transform_7, window_bounds = array<i64: 128, 128>}, {pipeline_mode = #tpu.pipeline_mode<synchronous>, transform_indices = @transform_8, window_bounds = array<i64: 1, 128>}, {transform_indices = @transform_9, window_bounds = array<i64: 2, 16, 128>}]} {
    %cst = arith.constant 0.000000e+00 : f32
    %0 = vector.broadcast %cst : f32 to vector<8x384xf32>
    %c0 = arith.constant 0 : index
    %c0_0 = arith.constant 0 : index
    %1 = vector.load %arg11[%c0, %c0_0] : memref<32x384xf32, #tpu.memory_space<vmem>>, vector<8x384xf32>
    tpu.vector_store %arg11[%c0, %c0_0], %0 {strides = array<i32>} : memref<32x384xf32, #tpu.memory_space<vmem>>, vector<8x384xf32>,
    %cst_1 = arith.constant 0.000000e+00 : f32
    %2 = vector.broadcast %cst_1 : f32 to vector<8x384xf32>
    %c24 = arith.constant 24 : index
    %c0_2 = arith.constant 0 : index
    %3 = vector.load %arg11[%c24, %c0_2] : memref<32x384xf32, #tpu.memory_space<vmem>>, vector<8x384xf32>
    tpu.vector_store %arg11[%c24, %c0_2], %2 {strides = array<i32>} : memref<32x384xf32, #tpu.memory_space<vmem>>, vector<8x384xf32>,
    %cst_3 = arith.constant 0.000000e+00 : f32
    %4 = vector.broadcast %cst_3 : f32 to vector<16x128xf32>
    %c8 = arith.constant 8 : index
    %c0_4 = arith.constant 0 : index
    %5 = vector.load %arg11[%c8, %c0_4] : memref<32x384xf32, #tpu.memory_space<vmem>>, vector<16x128xf32>
    tpu.vector_store %arg11[%c8, %c0_4], %4 {strides = array<i32>} : memref<32x384xf32, #tpu.memory_space<vmem>>, vector<16x128xf32>,
    %cst_5 = arith.constant 0.000000e+00 : f32
    %6 = vector.broadcast %cst_5 : f32 to vector<16x128xf32>
    %c8_6 = arith.constant 8 : index
    %c256 = arith.constant 256 : index
    %7 = vector.load %arg11[%c8_6, %c256] : memref<32x384xf32, #tpu.memory_space<vmem>>, vector<16x128xf32>
    tpu.vector_store %arg11[%c8_6, %c256], %6 {strides = array<i32>} : memref<32x384xf32, #tpu.memory_space<vmem>>, vector<16x128xf32>,
    %c0_7 = arith.constant 0 : index
    %c0_8 = arith.constant 0 : index
    %c0_9 = arith.constant 0 : index
    %8 = vector.load %arg1[%c0_7, %c0_8, %c0_9] : memref<2x16x128xf32, #tpu.memory_space<vmem>>, vector<2x16x128xf32>
    %9 = vector.extract_strided_slice %8 {offsets = [0, 0, 0], sizes = [1, 16, 128], strides = [1, 1, 1]} : vector<2x16x128xf32> to vector<1x16x128xf32>
    %10 = vector.shape_cast %9 : vector<1x16x128xf32> to vector<16x128xf32>
    %c8_10 = arith.constant 8 : index
    %c128 = arith.constant 128 : index
    %11 = vector.load %arg11[%c8_10, %c128] : memref<32x384xf32, #tpu.memory_space<vmem>>, vector<16x128xf32>
    tpu.vector_store %arg11[%c8_10, %c128], %10 {strides = array<i32>} : memref<32x384xf32, #tpu.memory_space<vmem>>, vector<16x128xf32>,
    %cst_11 = arith.constant 0.000000e+00 : f32
    %12 = vector.broadcast %cst_11 : f32 to vector<16x128xf32>
    %c0_12 = arith.constant 0 : index
    %c112 = arith.constant 112 : index
    %13 = vector.load %arg11[%c0_12, %c112] : memref<32x384xf32, #tpu.memory_space<vmem>>, vector<32x128xf32>
    %c0_13 = arith.constant 0 : index
    %c0_14 = arith.constant 0 : index
    %14 = vector.load %arg2[%c0_13, %c0_14] : memref<25x128xf32, #tpu.memory_space<vmem>>, vector<1x128xf32>
    %15 = vector.extract_strided_slice %13 {offsets = [6, 0], sizes = [16, 128], strides = [1, 1]} : vector<32x128xf32> to vector<16x128xf32>
    %16 = vector.broadcast %14 : vector<1x128xf32> to vector<16x128xf32>
    %17 = arith.mulf %16, %15 : vector<16x128xf32>
    %18 = arith.addf %12, %17 : vector<16x128xf32>
    %c5 = arith.constant 5 : index
    %c0_15 = arith.constant 0 : index
    %19 = vector.load %arg2[%c5, %c0_15] : memref<25x128xf32, #tpu.memory_space<vmem>>, vector<1x128xf32>
    %20 = vector.extract_strided_slice %13 {offsets = [7, 0], sizes = [16, 128], strides = [1, 1]} : vector<32x128xf32> to vector<16x128xf32>
    %21 = vector.broadcast %19 : vector<1x128xf32> to vector<16x128xf32>
    %22 = arith.mulf %21, %20 : vector<16x128xf32>
    %23 = arith.addf %18, %22 : vector<16x128xf32>
    %c10 = arith.constant 10 : index
    %c0_16 = arith.constant 0 : index
    %24 = vector.load %arg2[%c10, %c0_16] : memref<25x128xf32, #tpu.memory_space<vmem>>, vector<1x128xf32>
    %25 = vector.extract_strided_slice %13 {offsets = [8, 0], sizes = [16, 128], strides = [1, 1]} : vector<32x128xf32> to vector<16x128xf32>
    %26 = vector.broadcast %24 : vector<1x128xf32> to vector<16x128xf32>
    %27 = arith.mulf %26, %25 : vector<16x128xf32>
    %28 = arith.addf %23, %27 : vector<16x128xf32>
    %c15 = arith.constant 15 : index
    %c0_17 = arith.constant 0 : index
    %29 = vector.load %arg2[%c15, %c0_17] : memref<25x128xf32, #tpu.memory_space<vmem>>, vector<1x128xf32>
    %30 = vector.extract_strided_slice %13 {offsets = [9, 0], sizes = [16, 128], strides = [1, 1]} : vector<32x128xf32> to vector<16x128xf32>
    %31 = vector.broadcast %29 : vector<1x128xf32> to vector<16x128xf32>
    %32 = arith.mulf %31, %30 : vector<16x128xf32>
    %33 = arith.addf %28, %32 : vector<16x128xf32>
    %c20 = arith.constant 20 : index
    %c0_18 = arith.constant 0 : index
    %34 = vector.load %arg2[%c20, %c0_18] : memref<25x128xf32, #tpu.memory_space<vmem>>, vector<1x128xf32>
    %35 = vector.extract_strided_slice %13 {offsets = [10, 0], sizes = [16, 128], strides = [1, 1]} : vector<32x128xf32> to vector<16x128xf32>
    %36 = vector.broadcast %34 : vector<1x128xf32> to vector<16x128xf32>
    %37 = arith.mulf %36, %35 : vector<16x128xf32>
    %38 = arith.addf %33, %37 : vector<16x128xf32>
    %c0_19 = arith.constant 0 : index
    %c120 = arith.constant 120 : index
    %39 = vector.load %arg11[%c0_19, %c120] : memref<32x384xf32, #tpu.memory_space<vmem>>, vector<32x128xf32>
    %c1 = arith.constant 1 : index
    %c0_20 = arith.constant 0 : index
    %40 = vector.load %arg2[%c1, %c0_20] : memref<25x128xf32, #tpu.memory_space<vmem>>, vector<1x128xf32>
    %41 = vector.extract_strided_slice %39 {offsets = [6, 0], sizes = [16, 128], strides = [1, 1]} : vector<32x128xf32> to vector<16x128xf32>
    %42 = vector.broadcast %40 : vector<1x128xf32> to vector<16x128xf32>
    %43 = arith.mulf %42, %41 : vector<16x128xf32>
    %44 = arith.addf %38, %43 : vector<16x128xf32>
    %c6 = arith.constant 6 : index
    %c0_21 = arith.constant 0 : index
    %45 = vector.load %arg2[%c6, %c0_21] : memref<25x128xf32, #tpu.memory_space<vmem>>, vector<1x128xf32>
    %46 = vector.extract_strided_slice %39 {offsets = [7, 0], sizes = [16, 128], strides = [1, 1]} : vector<32x128xf32> to vector<16x128xf32>
    %47 = vector.broadcast %45 : vector<1x128xf32> to vector<16x128xf32>
    %48 = arith.mulf %47, %46 : vector<16x128xf32>
    %49 = arith.addf %44, %48 : vector<16x128xf32>
    %c11 = arith.constant 11 : index
    %c0_22 = arith.constant 0 : index
    %50 = vector.load %arg2[%c11, %c0_22] : memref<25x128xf32, #tpu.memory_space<vmem>>, vector<1x128xf32>
    %51 = vector.extract_strided_slice %39 {offsets = [8, 0], sizes = [16, 128], strides = [1, 1]} : vector<32x128xf32> to vector<16x128xf32>
    %52 = vector.broadcast %50 : vector<1x128xf32> to vector<16x128xf32>
    %53 = arith.mulf %52, %51 : vector<16x128xf32>
    %54 = arith.addf %49, %53 : vector<16x128xf32>
    %c16 = arith.constant 16 : index
    %c0_23 = arith.constant 0 : index
    %55 = vector.load %arg2[%c16, %c0_23] : memref<25x128xf32, #tpu.memory_space<vmem>>, vector<1x128xf32>
    %56 = vector.extract_strided_slice %39 {offsets = [9, 0], sizes = [16, 128], strides = [1, 1]} : vector<32x128xf32> to vector<16x128xf32>
    %57 = vector.broadcast %55 : vector<1x128xf32> to vector<16x128xf32>
    %58 = arith.mulf %57, %56 : vector<16x128xf32>
    %59 = arith.addf %54, %58 : vector<16x128xf32>
    %c21 = arith.constant 21 : index
    %c0_24 = arith.constant 0 : index
    %60 = vector.load %arg2[%c21, %c0_24] : memref<25x128xf32, #tpu.memory_space<vmem>>, vector<1x128xf32>
    %61 = vector.extract_strided_slice %39 {offsets = [10, 0], sizes = [16, 128], strides = [1, 1]} : vector<32x128xf32> to vector<16x128xf32>
    %62 = vector.broadcast %60 : vector<1x128xf32> to vector<16x128xf32>
    %63 = arith.mulf %62, %61 : vector<16x128xf32>
    %64 = arith.addf %59, %63 : vector<16x128xf32>
    %c0_25 = arith.constant 0 : index
    %c128_26 = arith.constant 128 : index
    %65 = vector.load %arg11[%c0_25, %c128_26] : memref<32x384xf32, #tpu.memory_space<vmem>>, vector<32x128xf32>
    %c2 = arith.constant 2 : index
    %c0_27 = arith.constant 0 : index
    %66 = vector.load %arg2[%c2, %c0_27] : memref<25x128xf32, #tpu.memory_space<vmem>>, vector<1x128xf32>
    %67 = vector.extract_strided_slice %65 {offsets = [6, 0], sizes = [16, 128], strides = [1, 1]} : vector<32x128xf32> to vector<16x128xf32>
    %68 = vector.broadcast %66 : vector<1x128xf32> to vector<16x128xf32>
    %69 = arith.mulf %68, %67 : vector<16x128xf32>
    %70 = arith.addf %64, %69 : vector<16x128xf32>
    %c7 = arith.constant 7 : index
    %c0_28 = arith.constant 0 : index
    %71 = vector.load %arg2[%c7, %c0_28] : memref<25x128xf32, #tpu.memory_space<vmem>>, vector<1x128xf32>
    %72 = vector.extract_strided_slice %65 {offsets = [7, 0], sizes = [16, 128], strides = [1, 1]} : vector<32x128xf32> to vector<16x128xf32>
    %73 = vector.broadcast %71 : vector<1x128xf32> to vector<16x128xf32>
    %74 = arith.mulf %73, %72 : vector<16x128xf32>
    %75 = arith.addf %70, %74 : vector<16x128xf32>
    %c12 = arith.constant 12 : index
    %c0_29 = arith.constant 0 : index
    %76 = vector.load %arg2[%c12, %c0_29] : memref<25x128xf32, #tpu.memory_space<vmem>>, vector<1x128xf32>
    %77 = vector.extract_strided_slice %65 {offsets = [8, 0], sizes = [16, 128], strides = [1, 1]} : vector<32x128xf32> to vector<16x128xf32>
    %78 = vector.broadcast %76 : vector<1x128xf32> to vector<16x128xf32>
    %79 = arith.mulf %78, %77 : vector<16x128xf32>
    %80 = arith.addf %75, %79 : vector<16x128xf32>
    %c17 = arith.constant 17 : index
    %c0_30 = arith.constant 0 : index
    %81 = vector.load %arg2[%c17, %c0_30] : memref<25x128xf32, #tpu.memory_space<vmem>>, vector<1x128xf32>
    %82 = vector.extract_strided_slice %65 {offsets = [9, 0], sizes = [16, 128], strides = [1, 1]} : vector<32x128xf32> to vector<16x128xf32>
    %83 = vector.broadcast %81 : vector<1x128xf32> to vector<16x128xf32>
    %84 = arith.mulf %83, %82 : vector<16x128xf32>
    %85 = arith.addf %80, %84 : vector<16x128xf32>
    %c22 = arith.constant 22 : index
    %c0_31 = arith.constant 0 : index
    %86 = vector.load %arg2[%c22, %c0_31] : memref<25x128xf32, #tpu.memory_space<vmem>>, vector<1x128xf32>
    %87 = vector.extract_strided_slice %65 {offsets = [10, 0], sizes = [16, 128], strides = [1, 1]} : vector<32x128xf32> to vector<16x128xf32>
    %88 = vector.broadcast %86 : vector<1x128xf32> to vector<16x128xf32>
    %89 = arith.mulf %88, %87 : vector<16x128xf32>
    %90 = arith.addf %85, %89 : vector<16x128xf32>
    %c0_32 = arith.constant 0 : index
    %c136 = arith.constant 136 : index
    %91 = vector.load %arg11[%c0_32, %c136] : memref<32x384xf32, #tpu.memory_space<vmem>>, vector<32x128xf32>
    %c3 = arith.constant 3 : index
    %c0_33 = arith.constant 0 : index
    %92 = vector.load %arg2[%c3, %c0_33] : memref<25x128xf32, #tpu.memory_space<vmem>>, vector<1x128xf32>
    %93 = vector.extract_strided_slice %91 {offsets = [6, 0], sizes = [16, 128], strides = [1, 1]} : vector<32x128xf32> to vector<16x128xf32>
    %94 = vector.broadcast %92 : vector<1x128xf32> to vector<16x128xf32>
    %95 = arith.mulf %94, %93 : vector<16x128xf32>
    %96 = arith.addf %90, %95 : vector<16x128xf32>
    %c8_34 = arith.constant 8 : index
    %c0_35 = arith.constant 0 : index
    %97 = vector.load %arg2[%c8_34, %c0_35] : memref<25x128xf32, #tpu.memory_space<vmem>>, vector<1x128xf32>
    %98 = vector.extract_strided_slice %91 {offsets = [7, 0], sizes = [16, 128], strides = [1, 1]} : vector<32x128xf32> to vector<16x128xf32>
    %99 = vector.broadcast %97 : vector<1x128xf32> to vector<16x128xf32>
    %100 = arith.mulf %99, %98 : vector<16x128xf32>
    %101 = arith.addf %96, %100 : vector<16x128xf32>
    %c13 = arith.constant 13 : index
    %c0_36 = arith.constant 0 : index
    %102 = vector.load %arg2[%c13, %c0_36] : memref<25x128xf32, #tpu.memory_space<vmem>>, vector<1x128xf32>
    %103 = vector.extract_strided_slice %91 {offsets = [8, 0], sizes = [16, 128], strides = [1, 1]} : vector<32x128xf32> to vector<16x128xf32>
    %104 = vector.broadcast %102 : vector<1x128xf32> to vector<16x128xf32>
    %105 = arith.mulf %104, %103 : vector<16x128xf32>
    %106 = arith.addf %101, %105 : vector<16x128xf32>
    %c18 = arith.constant 18 : index
    %c0_37 = arith.constant 0 : index
    %107 = vector.load %arg2[%c18, %c0_37] : memref<25x128xf32, #tpu.memory_space<vmem>>, vector<1x128xf32>
    %108 = vector.extract_strided_slice %91 {offsets = [9, 0], sizes = [16, 128], strides = [1, 1]} : vector<32x128xf32> to vector<16x128xf32>
    %109 = vector.broadcast %107 : vector<1x128xf32> to vector<16x128xf32>
    %110 = arith.mulf %109, %108 : vector<16x128xf32>
    %111 = arith.addf %106, %110 : vector<16x128xf32>
    %c23 = arith.constant 23 : index
    %c0_38 = arith.constant 0 : index
    %112 = vector.load %arg2[%c23, %c0_38] : memref<25x128xf32, #tpu.memory_space<vmem>>, vector<1x128xf32>
    %113 = vector.extract_strided_slice %91 {offsets = [10, 0], sizes = [16, 128], strides = [1, 1]} : vector<32x128xf32> to vector<16x128xf32>
    %114 = vector.broadcast %112 : vector<1x128xf32> to vector<16x128xf32>
    %115 = arith.mulf %114, %113 : vector<16x128xf32>
    %116 = arith.addf %111, %115 : vector<16x128xf32>
    %c0_39 = arith.constant 0 : index
    %c144 = arith.constant 144 : index
    %117 = vector.load %arg11[%c0_39, %c144] : memref<32x384xf32, #tpu.memory_space<vmem>>, vector<32x128xf32>
    %c4 = arith.constant 4 : index
    %c0_40 = arith.constant 0 : index
    %118 = vector.load %arg2[%c4, %c0_40] : memref<25x128xf32, #tpu.memory_space<vmem>>, vector<1x128xf32>
    %119 = vector.extract_strided_slice %117 {offsets = [6, 0], sizes = [16, 128], strides = [1, 1]} : vector<32x128xf32> to vector<16x128xf32>
    %120 = vector.broadcast %118 : vector<1x128xf32> to vector<16x128xf32>
    %121 = arith.mulf %120, %119 : vector<16x128xf32>
    %122 = arith.addf %116, %121 : vector<16x128xf32>
    %c9 = arith.constant 9 : index
    %c0_41 = arith.constant 0 : index
    %123 = vector.load %arg2[%c9, %c0_41] : memref<25x128xf32, #tpu.memory_space<vmem>>, vector<1x128xf32>
    %124 = vector.extract_strided_slice %117 {offsets = [7, 0], sizes = [16, 128], strides = [1, 1]} : vector<32x128xf32> to vector<16x128xf32>
    %125 = vector.broadcast %123 : vector<1x128xf32> to vector<16x128xf32>
    %126 = arith.mulf %125, %124 : vector<16x128xf32>
    %127 = arith.addf %122, %126 : vector<16x128xf32>
    %c14 = arith.constant 14 : index
    %c0_42 = arith.constant 0 : index
    %128 = vector.load %arg2[%c14, %c0_42] : memref<25x128xf32, #tpu.memory_space<vmem>>, vector<1x128xf32>
    %129 = vector.extract_strided_slice %117 {offsets = [8, 0], sizes = [16, 128], strides = [1, 1]} : vector<32x128xf32> to vector<16x128xf32>
    %130 = vector.broadcast %128 : vector<1x128xf32> to vector<16x128xf32>
    %131 = arith.mulf %130, %129 : vector<16x128xf32>
    %132 = arith.addf %127, %131 : vector<16x128xf32>
    %c19 = arith.constant 19 : index
    %c0_43 = arith.constant 0 : index
    %133 = vector.load %arg2[%c19, %c0_43] : memref<25x128xf32, #tpu.memory_space<vmem>>, vector<1x128xf32>
    %134 = vector.extract_strided_slice %117 {offsets = [9, 0], sizes = [16, 128], strides = [1, 1]} : vector<32x128xf32> to vector<16x128xf32>
    %135 = vector.broadcast %133 : vector<1x128xf32> to vector<16x128xf32>
    %136 = arith.mulf %135, %134 : vector<16x128xf32>
    %137 = arith.addf %132, %136 : vector<16x128xf32>
    %c24_44 = arith.constant 24 : index
    %c0_45 = arith.constant 0 : index
    %138 = vector.load %arg2[%c24_44, %c0_45] : memref<25x128xf32, #tpu.memory_space<vmem>>, vector<1x128xf32>
    %139 = vector.extract_strided_slice %117 {offsets = [10, 0], sizes = [16, 128], strides = [1, 1]} : vector<32x128xf32> to vector<16x128xf32>
    %140 = vector.broadcast %138 : vector<1x128xf32> to vector<16x128xf32>
    %141 = arith.mulf %140, %139 : vector<16x128xf32>
    %142 = arith.addf %137, %141 : vector<16x128xf32>
    %c0_46 = arith.constant 0 : index
    %c0_47 = arith.constant 0 : index
    %143 = vector.load %arg3[%c0_46, %c0_47] : memref<1x128xf32, #tpu.memory_space<vmem>>, vector<1x128xf32>
    %144 = vector.broadcast %143 : vector<1x128xf32> to vector<16x128xf32>
    %145 = arith.addf %142, %144 : vector<16x128xf32>
    %c8_48 = arith.constant 8 : index
    %c128_49 = arith.constant 128 : index
    %146 = vector.load %arg11[%c8_48, %c128_49] : memref<32x384xf32, #tpu.memory_space<vmem>>, vector<16x128xf32>
    tpu.vector_store %arg11[%c8_48, %c128_49], %145 {strides = array<i32>} : memref<32x384xf32, #tpu.memory_space<vmem>>, vector<16x128xf32>,
    %cst_50 = arith.constant 0.000000e+00 : f32
    %147 = vector.broadcast %cst_50 : f32 to vector<16x128xf32>
    %c8_51 = arith.constant 8 : index
    %c104 = arith.constant 104 : index
    %148 = vector.load %arg11[%c8_51, %c104] : memref<32x384xf32, #tpu.memory_space<vmem>>, vector<16x128xf32>
    %c0_52 = arith.constant 0 : index
    %c0_53 = arith.constant 0 : index
    %149 = vector.load %arg4[%c0_52, %c0_53] : memref<7x128xf32, #tpu.memory_space<vmem>>, vector<1x128xf32>
    %150 = vector.broadcast %149 : vector<1x128xf32> to vector<16x128xf32>
    %151 = arith.mulf %150, %148 : vector<16x128xf32>
    %152 = arith.addf %147, %151 : vector<16x128xf32>
    %c8_54 = arith.constant 8 : index
    %c112_55 = arith.constant 112 : index
    %153 = vector.load %arg11[%c8_54, %c112_55] : memref<32x384xf32, #tpu.memory_space<vmem>>, vector<16x128xf32>
    %c1_56 = arith.constant 1 : index
    %c0_57 = arith.constant 0 : index
    %154 = vector.load %arg4[%c1_56, %c0_57] : memref<7x128xf32, #tpu.memory_space<vmem>>, vector<1x128xf32>
    %155 = vector.broadcast %154 : vector<1x128xf32> to vector<16x128xf32>
    %156 = arith.mulf %155, %153 : vector<16x128xf32>
    %157 = arith.addf %152, %156 : vector<16x128xf32>
    %c8_58 = arith.constant 8 : index
    %c120_59 = arith.constant 120 : index
    %158 = vector.load %arg11[%c8_58, %c120_59] : memref<32x384xf32, #tpu.memory_space<vmem>>, vector<16x128xf32>
    %c2_60 = arith.constant 2 : index
    %c0_61 = arith.constant 0 : index
    %159 = vector.load %arg4[%c2_60, %c0_61] : memref<7x128xf32, #tpu.memory_space<vmem>>, vector<1x128xf32>
    %160 = vector.broadcast %159 : vector<1x128xf32> to vector<16x128xf32>
    %161 = arith.mulf %160, %158 : vector<16x128xf32>
    %162 = arith.addf %157, %161 : vector<16x128xf32>
    %c8_62 = arith.constant 8 : index
    %c128_63 = arith.constant 128 : index
    %163 = vector.load %arg11[%c8_62, %c128_63] : memref<32x384xf32, #tpu.memory_space<vmem>>, vector<16x128xf32>
    %c3_64 = arith.constant 3 : index
    %c0_65 = arith.constant 0 : index
    %164 = vector.load %arg4[%c3_64, %c0_65] : memref<7x128xf32, #tpu.memory_space<vmem>>, vector<1x128xf32>
    %165 = vector.broadcast %164 : vector<1x128xf32> to vector<16x128xf32>
    %166 = arith.mulf %165, %163 : vector<16x128xf32>
    %167 = arith.addf %162, %166 : vector<16x128xf32>
    %c8_66 = arith.constant 8 : index
    %c136_67 = arith.constant 136 : index
    %168 = vector.load %arg11[%c8_66, %c136_67] : memref<32x384xf32, #tpu.memory_space<vmem>>, vector<16x128xf32>
    %c4_68 = arith.constant 4 : index
    %c0_69 = arith.constant 0 : index
    %169 = vector.load %arg4[%c4_68, %c0_69] : memref<7x128xf32, #tpu.memory_space<vmem>>, vector<1x128xf32>
    %170 = vector.broadcast %169 : vector<1x128xf32> to vector<16x128xf32>
    %171 = arith.mulf %170, %168 : vector<16x128xf32>
    %172 = arith.addf %167, %171 : vector<16x128xf32>
    %c8_70 = arith.constant 8 : index
    %c144_71 = arith.constant 144 : index
    %173 = vector.load %arg11[%c8_70, %c144_71] : memref<32x384xf32, #tpu.memory_space<vmem>>, vector<16x128xf32>
    %c5_72 = arith.constant 5 : index
    %c0_73 = arith.constant 0 : index
    %174 = vector.load %arg4[%c5_72, %c0_73] : memref<7x128xf32, #tpu.memory_space<vmem>>, vector<1x128xf32>
    %175 = vector.broadcast %174 : vector<1x128xf32> to vector<16x128xf32>
    %176 = arith.mulf %175, %173 : vector<16x128xf32>
    %177 = arith.addf %172, %176 : vector<16x128xf32>
    %c8_74 = arith.constant 8 : index
    %c152 = arith.constant 152 : index
    %178 = vector.load %arg11[%c8_74, %c152] : memref<32x384xf32, #tpu.memory_space<vmem>>, vector<16x128xf32>
    %c6_75 = arith.constant 6 : index
    %c0_76 = arith.constant 0 : index
    %179 = vector.load %arg4[%c6_75, %c0_76] : memref<7x128xf32, #tpu.memory_space<vmem>>, vector<1x128xf32>
    %180 = vector.broadcast %179 : vector<1x128xf32> to vector<16x128xf32>
    %181 = arith.mulf %180, %178 : vector<16x128xf32>
    %182 = arith.addf %177, %181 : vector<16x128xf32>
    %c0_77 = arith.constant 0 : index
    %c0_78 = arith.constant 0 : index
    %183 = vector.load %arg5[%c0_77, %c0_78] : memref<1x128xf32, #tpu.memory_space<vmem>>, vector<1x128xf32>
    %184 = vector.broadcast %183 : vector<1x128xf32> to vector<16x128xf32>
    %185 = arith.addf %182, %184 : vector<16x128xf32>
    %c8_79 = arith.constant 8 : index
    %c128_80 = arith.constant 128 : index
    %186 = vector.load %arg11[%c8_79, %c128_80] : memref<32x384xf32, #tpu.memory_space<vmem>>, vector<16x128xf32>
    tpu.vector_store %arg11[%c8_79, %c128_80], %185 {strides = array<i32>} : memref<32x384xf32, #tpu.memory_space<vmem>>, vector<16x128xf32>,
    %cst_81 = arith.constant 0.000000e+00 : f32
    %187 = vector.broadcast %cst_81 : f32 to vector<16x128xf32>
    %c0_82 = arith.constant 0 : index
    %c128_83 = arith.constant 128 : index
    %188 = vector.load %arg11[%c0_82, %c128_83] : memref<32x384xf32, #tpu.memory_space<vmem>>, vector<32x128xf32>
    %c0_84 = arith.constant 0 : index
    %c0_85 = arith.constant 0 : index
    %189 = vector.load %arg6[%c0_84, %c0_85] : memref<7x128xf32, #tpu.memory_space<vmem>>, vector<1x128xf32>
    %190 = vector.extract_strided_slice %188 {offsets = [5, 0], sizes = [16, 128], strides = [1, 1]} : vector<32x128xf32> to vector<16x128xf32>
    %191 = vector.broadcast %189 : vector<1x128xf32> to vector<16x128xf32>
    %192 = arith.mulf %191, %190 : vector<16x128xf32>
    %193 = arith.addf %187, %192 : vector<16x128xf32>
    %c1_86 = arith.constant 1 : index
    %c0_87 = arith.constant 0 : index
    %194 = vector.load %arg6[%c1_86, %c0_87] : memref<7x128xf32, #tpu.memory_space<vmem>>, vector<1x128xf32>
    %195 = vector.extract_strided_slice %188 {offsets = [6, 0], sizes = [16, 128], strides = [1, 1]} : vector<32x128xf32> to vector<16x128xf32>
    %196 = vector.broadcast %194 : vector<1x128xf32> to vector<16x128xf32>
    %197 = arith.mulf %196, %195 : vector<16x128xf32>
    %198 = arith.addf %193, %197 : vector<16x128xf32>
    %c2_88 = arith.constant 2 : index
    %c0_89 = arith.constant 0 : index
    %199 = vector.load %arg6[%c2_88, %c0_89] : memref<7x128xf32, #tpu.memory_space<vmem>>, vector<1x128xf32>
    %200 = vector.extract_strided_slice %188 {offsets = [7, 0], sizes = [16, 128], strides = [1, 1]} : vector<32x128xf32> to vector<16x128xf32>
    %201 = vector.broadcast %199 : vector<1x128xf32> to vector<16x128xf32>
    %202 = arith.mulf %201, %200 : vector<16x128xf32>
    %203 = arith.addf %198, %202 : vector<16x128xf32>
    %c3_90 = arith.constant 3 : index
    %c0_91 = arith.constant 0 : index
    %204 = vector.load %arg6[%c3_90, %c0_91] : memref<7x128xf32, #tpu.memory_space<vmem>>, vector<1x128xf32>
    %205 = vector.extract_strided_slice %188 {offsets = [8, 0], sizes = [16, 128], strides = [1, 1]} : vector<32x128xf32> to vector<16x128xf32>
    %206 = vector.broadcast %204 : vector<1x128xf32> to vector<16x128xf32>
    %207 = arith.mulf %206, %205 : vector<16x128xf32>
    %208 = arith.addf %203, %207 : vector<16x128xf32>
    %c4_92 = arith.constant 4 : index
    %c0_93 = arith.constant 0 : index
    %209 = vector.load %arg6[%c4_92, %c0_93] : memref<7x128xf32, #tpu.memory_space<vmem>>, vector<1x128xf32>
    %210 = vector.extract_strided_slice %188 {offsets = [9, 0], sizes = [16, 128], strides = [1, 1]} : vector<32x128xf32> to vector<16x128xf32>
    %211 = vector.broadcast %209 : vector<1x128xf32> to vector<16x128xf32>
    %212 = arith.mulf %211, %210 : vector<16x128xf32>
    %213 = arith.addf %208, %212 : vector<16x128xf32>
    %c5_94 = arith.constant 5 : index
    %c0_95 = arith.constant 0 : index
    %214 = vector.load %arg6[%c5_94, %c0_95] : memref<7x128xf32, #tpu.memory_space<vmem>>, vector<1x128xf32>
    %215 = vector.extract_strided_slice %188 {offsets = [10, 0], sizes = [16, 128], strides = [1, 1]} : vector<32x128xf32> to vector<16x128xf32>
    %216 = vector.broadcast %214 : vector<1x128xf32> to vector<16x128xf32>
    %217 = arith.mulf %216, %215 : vector<16x128xf32>
    %218 = arith.addf %213, %217 : vector<16x128xf32>
    %c6_96 = arith.constant 6 : index
    %c0_97 = arith.constant 0 : index
    %219 = vector.load %arg6[%c6_96, %c0_97] : memref<7x128xf32, #tpu.memory_space<vmem>>, vector<1x128xf32>
    %220 = vector.extract_strided_slice %188 {offsets = [11, 0], sizes = [16, 128], strides = [1, 1]} : vector<32x128xf32> to vector<16x128xf32>
    %221 = vector.broadcast %219 : vector<1x128xf32> to vector<16x128xf32>
    %222 = arith.mulf %221, %220 : vector<16x128xf32>
    %223 = arith.addf %218, %222 : vector<16x128xf32>
    %c0_98 = arith.constant 0 : index
    %c0_99 = arith.constant 0 : index
    %224 = vector.load %arg7[%c0_98, %c0_99] : memref<1x128xf32, #tpu.memory_space<vmem>>, vector<1x128xf32>
    %225 = vector.broadcast %224 : vector<1x128xf32> to vector<16x128xf32>
    %226 = arith.addf %223, %225 : vector<16x128xf32>
    %227 = vector.extract_strided_slice %8 {offsets = [1, 0, 0], sizes = [1, 16, 128], strides = [1, 1, 1]} : vector<2x16x128xf32> to vector<1x16x128xf32>
    %228 = vector.shape_cast %227 : vector<1x16x128xf32> to vector<16x128xf32>
    %c8_100 = arith.constant 8 : index
    %c128_101 = arith.constant 128 : index
    %229 = vector.load %arg11[%c8_100, %c128_101] : memref<32x384xf32, #tpu.memory_space<vmem>>, vector<16x128xf32>
    tpu.vector_store %arg11[%c8_100, %c128_101], %228 {strides = array<i32>} : memref<32x384xf32, #tpu.memory_space<vmem>>, vector<16x128xf32>,
    %cst_102 = arith.constant 0.000000e+00 : f32
    %230 = vector.broadcast %cst_102 : f32 to vector<16x128xf32>
    %c0_103 = arith.constant 0 : index
    %c112_104 = arith.constant 112 : index
    %231 = vector.load %arg11[%c0_103, %c112_104] : memref<32x384xf32, #tpu.memory_space<vmem>>, vector<32x128xf32>
    %c0_105 = arith.constant 0 : index
    %c0_106 = arith.constant 0 : index
    %232 = vector.load %arg2[%c0_105, %c0_106] : memref<25x128xf32, #tpu.memory_space<vmem>>, vector<1x128xf32>
    %233 = vector.extract_strided_slice %231 {offsets = [6, 0], sizes = [16, 128], strides = [1, 1]} : vector<32x128xf32> to vector<16x128xf32>
    %234 = vector.broadcast %232 : vector<1x128xf32> to vector<16x128xf32>
    %235 = arith.mulf %234, %233 : vector<16x128xf32>
    %236 = arith.addf %230, %235 : vector<16x128xf32>
    %c5_107 = arith.constant 5 : index
    %c0_108 = arith.constant 0 : index
    %237 = vector.load %arg2[%c5_107, %c0_108] : memref<25x128xf32, #tpu.memory_space<vmem>>, vector<1x128xf32>
    %238 = vector.extract_strided_slice %231 {offsets = [7, 0], sizes = [16, 128], strides = [1, 1]} : vector<32x128xf32> to vector<16x128xf32>
    %239 = vector.broadcast %237 : vector<1x128xf32> to vector<16x128xf32>
    %240 = arith.mulf %239, %238 : vector<16x128xf32>
    %241 = arith.addf %236, %240 : vector<16x128xf32>
    %c10_109 = arith.constant 10 : index
    %c0_110 = arith.constant 0 : index
    %242 = vector.load %arg2[%c10_109, %c0_110] : memref<25x128xf32, #tpu.memory_space<vmem>>, vector<1x128xf32>
    %243 = vector.extract_strided_slice %231 {offsets = [8, 0], sizes = [16, 128], strides = [1, 1]} : vector<32x128xf32> to vector<16x128xf32>
    %244 = vector.broadcast %242 : vector<1x128xf32> to vector<16x128xf32>
    %245 = arith.mulf %244, %243 : vector<16x128xf32>
    %246 = arith.addf %241, %245 : vector<16x128xf32>
    %c15_111 = arith.constant 15 : index
    %c0_112 = arith.constant 0 : index
    %247 = vector.load %arg2[%c15_111, %c0_112] : memref<25x128xf32, #tpu.memory_space<vmem>>, vector<1x128xf32>
    %248 = vector.extract_strided_slice %231 {offsets = [9, 0], sizes = [16, 128], strides = [1, 1]} : vector<32x128xf32> to vector<16x128xf32>
    %249 = vector.broadcast %247 : vector<1x128xf32> to vector<16x128xf32>
    %250 = arith.mulf %249, %248 : vector<16x128xf32>
    %251 = arith.addf %246, %250 : vector<16x128xf32>
    %c20_113 = arith.constant 20 : index
    %c0_114 = arith.constant 0 : index
    %252 = vector.load %arg2[%c20_113, %c0_114] : memref<25x128xf32, #tpu.memory_space<vmem>>, vector<1x128xf32>
    %253 = vector.extract_strided_slice %231 {offsets = [10, 0], sizes = [16, 128], strides = [1, 1]} : vector<32x128xf32> to vector<16x128xf32>
    %254 = vector.broadcast %252 : vector<1x128xf32> to vector<16x128xf32>
    %255 = arith.mulf %254, %253 : vector<16x128xf32>
    %256 = arith.addf %251, %255 : vector<16x128xf32>
    %c0_115 = arith.constant 0 : index
    %c120_116 = arith.constant 120 : index
    %257 = vector.load %arg11[%c0_115, %c120_116] : memref<32x384xf32, #tpu.memory_space<vmem>>, vector<32x128xf32>
    %c1_117 = arith.constant 1 : index
    %c0_118 = arith.constant 0 : index
    %258 = vector.load %arg2[%c1_117, %c0_118] : memref<25x128xf32, #tpu.memory_space<vmem>>, vector<1x128xf32>
    %259 = vector.extract_strided_slice %257 {offsets = [6, 0], sizes = [16, 128], strides = [1, 1]} : vector<32x128xf32> to vector<16x128xf32>
    %260 = vector.broadcast %258 : vector<1x128xf32> to vector<16x128xf32>
    %261 = arith.mulf %260, %259 : vector<16x128xf32>
    %262 = arith.addf %256, %261 : vector<16x128xf32>
    %c6_119 = arith.constant 6 : index
    %c0_120 = arith.constant 0 : index
    %263 = vector.load %arg2[%c6_119, %c0_120] : memref<25x128xf32, #tpu.memory_space<vmem>>, vector<1x128xf32>
    %264 = vector.extract_strided_slice %257 {offsets = [7, 0], sizes = [16, 128], strides = [1, 1]} : vector<32x128xf32> to vector<16x128xf32>
    %265 = vector.broadcast %263 : vector<1x128xf32> to vector<16x128xf32>
    %266 = arith.mulf %265, %264 : vector<16x128xf32>
    %267 = arith.addf %262, %266 : vector<16x128xf32>
    %c11_121 = arith.constant 11 : index
    %c0_122 = arith.constant 0 : index
    %268 = vector.load %arg2[%c11_121, %c0_122] : memref<25x128xf32, #tpu.memory_space<vmem>>, vector<1x128xf32>
    %269 = vector.extract_strided_slice %257 {offsets = [8, 0], sizes = [16, 128], strides = [1, 1]} : vector<32x128xf32> to vector<16x128xf32>
    %270 = vector.broadcast %268 : vector<1x128xf32> to vector<16x128xf32>
    %271 = arith.mulf %270, %269 : vector<16x128xf32>
    %272 = arith.addf %267, %271 : vector<16x128xf32>
    %c16_123 = arith.constant 16 : index
    %c0_124 = arith.constant 0 : index
    %273 = vector.load %arg2[%c16_123, %c0_124] : memref<25x128xf32, #tpu.memory_space<vmem>>, vector<1x128xf32>
    %274 = vector.extract_strided_slice %257 {offsets = [9, 0], sizes = [16, 128], strides = [1, 1]} : vector<32x128xf32> to vector<16x128xf32>
    %275 = vector.broadcast %273 : vector<1x128xf32> to vector<16x128xf32>
    %276 = arith.mulf %275, %274 : vector<16x128xf32>
    %277 = arith.addf %272, %276 : vector<16x128xf32>
    %c21_125 = arith.constant 21 : index
    %c0_126 = arith.constant 0 : index
    %278 = vector.load %arg2[%c21_125, %c0_126] : memref<25x128xf32, #tpu.memory_space<vmem>>, vector<1x128xf32>
    %279 = vector.extract_strided_slice %257 {offsets = [10, 0], sizes = [16, 128], strides = [1, 1]} : vector<32x128xf32> to vector<16x128xf32>
    %280 = vector.broadcast %278 : vector<1x128xf32> to vector<16x128xf32>
    %281 = arith.mulf %280, %279 : vector<16x128xf32>
    %282 = arith.addf %277, %281 : vector<16x128xf32>
    %c0_127 = arith.constant 0 : index
    %c128_128 = arith.constant 128 : index
    %283 = vector.load %arg11[%c0_127, %c128_128] : memref<32x384xf32, #tpu.memory_space<vmem>>, vector<32x128xf32>
    %c2_129 = arith.constant 2 : index
    %c0_130 = arith.constant 0 : index
    %284 = vector.load %arg2[%c2_129, %c0_130] : memref<25x128xf32, #tpu.memory_space<vmem>>, vector<1x128xf32>
    %285 = vector.extract_strided_slice %283 {offsets = [6, 0], sizes = [16, 128], strides = [1, 1]} : vector<32x128xf32> to vector<16x128xf32>
    %286 = vector.broadcast %284 : vector<1x128xf32> to vector<16x128xf32>
    %287 = arith.mulf %286, %285 : vector<16x128xf32>
    %288 = arith.addf %282, %287 : vector<16x128xf32>
    %c7_131 = arith.constant 7 : index
    %c0_132 = arith.constant 0 : index
    %289 = vector.load %arg2[%c7_131, %c0_132] : memref<25x128xf32, #tpu.memory_space<vmem>>, vector<1x128xf32>
    %290 = vector.extract_strided_slice %283 {offsets = [7, 0], sizes = [16, 128], strides = [1, 1]} : vector<32x128xf32> to vector<16x128xf32>
    %291 = vector.broadcast %289 : vector<1x128xf32> to vector<16x128xf32>
    %292 = arith.mulf %291, %290 : vector<16x128xf32>
    %293 = arith.addf %288, %292 : vector<16x128xf32>
    %c12_133 = arith.constant 12 : index
    %c0_134 = arith.constant 0 : index
    %294 = vector.load %arg2[%c12_133, %c0_134] : memref<25x128xf32, #tpu.memory_space<vmem>>, vector<1x128xf32>
    %295 = vector.extract_strided_slice %283 {offsets = [8, 0], sizes = [16, 128], strides = [1, 1]} : vector<32x128xf32> to vector<16x128xf32>
    %296 = vector.broadcast %294 : vector<1x128xf32> to vector<16x128xf32>
    %297 = arith.mulf %296, %295 : vector<16x128xf32>
    %298 = arith.addf %293, %297 : vector<16x128xf32>
    %c17_135 = arith.constant 17 : index
    %c0_136 = arith.constant 0 : index
    %299 = vector.load %arg2[%c17_135, %c0_136] : memref<25x128xf32, #tpu.memory_space<vmem>>, vector<1x128xf32>
    %300 = vector.extract_strided_slice %283 {offsets = [9, 0], sizes = [16, 128], strides = [1, 1]} : vector<32x128xf32> to vector<16x128xf32>
    %301 = vector.broadcast %299 : vector<1x128xf32> to vector<16x128xf32>
    %302 = arith.mulf %301, %300 : vector<16x128xf32>
    %303 = arith.addf %298, %302 : vector<16x128xf32>
    %c22_137 = arith.constant 22 : index
    %c0_138 = arith.constant 0 : index
    %304 = vector.load %arg2[%c22_137, %c0_138] : memref<25x128xf32, #tpu.memory_space<vmem>>, vector<1x128xf32>
    %305 = vector.extract_strided_slice %283 {offsets = [10, 0], sizes = [16, 128], strides = [1, 1]} : vector<32x128xf32> to vector<16x128xf32>
    %306 = vector.broadcast %304 : vector<1x128xf32> to vector<16x128xf32>
    %307 = arith.mulf %306, %305 : vector<16x128xf32>
    %308 = arith.addf %303, %307 : vector<16x128xf32>
    %c0_139 = arith.constant 0 : index
    %c136_140 = arith.constant 136 : index
    %309 = vector.load %arg11[%c0_139, %c136_140] : memref<32x384xf32, #tpu.memory_space<vmem>>, vector<32x128xf32>
    %c3_141 = arith.constant 3 : index
    %c0_142 = arith.constant 0 : index
    %310 = vector.load %arg2[%c3_141, %c0_142] : memref<25x128xf32, #tpu.memory_space<vmem>>, vector<1x128xf32>
    %311 = vector.extract_strided_slice %309 {offsets = [6, 0], sizes = [16, 128], strides = [1, 1]} : vector<32x128xf32> to vector<16x128xf32>
    %312 = vector.broadcast %310 : vector<1x128xf32> to vector<16x128xf32>
    %313 = arith.mulf %312, %311 : vector<16x128xf32>
    %314 = arith.addf %308, %313 : vector<16x128xf32>
    %c8_143 = arith.constant 8 : index
    %c0_144 = arith.constant 0 : index
    %315 = vector.load %arg2[%c8_143, %c0_144] : memref<25x128xf32, #tpu.memory_space<vmem>>, vector<1x128xf32>
    %316 = vector.extract_strided_slice %309 {offsets = [7, 0], sizes = [16, 128], strides = [1, 1]} : vector<32x128xf32> to vector<16x128xf32>
    %317 = vector.broadcast %315 : vector<1x128xf32> to vector<16x128xf32>
    %318 = arith.mulf %317, %316 : vector<16x128xf32>
    %319 = arith.addf %314, %318 : vector<16x128xf32>
    %c13_145 = arith.constant 13 : index
    %c0_146 = arith.constant 0 : index
    %320 = vector.load %arg2[%c13_145, %c0_146] : memref<25x128xf32, #tpu.memory_space<vmem>>, vector<1x128xf32>
    %321 = vector.extract_strided_slice %309 {offsets = [8, 0], sizes = [16, 128], strides = [1, 1]} : vector<32x128xf32> to vector<16x128xf32>
    %322 = vector.broadcast %320 : vector<1x128xf32> to vector<16x128xf32>
    %323 = arith.mulf %322, %321 : vector<16x128xf32>
    %324 = arith.addf %319, %323 : vector<16x128xf32>
    %c18_147 = arith.constant 18 : index
    %c0_148 = arith.constant 0 : index
    %325 = vector.load %arg2[%c18_147, %c0_148] : memref<25x128xf32, #tpu.memory_space<vmem>>, vector<1x128xf32>
    %326 = vector.extract_strided_slice %309 {offsets = [9, 0], sizes = [16, 128], strides = [1, 1]} : vector<32x128xf32> to vector<16x128xf32>
    %327 = vector.broadcast %325 : vector<1x128xf32> to vector<16x128xf32>
    %328 = arith.mulf %327, %326 : vector<16x128xf32>
    %329 = arith.addf %324, %328 : vector<16x128xf32>
    %c23_149 = arith.constant 23 : index
    %c0_150 = arith.constant 0 : index
    %330 = vector.load %arg2[%c23_149, %c0_150] : memref<25x128xf32, #tpu.memory_space<vmem>>, vector<1x128xf32>
    %331 = vector.extract_strided_slice %309 {offsets = [10, 0], sizes = [16, 128], strides = [1, 1]} : vector<32x128xf32> to vector<16x128xf32>
    %332 = vector.broadcast %330 : vector<1x128xf32> to vector<16x128xf32>
    %333 = arith.mulf %332, %331 : vector<16x128xf32>
    %334 = arith.addf %329, %333 : vector<16x128xf32>
    %c0_151 = arith.constant 0 : index
    %c144_152 = arith.constant 144 : index
    %335 = vector.load %arg11[%c0_151, %c144_152] : memref<32x384xf32, #tpu.memory_space<vmem>>, vector<32x128xf32>
    %c4_153 = arith.constant 4 : index
    %c0_154 = arith.constant 0 : index
    %336 = vector.load %arg2[%c4_153, %c0_154] : memref<25x128xf32, #tpu.memory_space<vmem>>, vector<1x128xf32>
    %337 = vector.extract_strided_slice %335 {offsets = [6, 0], sizes = [16, 128], strides = [1, 1]} : vector<32x128xf32> to vector<16x128xf32>
    %338 = vector.broadcast %336 : vector<1x128xf32> to vector<16x128xf32>
    %339 = arith.mulf %338, %337 : vector<16x128xf32>
    %340 = arith.addf %334, %339 : vector<16x128xf32>
    %c9_155 = arith.constant 9 : index
    %c0_156 = arith.constant 0 : index
    %341 = vector.load %arg2[%c9_155, %c0_156] : memref<25x128xf32, #tpu.memory_space<vmem>>, vector<1x128xf32>
    %342 = vector.extract_strided_slice %335 {offsets = [7, 0], sizes = [16, 128], strides = [1, 1]} : vector<32x128xf32> to vector<16x128xf32>
    %343 = vector.broadcast %341 : vector<1x128xf32> to vector<16x128xf32>
    %344 = arith.mulf %343, %342 : vector<16x128xf32>
    %345 = arith.addf %340, %344 : vector<16x128xf32>
    %c14_157 = arith.constant 14 : index
    %c0_158 = arith.constant 0 : index
    %346 = vector.load %arg2[%c14_157, %c0_158] : memref<25x128xf32, #tpu.memory_space<vmem>>, vector<1x128xf32>
    %347 = vector.extract_strided_slice %335 {offsets = [8, 0], sizes = [16, 128], strides = [1, 1]} : vector<32x128xf32> to vector<16x128xf32>
    %348 = vector.broadcast %346 : vector<1x128xf32> to vector<16x128xf32>
    %349 = arith.mulf %348, %347 : vector<16x128xf32>
    %350 = arith.addf %345, %349 : vector<16x128xf32>
    %c19_159 = arith.constant 19 : index
    %c0_160 = arith.constant 0 : index
    %351 = vector.load %arg2[%c19_159, %c0_160] : memref<25x128xf32, #tpu.memory_space<vmem>>, vector<1x128xf32>
    %352 = vector.extract_strided_slice %335 {offsets = [9, 0], sizes = [16, 128], strides = [1, 1]} : vector<32x128xf32> to vector<16x128xf32>
    %353 = vector.broadcast %351 : vector<1x128xf32> to vector<16x128xf32>
    %354 = arith.mulf %353, %352 : vector<16x128xf32>
    %355 = arith.addf %350, %354 : vector<16x128xf32>
    %c24_161 = arith.constant 24 : index
    %c0_162 = arith.constant 0 : index
    %356 = vector.load %arg2[%c24_161, %c0_162] : memref<25x128xf32, #tpu.memory_space<vmem>>, vector<1x128xf32>
    %357 = vector.extract_strided_slice %335 {offsets = [10, 0], sizes = [16, 128], strides = [1, 1]} : vector<32x128xf32> to vector<16x128xf32>
    %358 = vector.broadcast %356 : vector<1x128xf32> to vector<16x128xf32>
    %359 = arith.mulf %358, %357 : vector<16x128xf32>
    %360 = arith.addf %355, %359 : vector<16x128xf32>
    %c0_163 = arith.constant 0 : index
    %c0_164 = arith.constant 0 : index
    %361 = vector.load %arg3[%c0_163, %c0_164] : memref<1x128xf32, #tpu.memory_space<vmem>>, vector<1x128xf32>
    %362 = vector.broadcast %361 : vector<1x128xf32> to vector<16x128xf32>
    %363 = arith.addf %360, %362 : vector<16x128xf32>
    %c8_165 = arith.constant 8 : index
    %c128_166 = arith.constant 128 : index
    %364 = vector.load %arg11[%c8_165, %c128_166] : memref<32x384xf32, #tpu.memory_space<vmem>>, vector<16x128xf32>
    tpu.vector_store %arg11[%c8_165, %c128_166], %363 {strides = array<i32>} : memref<32x384xf32, #tpu.memory_space<vmem>>, vector<16x128xf32>,
    %cst_167 = arith.constant 0.000000e+00 : f32
    %365 = vector.broadcast %cst_167 : f32 to vector<16x128xf32>
    %c8_168 = arith.constant 8 : index
    %c104_169 = arith.constant 104 : index
    %366 = vector.load %arg11[%c8_168, %c104_169] : memref<32x384xf32, #tpu.memory_space<vmem>>, vector<16x128xf32>
    %c0_170 = arith.constant 0 : index
    %c0_171 = arith.constant 0 : index
    %367 = vector.load %arg4[%c0_170, %c0_171] : memref<7x128xf32, #tpu.memory_space<vmem>>, vector<1x128xf32>
    %368 = vector.broadcast %367 : vector<1x128xf32> to vector<16x128xf32>
    %369 = arith.mulf %368, %366 : vector<16x128xf32>
    %370 = arith.addf %365, %369 : vector<16x128xf32>
    %c8_172 = arith.constant 8 : index
    %c112_173 = arith.constant 112 : index
    %371 = vector.load %arg11[%c8_172, %c112_173] : memref<32x384xf32, #tpu.memory_space<vmem>>, vector<16x128xf32>
    %c1_174 = arith.constant 1 : index
    %c0_175 = arith.constant 0 : index
    %372 = vector.load %arg4[%c1_174, %c0_175] : memref<7x128xf32, #tpu.memory_space<vmem>>, vector<1x128xf32>
    %373 = vector.broadcast %372 : vector<1x128xf32> to vector<16x128xf32>
    %374 = arith.mulf %373, %371 : vector<16x128xf32>
    %375 = arith.addf %370, %374 : vector<16x128xf32>
    %c8_176 = arith.constant 8 : index
    %c120_177 = arith.constant 120 : index
    %376 = vector.load %arg11[%c8_176, %c120_177] : memref<32x384xf32, #tpu.memory_space<vmem>>, vector<16x128xf32>
    %c2_178 = arith.constant 2 : index
    %c0_179 = arith.constant 0 : index
    %377 = vector.load %arg4[%c2_178, %c0_179] : memref<7x128xf32, #tpu.memory_space<vmem>>, vector<1x128xf32>
    %378 = vector.broadcast %377 : vector<1x128xf32> to vector<16x128xf32>
    %379 = arith.mulf %378, %376 : vector<16x128xf32>
    %380 = arith.addf %375, %379 : vector<16x128xf32>
    %c8_180 = arith.constant 8 : index
    %c128_181 = arith.constant 128 : index
    %381 = vector.load %arg11[%c8_180, %c128_181] : memref<32x384xf32, #tpu.memory_space<vmem>>, vector<16x128xf32>
    %c3_182 = arith.constant 3 : index
    %c0_183 = arith.constant 0 : index
    %382 = vector.load %arg4[%c3_182, %c0_183] : memref<7x128xf32, #tpu.memory_space<vmem>>, vector<1x128xf32>
    %383 = vector.broadcast %382 : vector<1x128xf32> to vector<16x128xf32>
    %384 = arith.mulf %383, %381 : vector<16x128xf32>
    %385 = arith.addf %380, %384 : vector<16x128xf32>
    %c8_184 = arith.constant 8 : index
    %c136_185 = arith.constant 136 : index
    %386 = vector.load %arg11[%c8_184, %c136_185] : memref<32x384xf32, #tpu.memory_space<vmem>>, vector<16x128xf32>
    %c4_186 = arith.constant 4 : index
    %c0_187 = arith.constant 0 : index
    %387 = vector.load %arg4[%c4_186, %c0_187] : memref<7x128xf32, #tpu.memory_space<vmem>>, vector<1x128xf32>
    %388 = vector.broadcast %387 : vector<1x128xf32> to vector<16x128xf32>
    %389 = arith.mulf %388, %386 : vector<16x128xf32>
    %390 = arith.addf %385, %389 : vector<16x128xf32>
    %c8_188 = arith.constant 8 : index
    %c144_189 = arith.constant 144 : index
    %391 = vector.load %arg11[%c8_188, %c144_189] : memref<32x384xf32, #tpu.memory_space<vmem>>, vector<16x128xf32>
    %c5_190 = arith.constant 5 : index
    %c0_191 = arith.constant 0 : index
    %392 = vector.load %arg4[%c5_190, %c0_191] : memref<7x128xf32, #tpu.memory_space<vmem>>, vector<1x128xf32>
    %393 = vector.broadcast %392 : vector<1x128xf32> to vector<16x128xf32>
    %394 = arith.mulf %393, %391 : vector<16x128xf32>
    %395 = arith.addf %390, %394 : vector<16x128xf32>
    %c8_192 = arith.constant 8 : index
    %c152_193 = arith.constant 152 : index
    %396 = vector.load %arg11[%c8_192, %c152_193] : memref<32x384xf32, #tpu.memory_space<vmem>>, vector<16x128xf32>
    %c6_194 = arith.constant 6 : index
    %c0_195 = arith.constant 0 : index
    %397 = vector.load %arg4[%c6_194, %c0_195] : memref<7x128xf32, #tpu.memory_space<vmem>>, vector<1x128xf32>
    %398 = vector.broadcast %397 : vector<1x128xf32> to vector<16x128xf32>
    %399 = arith.mulf %398, %396 : vector<16x128xf32>
    %400 = arith.addf %395, %399 : vector<16x128xf32>
    %c0_196 = arith.constant 0 : index
    %c0_197 = arith.constant 0 : index
    %401 = vector.load %arg5[%c0_196, %c0_197] : memref<1x128xf32, #tpu.memory_space<vmem>>, vector<1x128xf32>
    %402 = vector.broadcast %401 : vector<1x128xf32> to vector<16x128xf32>
    %403 = arith.addf %400, %402 : vector<16x128xf32>
    %c8_198 = arith.constant 8 : index
    %c128_199 = arith.constant 128 : index
    %404 = vector.load %arg11[%c8_198, %c128_199] : memref<32x384xf32, #tpu.memory_space<vmem>>, vector<16x128xf32>
    tpu.vector_store %arg11[%c8_198, %c128_199], %403 {strides = array<i32>} : memref<32x384xf32, #tpu.memory_space<vmem>>, vector<16x128xf32>,
    %cst_200 = arith.constant 0.000000e+00 : f32
    %405 = vector.broadcast %cst_200 : f32 to vector<16x128xf32>
    %c0_201 = arith.constant 0 : index
    %c128_202 = arith.constant 128 : index
    %406 = vector.load %arg11[%c0_201, %c128_202] : memref<32x384xf32, #tpu.memory_space<vmem>>, vector<32x128xf32>
    %c0_203 = arith.constant 0 : index
    %c0_204 = arith.constant 0 : index
    %407 = vector.load %arg6[%c0_203, %c0_204] : memref<7x128xf32, #tpu.memory_space<vmem>>, vector<1x128xf32>
    %408 = vector.extract_strided_slice %406 {offsets = [5, 0], sizes = [16, 128], strides = [1, 1]} : vector<32x128xf32> to vector<16x128xf32>
    %409 = vector.broadcast %407 : vector<1x128xf32> to vector<16x128xf32>
    %410 = arith.mulf %409, %408 : vector<16x128xf32>
    %411 = arith.addf %405, %410 : vector<16x128xf32>
    %c1_205 = arith.constant 1 : index
    %c0_206 = arith.constant 0 : index
    %412 = vector.load %arg6[%c1_205, %c0_206] : memref<7x128xf32, #tpu.memory_space<vmem>>, vector<1x128xf32>
    %413 = vector.extract_strided_slice %406 {offsets = [6, 0], sizes = [16, 128], strides = [1, 1]} : vector<32x128xf32> to vector<16x128xf32>
    %414 = vector.broadcast %412 : vector<1x128xf32> to vector<16x128xf32>
    %415 = arith.mulf %414, %413 : vector<16x128xf32>
    %416 = arith.addf %411, %415 : vector<16x128xf32>
    %c2_207 = arith.constant 2 : index
    %c0_208 = arith.constant 0 : index
    %417 = vector.load %arg6[%c2_207, %c0_208] : memref<7x128xf32, #tpu.memory_space<vmem>>, vector<1x128xf32>
    %418 = vector.extract_strided_slice %406 {offsets = [7, 0], sizes = [16, 128], strides = [1, 1]} : vector<32x128xf32> to vector<16x128xf32>
    %419 = vector.broadcast %417 : vector<1x128xf32> to vector<16x128xf32>
    %420 = arith.mulf %419, %418 : vector<16x128xf32>
    %421 = arith.addf %416, %420 : vector<16x128xf32>
    %c3_209 = arith.constant 3 : index
    %c0_210 = arith.constant 0 : index
    %422 = vector.load %arg6[%c3_209, %c0_210] : memref<7x128xf32, #tpu.memory_space<vmem>>, vector<1x128xf32>
    %423 = vector.extract_strided_slice %406 {offsets = [8, 0], sizes = [16, 128], strides = [1, 1]} : vector<32x128xf32> to vector<16x128xf32>
    %424 = vector.broadcast %422 : vector<1x128xf32> to vector<16x128xf32>
    %425 = arith.mulf %424, %423 : vector<16x128xf32>
    %426 = arith.addf %421, %425 : vector<16x128xf32>
    %c4_211 = arith.constant 4 : index
    %c0_212 = arith.constant 0 : index
    %427 = vector.load %arg6[%c4_211, %c0_212] : memref<7x128xf32, #tpu.memory_space<vmem>>, vector<1x128xf32>
    %428 = vector.extract_strided_slice %406 {offsets = [9, 0], sizes = [16, 128], strides = [1, 1]} : vector<32x128xf32> to vector<16x128xf32>
    %429 = vector.broadcast %427 : vector<1x128xf32> to vector<16x128xf32>
    %430 = arith.mulf %429, %428 : vector<16x128xf32>
    %431 = arith.addf %426, %430 : vector<16x128xf32>
    %c5_213 = arith.constant 5 : index
    %c0_214 = arith.constant 0 : index
    %432 = vector.load %arg6[%c5_213, %c0_214] : memref<7x128xf32, #tpu.memory_space<vmem>>, vector<1x128xf32>
    %433 = vector.extract_strided_slice %406 {offsets = [10, 0], sizes = [16, 128], strides = [1, 1]} : vector<32x128xf32> to vector<16x128xf32>
    %434 = vector.broadcast %432 : vector<1x128xf32> to vector<16x128xf32>
    %435 = arith.mulf %434, %433 : vector<16x128xf32>
    %436 = arith.addf %431, %435 : vector<16x128xf32>
    %c6_215 = arith.constant 6 : index
    %c0_216 = arith.constant 0 : index
    %437 = vector.load %arg6[%c6_215, %c0_216] : memref<7x128xf32, #tpu.memory_space<vmem>>, vector<1x128xf32>
    %438 = vector.extract_strided_slice %406 {offsets = [11, 0], sizes = [16, 128], strides = [1, 1]} : vector<32x128xf32> to vector<16x128xf32>
    %439 = vector.broadcast %437 : vector<1x128xf32> to vector<16x128xf32>
    %440 = arith.mulf %439, %438 : vector<16x128xf32>
    %441 = arith.addf %436, %440 : vector<16x128xf32>
    %c0_217 = arith.constant 0 : index
    %c0_218 = arith.constant 0 : index
    %442 = vector.load %arg7[%c0_217, %c0_218] : memref<1x128xf32, #tpu.memory_space<vmem>>, vector<1x128xf32>
    %443 = vector.broadcast %442 : vector<1x128xf32> to vector<16x128xf32>
    %444 = arith.addf %441, %443 : vector<16x128xf32>
    %445 = tpu.concatenate %226, %444 in 0 : vector<16x128xf32>, vector<16x128xf32> -> vector<32x128xf32>
    %c0_219 = arith.constant 0 : index
    %c0_220 = arith.constant 0 : index
    %446 = vector.load %arg8[%c0_219, %c0_220] : memref<128x128xf32, #tpu.memory_space<vmem>>, vector<128x128xf32>
    %cst_221 = arith.constant dense<0.000000e+00> : vector<32x128xf32>
    %447 = tpu.matmul %445, %446, %cst_221 {dimension_numbers = #tpu.dot_dimension_numbers<[1], [0], [0], [1], [0, 0, 1, 1], [], []>} : vector<32x128xf32>, vector<128x128xf32>, vector<32x128xf32> -> vector<32x128xf32>
    %c0_222 = arith.constant 0 : index
    %c0_223 = arith.constant 0 : index
    %448 = vector.load %arg9[%c0_222, %c0_223] : memref<1x128xf32, #tpu.memory_space<vmem>>, vector<1x128xf32>
    %449 = vector.broadcast %448 : vector<1x128xf32> to vector<32x128xf32>
    %450 = arith.addf %447, %449 : vector<32x128xf32>
    %451 = vector.shape_cast %450 : vector<32x128xf32> to vector<2x16x128xf32>
    %452 = arith.mulf %8, %451 : vector<2x16x128xf32>
    %c0_224 = arith.constant 0 : index
    %c0_225 = arith.constant 0 : index
    %c0_226 = arith.constant 0 : index
    %453 = vector.load %arg10[%c0_224, %c0_225, %c0_226] : memref<2x16x128xf32, #tpu.memory_space<vmem>>, vector<2x16x128xf32>
    tpu.vector_store %arg10[%c0_224, %c0_225, %c0_226], %452 {strides = array<i32>} : memref<2x16x128xf32, #tpu.memory_space<vmem>>, vector<2x16x128xf32>,
    return
  }
  func.func @transform_0(%arg0: i32) -> (i32, i32, i32) {
    %c0_i32 = arith.constant 0 : i32
    %c0_i32_0 = arith.constant 0 : i32
    %c0_i32_1 = arith.constant 0 : i32
    return %arg0, %c0_i32, %c0_i32_0 : i32, i32, i32
  }
  func.func @transform_1(%arg0: i32) -> (i32, i32) {
    %c0_i32 = arith.constant 0 : i32
    %c0_i32_0 = arith.constant 0 : i32
    %c0_i32_1 = arith.constant 0 : i32
    return %c0_i32, %c0_i32_0 : i32, i32
  }
  func.func @transform_2(%arg0: i32) -> (i32, i32) {
    %c0_i32 = arith.constant 0 : i32
    %c0_i32_0 = arith.constant 0 : i32
    %c0_i32_1 = arith.constant 0 : i32
    return %c0_i32, %c0_i32_0 : i32, i32
  }
  func.func @transform_3(%arg0: i32) -> (i32, i32) {
    %c0_i32 = arith.constant 0 : i32
    %c0_i32_0 = arith.constant 0 : i32
    %c0_i32_1 = arith.constant 0 : i32
    return %c0_i32, %c0_i32_0 : i32, i32
  }
  func.func @transform_4(%arg0: i32) -> (i32, i32) {
    %c0_i32 = arith.constant 0 : i32
    %c0_i32_0 = arith.constant 0 : i32
    %c0_i32_1 = arith.constant 0 : i32
    return %c0_i32, %c0_i32_0 : i32, i32
  }
  func.func @transform_5(%arg0: i32) -> (i32, i32) {
    %c0_i32 = arith.constant 0 : i32
    %c0_i32_0 = arith.constant 0 : i32
    %c0_i32_1 = arith.constant 0 : i32
    return %c0_i32, %c0_i32_0 : i32, i32
  }
  func.func @transform_6(%arg0: i32) -> (i32, i32) {
    %c0_i32 = arith.constant 0 : i32
    %c0_i32_0 = arith.constant 0 : i32
    %c0_i32_1 = arith.constant 0 : i32
    return %c0_i32, %c0_i32_0 : i32, i32
  }
  func.func @transform_7(%arg0: i32) -> (i32, i32) {
    %c0_i32 = arith.constant 0 : i32
    %c0_i32_0 = arith.constant 0 : i32
    %c0_i32_1 = arith.constant 0 : i32
    return %c0_i32, %c0_i32_0 : i32, i32
  }
  func.func @transform_8(%arg0: i32) -> (i32, i32) {
    %c0_i32 = arith.constant 0 : i32
    %c0_i32_0 = arith.constant 0 : i32
    %c0_i32_1 = arith.constant 0 : i32
    return %c0_i32, %c0_i32_0 : i32, i32
  }
  func.func @transform_9(%arg0: i32) -> (i32, i32, i32) {
    %c0_i32 = arith.constant 0 : i32
    %c0_i32_0 = arith.constant 0 : i32
    %c0_i32_1 = arith.constant 0 : i32
    return %arg0, %c0_i32, %c0_i32_0 : i32, i32, i32
  }
}

</mosaic_0001>

<bundles_post_ra>
// kernel: tpu_custom_call.1
= control target key start
LH: loop header
LB: loop body
LE: loop exit
PB: predicated region body
PF: predicated region fallthrough
CT: control target
= control target key end

     0   :  { %14 = vsyncpa [#allocation4], 0  ;;  %s3246_s0 = inlined_call_operand.hbm [shape: f32[2,16,128], index: 0, kind: input, shape index: {}]   ;;  %s3247_s1 = inlined_call_operand.hbm [shape: f32[25,128], index: 1, kind: input, shape index: {}]   ;;  %s3248_s2 = inlined_call_operand.vmem [shape: f32[1,128], index: 2, kind: input, shape index: {}]   ;;  %s3249_s3 = inlined_call_operand.vmem [shape: f32[7,128], index: 3, kind: input, shape index: {}]   ;;  %s3250_s4 = inlined_call_operand.vmem [shape: f32[1,128], index: 4, kind: input, shape index: {}]   ;;  %s3251_s5 = inlined_call_operand.vmem [shape: f32[7,128], index: 5, kind: input, shape index: {}]   ;;  %s3252_s6 = inlined_call_operand.vmem [shape: f32[1,128], index: 6, kind: input, shape index: {}]   ;;  %s3253_s7 = inlined_call_operand.hbm [shape: f32[128,128], index: 7, kind: input, shape index: {}]   ;;  %s3254_s8 = inlined_call_operand.vmem [shape: f32[1,128], index: 8, kind: input, shape index: {}]   ;;  %s3255_s9 = inlined_call_operand.hbm [shape: f32[2,16,128], index: 9, kind: output, shape index: {}]  }
   0x1   :  { %15 = vsyncpa [#allocation7], 0 }
   0x2   :  { %16 = vsyncpa [#allocation5], 0  ;;  %s2112_s30 = smov [#allocation6]   ;;  %s2113_s11 = smov [#allocation3]  }
   0x3   :  { %s34_s10 = sshll.u32 %s2112_s30, 4  ;;  %s22_s12 = sshll.u32 %s2113_s11, 4  ;;  %s35_s10 = int_to_ptr.vmem [resolvable:$true] %s34_s10  ;;  %s2174_s12 = int_to_ptr.vmem [resolvable:$true] %s22_s12 }
   0x4   :  { %s2018_s15 = scalar_lea.hbm %s3247_s1, 512 }
   0x5   :  { %p2019_p0 = scmp.ne.s32.totalorder %s3247_s1, %s2018_s15  ;;  %p2022_p1 = scmp.lt.u32.totalorder %s2018_s15, %s3247_s1 }
   0x7   :  { %p2024_p2 = pnand %p2022_p1, %p2019_p0 }
   0x9   :  { %2027 = shalt.err (!%p2024_p2)
}
   0xa   :  { %s2028_s20 = scalar_lea.vmem %s35_s10, 512  ;;  %p2033_p4 = scmp.lt.s32.totalorder %s35_s10, %s35_s10 }
   0xb   :  { %p2029_p3 = scmp.ne.s32.totalorder %s35_s10, %s2028_s20  ;;  %p2034_p5 = scmp.lt.s32.totalorder %s2028_s20, %s2028_s20 }
   0xd   :  { %p2035_p6 = por %p2034_p5, %p2033_p4 }
   0xf   :  { %p2036_p7 = pnand %p2035_p6, %p2029_p3 }
  0x11   :  { %2039 = shalt.err (!%p2036_p7)
}
  0x12   :  { %s2114_s21 = smov 128   ;;  %s2115_s22 = smov 8  }
  0x13   :  { %40 = dma.hbm_to_vmem [thread:$0]  %s3247_s1, 512, %s35_s10, [#allocation7], %s2114_s21, %s2114_s21, %s2115_s22  }
  0x14   :  { %s2040_s27 = scalar_lea.hbm %s3246_s0, 512 }
  0x15   :  { %p2041_p8 = scmp.ne.s32.totalorder %s3246_s0, %s2040_s27  ;;  %p2044_p9 = scmp.lt.u32.totalorder %s2040_s27, %s3246_s0 }
  0x17   :  { %p2046_p10 = pnand %p2044_p9, %p2041_p8 }
  0x19   :  { %2049 = shalt.err (!%p2046_p10)
}
  0x1a   :  { %s2050_s13 = scalar_lea.vmem %s2174_s12, 512  ;;  %p2055_p12 = scmp.lt.s32.totalorder %s2174_s12, %s2174_s12 }
  0x1b   :  { %p2051_p11 = scmp.ne.s32.totalorder %s2174_s12, %s2050_s13  ;;  %p2056_p13 = scmp.lt.s32.totalorder %s2050_s13, %s2050_s13 }
  0x1d   :  { %p2057_p0 = por %p2056_p13, %p2055_p12 }
  0x1f   :  { %p2058_p1 = pnand %p2057_p0, %p2051_p11 }
  0x21   :  { %2061 = shalt.err (!%p2058_p1)
}
  0x22   :  { %28 = dma.hbm_to_vmem [thread:$0]  %s3246_s0, 512, %s2174_s12, [#allocation4], %s2114_s21, %s2114_s21, %s2115_s22  }
  0x23   :  { %s2116_s14 = smov [#allocation8]   ;;  %s2062_s18 = scalar_lea.hbm %s3253_s7, 2048 }
  0x24   :  { %s56_s15 = sshll.u32 %s2116_s14, 4  ;;  %p2063_p2 = scmp.ne.s32.totalorder %s3253_s7, %s2062_s18  ;;  %s57_s15 = int_to_ptr.vmem [resolvable:$true] %s56_s15 }
  0x25   :  { %p2066_p3 = scmp.lt.u32.totalorder %s2062_s18, %s3253_s7 }
  0x27   :  { %p2068_p4 = pnand %p2066_p3, %p2063_p2 }
  0x29   :  { %2071 = shalt.err (!%p2068_p4)
}
  0x2a   :  { %s2072_s25 = scalar_lea.vmem %s57_s15, 2048  ;;  %p2077_p6 = scmp.lt.s32.totalorder %s57_s15, %s57_s15 }
  0x2b   :  { %p2073_p5 = scmp.ne.s32.totalorder %s57_s15, %s2072_s25  ;;  %p2078_p7 = scmp.lt.s32.totalorder %s2072_s25, %s2072_s25 }
  0x2d   :  { %p2079_p8 = por %p2078_p7, %p2077_p6 }
  0x2f   :  { %p2080_p9 = pnand %p2079_p8, %p2073_p5 }
  0x31   :  { %2083 = shalt.err (!%p2080_p9)
}
  0x32   :  { %62 = dma.hbm_to_vmem [thread:$0]  %s3253_s7, 2048, %s57_s15, [#allocation7], %s2114_s21, %s2114_s21, %s2115_s22  }
  0x33   :  { %2106 = dma.done.wait [#allocation4], 512  }
  0x34   :  { %2107 = vsyncadd [#allocation4], 4294966784 }
  0x35   :  { %2108 = dma.done.wait [#allocation7], 2560  }
  0x36   :  { %2109 = vsyncadd [#allocation7], 4294964736  ;;  %v3256_v0 = vmov 0.0   ;;  %s2118_s26 = smov 16   ;;  %v2236_v4 = vld [vmem:[#allocation3] sm:$0xff]  ;;  %vm134_vm0 = vcmask 1040384  }
  0x37   :  { %v2227_v1 = vrot.slane %v3256_v0, 6  ;;  %v2230_v2 = vrot.slane %v3256_v0, 7  ;;  %vm105_vm1 = vcmask 1041408   ;;  %v2238_v5 = vld [vmem:[#allocation3 + $0x10] sm:$0xff]  ;;  %v139_v6 = vrot.slane %v2236_v4, 7  ;;  %v2244_v10 = vld [vmem:[#allocation3 + $0x8] sm:$0xff] }
  0x38   :  { %v110_v7 = vrot.slane %v2236_v4, 6  ;;  %v852_v8 = vrot.slane %v2238_v5, 7  ;;  %v825_v9 = vrot.slane %v2238_v5, 6  ;;  %v114_v15 = vrot.slane %v2244_v10, 6  ;;  %v2275_v18 = vld [vmem:[#allocation3 + $0x18] sm:$0xff]  ;;  %s2119_s7 = smov 120  }
  0x39   :  { %3289 = vst [vmem:[#allocation13_spill] sm:$0xff] %v2227_v1  ;;  %3290 = vst [vmem:[#allocation14_spill] sm:$0xff] %v2230_v2  ;;  %v1759_v3 = vpack.i.bf16 %v2230_v2, %v2227_v1  ;;  %v2248_v11 = vsel %vm134_vm0, %v2230_v2, %v139_v6  ;;  %v143_v17 = vrot.slane %v2244_v10, 7  ;;  %v856_v20 = vrot.slane %v2275_v18, 7  ;;  %s2120_s27 = smov 112   ;;  %s2121_s28 = smov 24  }
  0x3a   :  { %v2252_v12 = vsel %vm105_vm1, %v2227_v1, %v110_v7  ;;  %v2260_v13 = vsel %vm134_vm0, %v2230_v2, %v852_v8  ;;  %v2264_v14 = vsel %vm105_vm1, %v2227_v1, %v825_v9  ;;  %v2272_v16 = vsel %vm105_vm1, %v110_v7, %v114_v15  ;;  %s2123_s17 = smov [#allocation9]  }
  0x3b   :  { %1760 = vrot.lane.b32.xlu1 %v1759_v3, %s2118_s26  ;;  %1755 = vrot.lane.b32.xlu0 %v1759_v3, %s2118_s26  ;;  %3291 = vst [vmem:[#allocation15_spill] sm:$0xff] %v2272_v16  ;;  %v2281_v19 = vsel %vm134_vm0, %v139_v6, %v143_v17  ;;  %v829_v21 = vrot.slane %v2275_v18, 6  ;;  %v2289_v22 = vsel %vm134_vm0, %v852_v8, %v856_v20  ;;  %v2307_v24 = vrot.slane %v3256_v0, 1  ;;  %s1623_s18 = sshll.u32 %s2123_s17, 4  ;;  %s1624_s18 = int_to_ptr.vmem [resolvable:$true] %s1623_s18 }
  0x3c   :  { %v185_v25 = vrot.slane %v2236_v4, 1  ;;  %v186_v26 = vrot.slane %v2244_v10, 1  ;;  %vm181_vm2 = vcmask 1046528   ;;  %v897_v29 = vrot.slane %v2238_v5, 1  ;;  %p2089_p11 = scmp.lt.s32.totalorder %s1624_s18, %s1624_s18 }
  0x3d   :  { %v2292_v23 = vsel %vm105_vm1, %v825_v9, %v829_v21  ;;  %3293 = vst [vmem:[#allocation17_spill] sm:$0xff] %v2307_v24  ;;  %v2317_v27 = vpack.i.bf16 %v2307_v24, %v2307_v24  ;;  %v898_v30 = vrot.slane %v2275_v18, 1  ;;  %v2336_v32 = vrot.slane %v3256_v0, 2 }
  0x3e   :  { %3292 = vst [vmem:[#allocation16_spill] sm:$0xff] %v2292_v23  ;;  %v2320_v28 = vsel %vm181_vm2, %v185_v25, %v186_v26  ;;  %v2344_v34 = vsel %vm181_vm2, %v186_v26, %v2307_v24  ;;  %v213_v35 = vrot.slane %v2236_v4, 2  ;;  %v214_v36 = vrot.slane %v2244_v10, 2 }
  0x3f   :  { %147 = vrot.lane.b32.xlu1 %v2248_v11, %s2118_s26  ;;  %118 = vrot.lane.b32.xlu0 %v2252_v12, %s2118_s26  ;;  %3294 = vst [vmem:[#allocation18_spill] sm:$0xff] %v2317_v27  ;;  %3295 = vst [vmem:[#allocation19_spill] sm:$0xff] %v2320_v28  ;;  %v2329_v31 = vsel %vm181_vm2, %v897_v29, %v898_v30  ;;  %v2340_v33 = vsel %vm181_vm2, %v898_v30, %v2307_v24  ;;  %vm209_vm3 = vcmask 1045504   ;;  %v924_v39 = vrot.slane %v2238_v5, 2 }
  0x40   :  { %3296 = vst [vmem:[#allocation20_spill] sm:$0xff] %v2329_v31  ;;  %3297 = vst [vmem:[#allocation21_spill] sm:$0xff] %v2336_v32  ;;  %v2354_v37 = vpack.i.bf16 %v2336_v32, %v2336_v32  ;;  %v2357_v38 = vsel %vm209_vm3, %v213_v35, %v214_v36  ;;  %v925_v40 = vrot.slane %v2275_v18, 2  ;;  %v2378_v43 = vsel %vm209_vm3, %v214_v36, %v2336_v32 }
  0x41   :  { %3298 = vst [vmem:[#allocation22_spill] sm:$0xff] %v2340_v33  ;;  %3299 = vst [vmem:[#allocation23_spill] sm:$0xff] %v2344_v34  ;;  %v2386_v44 = vpack.i.bf16 %v2227_v1, %v2227_v1  ;;  %v2402_v45 = vpack.i.bf16 %v2230_v2, %v2230_v2  ;;  %vm124_vm4 = vcmask 130048   ;;  %vm245_vm5 = vcmask 64512  }
  0x42   :  { %3300 = vst [vmem:[#allocation24_spill] sm:$0xff] %v2354_v37  ;;  %3301 = vst [vmem:[#allocation25_spill] sm:$0xff] %v2357_v38  ;;  %v2366_v41 = vsel %vm209_vm3, %v924_v39, %v925_v40  ;;  %v2374_v42 = vsel %vm209_vm3, %v925_v40, %v2336_v32  ;;  %vm388_vm6 = vcmask 982016   ;;  %vm506_vm7 = vcmask 916480  }
  0x43   :  { %860 = vrot.lane.b32.xlu1 %v2260_v13, %s2118_s26  ;;  %833 = vrot.lane.b32.xlu0 %v2264_v14, %s2118_s26  ;;  %3302 = vst [vmem:[#allocation26_spill] sm:$0xff] %v2366_v41  ;;  %3303 = vst [vmem:[#allocation27_spill] sm:$0xff] %v2374_v42  ;;  %vm605_vm8 = vcmask 195584   ;;  %vm700_vm9 = vcmask 850944   ;;  %vm722_vm10 = vcmask 1042432   ;;  %vm789_vm11 = vcmask 1044480  }
  0x44   :  { %3304 = vst [vmem:[#allocation28_spill] sm:$0xff] %v2378_v43 }
  0x47   :  { %122 = vrot.lane.b32.xlu1 %v2272_v16, %s2118_s26  ;;  %1765 = vrot.lane.b32.xlu0 %v1759_v3, %s2118_s26 }
  0x4b   :  { %1770 = vrot.lane.b32.xlu1 %v1759_v3, %s2118_s26  ;;  %151 = vrot.lane.b32.xlu0 %v2281_v19, %s2118_s26 }
  0x4f   :  { %864 = vrot.lane.b32.xlu1 %v2289_v22, %s2118_s26  ;;  %837 = vrot.lane.b32.xlu0 %v2292_v23, %s2118_s26 }
  0x53   :  { %164 = vrot.lane.b32.xlu1 %v2236_v4, %s2118_s26  ;;  %1775 = vrot.lane.b32.xlu0 %v3256_v0, %s2118_s26 }
  0x57   :  { %1780 = vrot.lane.b32.xlu1 %v3256_v0, %s2118_s26  ;;  %877 = vrot.lane.b32.xlu0 %v2238_v5, %s2118_s26 }
  0x5b   :  { %881 = vrot.lane.b32.xlu1 %v2275_v18, %s2118_s26  ;;  %168 = vrot.lane.b32.xlu0 %v2244_v10, %s2118_s26 }
  0x5f   :  { %194 = vrot.lane.b32.xlu1 %v2320_v28, %s2118_s26  ;;  %1785 = vrot.lane.b32.xlu0 %v2317_v27, %s2118_s26 }
  0x63   :  { %1790 = vrot.lane.b32.xlu1 %v2317_v27, %s2118_s26  ;;  %906 = vrot.lane.b32.xlu0 %v2329_v31, %s2118_s26 }
  0x67   :  { %910 = vrot.lane.b32.xlu1 %v2340_v33, %s2118_s26  ;;  %198 = vrot.lane.b32.xlu0 %v2344_v34, %s2118_s26 }
  0x6b   :  { %222 = vrot.lane.b32.xlu1 %v2357_v38, %s2118_s26  ;;  %1795 = vrot.lane.b32.xlu0 %v2354_v37, %s2118_s26 }
  0x6f   :  { %1800 = vrot.lane.b32.xlu1 %v2354_v37, %s2118_s26  ;;  %933 = vrot.lane.b32.xlu0 %v2366_v41, %s2118_s26 }
  0x73   :  { %937 = vrot.lane.b32.xlu1 %v2374_v42, %s2118_s26  ;;  %226 = vrot.lane.b32.xlu0 %v2378_v43, %s2118_s26 }
  0x77   :  { %239 = vrot.lane.b32.xlu1 %v2252_v12, %s2115_s22  ;;  %1805 = vrot.lane.b32.xlu0 %v2386_v44, %s2115_s22 }
  0x7b   :  { %1810 = vrot.lane.b32.xlu1 %v2386_v44, %s2115_s22  ;;  %950 = vrot.lane.b32.xlu0 %v2264_v14, %s2115_s22 }
  0x7f   :  { %954 = vrot.lane.b32.xlu1 %v2292_v23, %s2115_s22  ;;  %243 = vrot.lane.b32.xlu0 %v2272_v16, %s2115_s22 }
  0x83   :  { %257 = vrot.lane.b32.xlu1 %v2248_v11, %s2115_s22  ;;  %1815 = vrot.lane.b32.xlu0 %v2402_v45, %s2115_s22 }
  0x87   :  { %1820 = vrot.lane.b32.xlu1 %v2402_v45, %s2115_s22  ;;  %967 = vrot.lane.b32.xlu0 %v2260_v13, %s2115_s22 }
  0x8b   :  { %971 = vrot.lane.b32.xlu1 %v2289_v22, %s2115_s22  ;;  %261 = vrot.lane.b32.xlu0 %v2281_v19, %s2115_s22 }
  0x8f   :  { %274 = vrot.lane.b32.xlu1 %v2236_v4, %s2115_s22  ;;  %1825 = vrot.lane.b32.xlu0 %v3256_v0, %s2115_s22 }
  0x93   :  { %1830 = vrot.lane.b32.xlu1 %v3256_v0, %s2115_s22  ;;  %984 = vrot.lane.b32.xlu0 %v2238_v5, %s2115_s22 }
  0x97   :  { %988 = vrot.lane.b32.xlu1 %v2275_v18, %s2115_s22  ;;  %278 = vrot.lane.b32.xlu0 %v2244_v10, %s2115_s22 }
  0x9b   :  { %291 = vrot.lane.b32.xlu1 %v2320_v28, %s2115_s22  ;;  %1835 = vrot.lane.b32.xlu0 %v2317_v27, %s2115_s22 }
  0x9f   :  { %1840 = vrot.lane.b32.xlu1 %v2317_v27, %s2115_s22  ;;  %1001 = vrot.lane.b32.xlu0 %v2329_v31, %s2115_s22 }
  0xa3   :  { %1005 = vrot.lane.b32.xlu1 %v2340_v33, %s2115_s22  ;;  %295 = vrot.lane.b32.xlu0 %v2344_v34, %s2115_s22 }
  0xa7   :  { %308 = vrot.lane.b32.xlu1 %v2357_v38, %s2115_s22  ;;  %1845 = vrot.lane.b32.xlu0 %v2354_v37, %s2115_s22 }
  0xab   :  { %1850 = vrot.lane.b32.xlu1 %v2354_v37, %s2115_s22  ;;  %1018 = vrot.lane.b32.xlu0 %v2366_v41, %s2115_s22 }
  0xad   :  { %v2448_v46 = vpop.permute.xlu1 %1760  ;;  %v2450_v47 = vpop.permute.xlu0 %1755 }
  0xae   :  { %v1758_v32 = vunpack.i.h.bf16 %v2450_v47  ;;  %v1757_v24 = vunpack.i.l.bf16 %v2450_v47 }
  0xaf   :  { %1022 = vrot.lane.b32.xlu1 %v2374_v42, %s2115_s22  ;;  %312 = vrot.lane.b32.xlu0 %v2378_v43, %s2115_s22 }
  0xb1   :  { %v2456_v48 = vpop.permute.xlu1 %147  ;;  %v2458_v49 = vpop.permute.xlu0 %118 }
  0xb3   :  { %1855 = vrot.lane.b32.xlu1 %v2386_v44, %s2119_s7  ;;  %380 = vrot.lane.b32.xlu0 %v2252_v12, %s2119_s7 }
  0xb5   :  { %v2464_v50 = vpop.permute.xlu1 %860  ;;  %v2466_v51 = vpop.permute.xlu0 %833 }
  0xb7   :  { %384 = vrot.lane.b32.xlu1 %v2272_v16, %s2119_s7  ;;  %1090 = vrot.lane.b32.xlu0 %v2264_v14, %s2119_s7 }
  0xb9   :  { %v2472_v52 = vpop.permute.xlu1 %122  ;;  %v2474_v53 = vpop.permute.xlu0 %1765 }
  0xbb   :  { %1094 = vrot.lane.b32.xlu1 %v2292_v23, %s2119_s7  ;;  %1860 = vrot.lane.b32.xlu0 %v2386_v44, %s2119_s7 }
  0xbd   :  { %v2480_v54 = vpop.permute.xlu1 %1770  ;;  %v2482_v55 = vpop.permute.xlu0 %151 }
  0xbf   :  { %1865 = vrot.lane.b32.xlu1 %v2402_v45, %s2119_s7  ;;  %408 = vrot.lane.b32.xlu0 %v2248_v11, %s2119_s7 }
  0xc1   :  { %v2488_v56 = vpop.permute.xlu1 %864  ;;  %v2490_v57 = vpop.permute.xlu0 %837 }
  0xc3   :  { %412 = vrot.lane.b32.xlu1 %v2281_v19, %s2119_s7  ;;  %1117 = vrot.lane.b32.xlu0 %v2260_v13, %s2119_s7 }
  0xc5   :  { %v2496_v58 = vpop.permute.xlu1 %164  ;;  %v2498_v59 = vpop.permute.xlu0 %1775 }
  0xc7   :  { %1121 = vrot.lane.b32.xlu1 %v2289_v22, %s2119_s7  ;;  %1870 = vrot.lane.b32.xlu0 %v2402_v45, %s2119_s7 }
  0xc9   :  { %v2504_v60 = vpop.permute.xlu1 %1780  ;;  %v2506_v61 = vpop.permute.xlu0 %877 }
  0xcb   :  { %1875 = vrot.lane.b32.xlu1 %v3256_v0, %s2119_s7  ;;  %425 = vrot.lane.b32.xlu0 %v2236_v4, %s2119_s7 }
  0xcd   :  { %v2512_v62 = vpop.permute.xlu1 %881  ;;  %v2514_v63 = vpop.permute.xlu0 %168 }
  0xcf   :  { %429 = vrot.lane.b32.xlu1 %v2244_v10, %s2119_s7  ;;  %1134 = vrot.lane.b32.xlu0 %v2238_v5, %s2119_s7 }
  0xd1   :  { %v2520_v3 = vpop.permute.xlu1 %194  ;;  %v2522_v6 = vpop.permute.xlu0 %1785 }
  0xd3   :  { %1138 = vrot.lane.b32.xlu1 %v2275_v18, %s2119_s7  ;;  %1880 = vrot.lane.b32.xlu0 %v3256_v0, %s2119_s7 }
  0xd5   :  { %v2528_v7 = vpop.permute.xlu1 %1790  ;;  %v2530_v8 = vpop.permute.xlu0 %906 }
  0xd7   :  { %1885 = vrot.lane.b32.xlu1 %v2317_v27, %s2119_s7  ;;  %454 = vrot.lane.b32.xlu0 %v2320_v28, %s2119_s7  ;;  %v1773_v28 = vunpack.i.h.bf16 %v2480_v54 }
  0xd9   :  { %v2536_v9 = vpop.permute.xlu1 %910  ;;  %v2538_v15 = vpop.permute.xlu0 %198 }
  0xdb   :  { %458 = vrot.lane.b32.xlu1 %v2344_v34, %s2119_s7  ;;  %1163 = vrot.lane.b32.xlu0 %v2329_v31, %s2119_s7  ;;  %v2610_v31 = vld [vmem:[#allocation6 + $0x2] ss:$0 sm:$0xff] }
  0xdd   :  { %v2544_v17 = vpop.permute.xlu1 %222  ;;  %v2546_v20 = vpop.permute.xlu0 %1795 }
  0xdf   :  { %1167 = vrot.lane.b32.xlu1 %v2340_v33, %s2119_s7  ;;  %1890 = vrot.lane.b32.xlu0 %v2317_v27, %s2119_s7 }
  0xe1   :  { %v2552_v21 = vpop.permute.xlu1 %1800  ;;  %v2554_v25 = vpop.permute.xlu0 %933 }
  0xe3   :  { %1895 = vrot.lane.b32.xlu1 %v2354_v37, %s2119_s7  ;;  %481 = vrot.lane.b32.xlu0 %v2357_v38, %s2119_s7  ;;  %v125_v38 = vsel %vm124_vm4, %v1757_v24, %v2458_v49  ;;  %v2620_v24 = vmul.f32 %v2610_v31, %v2264_v14  ;;  %v1777_v49 = vunpack.i.l.bf16 %v2498_v59 }
  0xe5   :  { %v2560_v26 = vpop.permute.xlu1 %937  ;;  %v2562_v29 = vpop.permute.xlu0 %226  ;;  %3306 = vst [vmem:[#allocation30_spill] sm:$0xff] %v2620_v24  ;;  %v1778_v24 = vunpack.i.h.bf16 %v2498_v59  ;;  %v867_v59 = vsel %vm124_vm4, %v1773_v28, %v2488_v56  ;;  %v1783_v56 = vunpack.i.h.bf16 %v2504_v60 }
  0xe7   :  { %485 = vrot.lane.b32.xlu1 %v2378_v43, %s2119_s7  ;;  %1190 = vrot.lane.b32.xlu0 %v2366_v41, %s2119_s7  ;;  %v153_v43 = vsel %vm124_vm4, %v1758_v32, %v2456_v48  ;;  %v98_v41 = vld [vmem:[#allocation6] ss:$0 sm:$0xff]  ;;  %v1763_v32 = vunpack.i.h.bf16 %v2448_v46  ;;  %v1768_v48 = vunpack.i.h.bf16 %v2474_v53 }
  0xe8   :  { %v129_v33 = vmul.f32 %v125_v38, %v98_v41  ;;  %v1762_v38 = vunpack.i.l.bf16 %v2448_v46 }
  0xe9   :  { %v2568_v30 = vpop.permute.xlu1 %239  ;;  %v2570_v35 = vpop.permute.xlu0 %1805  ;;  %v866_v34 = vsel %vm124_vm4, %v1763_v32, %v2464_v50  ;;  %v2648_v50 = vmul.f32 %v2610_v31, %v2252_v12  ;;  %v1788_v32 = vunpack.i.h.bf16 %v2522_v6 }
  0xeb   :  { %1194 = vrot.lane.b32.xlu1 %v2374_v42, %s2119_s7  ;;  %1900 = vrot.lane.b32.xlu0 %v2354_v37, %s2119_s7  ;;  %v133_v42 = vld [vmem:[#allocation6 + $0x5] ss:$0 sm:$0xff] }
  0xec   :  { %v157_v37 = vmul.f32 %v153_v43, %v133_v42  ;;  %v1767_v43 = vunpack.i.l.bf16 %v2474_v53 }
  0xed   :  { %v2576_v36 = vpop.permute.xlu1 %1810  ;;  %v2578_v39 = vpop.permute.xlu0 %950 }
  0xee   :  { %v159_v53 = vadd.f32 %v157_v37, %v129_v33  ;;  %v874_v37 = vld [vmem:[#allocation6 + $0xa] ss:$0 sm:$0xff] }
  0xef   :  { %1905 = vrot.lane.b32.xlu1 %v2386_v44, %s2120_s27  ;;  %498 = vrot.lane.b32.xlu0 %v2252_v12, %s2120_s27  ;;  %v126_v12 = vsel %vm124_vm4, %v1767_v43, %v2472_v52  ;;  %v871_v52 = vmul.f32 %v867_v59, %v133_v42  ;;  %v1782_v43 = vunpack.i.l.bf16 %v2504_v60  ;;  %v1797_v60 = vunpack.i.l.bf16 %v2546_v20 }
  0xf1   :  { %v2584_v40 = vpop.permute.xlu1 %954  ;;  %v2586_v0 = vpop.permute.xlu0 %243 }
  0xf3   :  { %502 = vrot.lane.b32.xlu1 %v2272_v16, %s2120_s27  ;;  %1207 = vrot.lane.b32.xlu0 %v2264_v14, %s2120_s27  ;;  %v1772_v14 = vunpack.i.l.bf16 %v2480_v54  ;;  %v154_v54 = vsel %vm124_vm4, %v1768_v48, %v2482_v55  ;;  %v1787_v55 = vunpack.i.l.bf16 %v2522_v6  ;;  %v171_v6 = vsel %vm124_vm4, %v1782_v43, %v2514_v63 }
  0xf5   :  { %v2594_v2 = vpop.permute.xlu1 %257  ;;  %v2596_v1 = vpop.permute.xlu0 %1815  ;;  %v840_v33 = vsel %vm124_vm4, %v1772_v14, %v2490_v57  ;;  %v883_v57 = vsel %vm124_vm4, %v1778_v24, %v2506_v61  ;;  %v891_v24 = vld [vmem:[#allocation6 + $0xf] ss:$0 sm:$0xff]  ;;  %v912_v14 = vsel %vm124_vm4, %v1788_v32, %v2530_v8  ;;  %v3308_v8 = vmov 0.0  }
  0xf6   :  { %v887_v61 = vmul.f32 %v883_v57, %v874_v37  ;;  %v1807_v32 = vunpack.i.l.bf16 %v2570_v35 }
  0xf7   :  { %1211 = vrot.lane.b32.xlu1 %v2292_v23, %s2120_s27  ;;  %1910 = vrot.lane.b32.xlu0 %v2386_v44, %s2120_s27  ;;  %v2622_v44 = vld [vmem:[#allocation6 + $0x7] ss:$0 sm:$0xff] }
  0xf8   :  { %v2629_v23 = vmul.f32 %v2622_v44, %v2260_v13 }
  0xf9   :  { %v2606_v47 = vpop.permute.xlu1 %1820  ;;  %v2608_v16 = vpop.permute.xlu0 %967 }
  0xfa   :  { %3305 = vst [vmem:[#allocation29_spill] sm:$0xff] %v2606_v47  ;;  %3307 = vst [vmem:[#allocation31_spill] sm:$0xff] %v2629_v23  ;;  %v839_v47 = vsel %vm124_vm4, %v1762_v38, %v2466_v51  ;;  %v2644_v23 = vmul.f32 %v2622_v44, %v2248_v11  ;;  %v170_v51 = vsel %vm124_vm4, %v1777_v49, %v2496_v58 }
  0xfb   :  { %1915 = vrot.lane.b32.xlu1 %v2402_v45, %s2120_s27  ;;  %516 = vrot.lane.b32.xlu0 %v2248_v11, %s2120_s27  ;;  %v870_v11 = vmul.f32 %v866_v34, %v133_v42  ;;  %v843_v28 = vmul.f32 %v839_v47, %v98_v41  ;;  %v158_v34 = vmul.f32 %v154_v54, %v133_v42  ;;  %v1798_v54 = vunpack.i.h.bf16 %v2546_v20 }
  0xfc   :  { %v844_v38 = vmul.f32 %v840_v33, %v98_v41  ;;  %v130_v58 = vmul.f32 %v126_v12, %v98_v41  ;;  %v884_v47 = vsel %vm124_vm4, %v1783_v56, %v2512_v62  ;;  %v174_v49 = vmul.f32 %v874_v37, %v170_v51 }
  0xfd   :  { %v2636_v27 = vpop.permute.xlu1 %971  ;;  %v2638_v46 = vpop.permute.xlu0 %261  ;;  %v200_v42 = vsel %vm124_vm4, %v1787_v55, %v2520_v3  ;;  %v1793_v41 = vunpack.i.h.bf16 %v2528_v7  ;;  %v1792_v62 = vunpack.i.l.bf16 %v2528_v7  ;;  %v872_v63 = vadd.f32 %v870_v11, %v843_v28  ;;  %v920_v28 = vld [vmem:[#allocation6 + $0x14] ss:$0 sm:$0xff] }
  0xfe   :  { %v160_v33 = vadd.f32 %v158_v34, %v130_v58  ;;  %v873_v12 = vadd.f32 %v871_v52, %v844_v38  ;;  %v888_v3 = vmul.f32 %v884_v47, %v874_v37  ;;  %v176_v51 = vadd.f32 %v174_v49, %v159_v53 }
  0xff   :  { %520 = vrot.lane.b32.xlu1 %v2281_v19, %s2120_s27  ;;  %1224 = vrot.lane.b32.xlu0 %v2260_v13, %s2120_s27  ;;  %v913_v55 = vsel %vm124_vm4, %v1793_v41, %v2536_v9  ;;  %v201_v7 = vsel %vm124_vm4, %v1792_v62, %v2538_v15  ;;  %v175_v20 = vmul.f32 %v874_v37, %v171_v6  ;;  %v1803_v9 = vunpack.i.h.bf16 %v2552_v21  ;;  %v947_v41 = vld [vmem:[#allocation6 + $0x1] ss:$0 sm:$0xff] }
 0x100   :  { %v916_v56 = vmul.f32 %v912_v14, %v891_v24  ;;  %v204_v11 = vmul.f32 %v891_v24, %v200_v42  ;;  %v228_v53 = vsel %vm124_vm4, %v1797_v60, %v2544_v17  ;;  %v889_v57 = vadd.f32 %v887_v61, %v872_v63 }
 0x101   :  { %v2669_v48 = vpop.permute.xlu1 %274  ;;  %v2671_v13 = vpop.permute.xlu0 %1825  ;;  %v939_v15 = vsel %vm124_vm4, %v1798_v54, %v2554_v25  ;;  %v890_v38 = vadd.f32 %v888_v3, %v873_v12  ;;  %v917_v37 = vmul.f32 %v913_v55, %v891_v24  ;;  %v205_v43 = vmul.f32 %v891_v24, %v201_v7 }
 0x102   :  { %v1808_v58 = vunpack.i.h.bf16 %v2570_v35  ;;  %v1802_v47 = vunpack.i.l.bf16 %v2552_v21  ;;  %v940_v17 = vsel %vm124_vm4, %v1803_v9, %v2560_v26  ;;  %v232_v49 = vmul.f32 %v920_v28, %v228_v53 }
 0x103   :  { %1228 = vrot.lane.b32.xlu1 %v2289_v22, %s2120_s27  ;;  %1920 = vrot.lane.b32.xlu0 %v2402_v45, %s2120_s27  ;;  %v1817_v61 = vunpack.i.l.bf16 %v2596_v1  ;;  %v177_v25 = vadd.f32 %v175_v20, %v160_v33  ;;  %v918_v6 = vadd.f32 %v916_v56, %v889_v57  ;;  %v206_v42 = vadd.f32 %v204_v11, %v176_v51  ;;  %v964_v51 = vld [vmem:[#allocation6 + $0x6] ss:$0 sm:$0xff] }
 0x104   :  { %v943_v60 = vmul.f32 %v939_v15, %v920_v28  ;;  %v229_v35 = vsel %vm124_vm4, %v1802_v47, %v2562_v29  ;;  %v1813_v21 = vunpack.i.h.bf16 %v2576_v36  ;;  %v246_v26 = vsel %vm245_vm5, %v1807_v32, %v2568_v30 }
 0x105   :  { %v2690_v45 = vpop.permute.xlu1 %1830  ;;  %v2692_v59 = vpop.permute.xlu0 %984  ;;  %v1818_v62 = vunpack.i.h.bf16 %v2596_v1  ;;  %v919_v54 = vadd.f32 %v917_v37, %v890_v38  ;;  %v207_v63 = vadd.f32 %v205_v43, %v177_v25  ;;  %v944_v12 = vmul.f32 %v940_v17, %v920_v28  ;;  %v3309_v38 = vld [vmem:[#allocation29_spill] sm:$0xff] }
 0x106   :  { %v956_v33 = vsel %vm245_vm5, %v1808_v58, %v2578_v39  ;;  %v234_v3 = vadd.f32 %v232_v49, %v206_v42  ;;  %v957_v29 = vsel %vm245_vm5, %v1813_v21, %v2584_v40  ;;  %v263_v55 = vsel %vm245_vm5, %v1817_v61, %v2594_v2  ;;  %v3310_v58 = vld [vmem:[#allocation18_spill] sm:$0xff] }
 0x107   :  { %1925 = vrot.lane.b32.xlu1 %v3308_v8, %s2120_s27  ;;  %533 = vrot.lane.b32.xlu0 %v2236_v4, %s2120_s27  ;;  %v945_v1 = vadd.f32 %v943_v60, %v918_v6  ;;  %v233_v30 = vmul.f32 %v920_v28, %v229_v35  ;;  %v250_v7 = vmul.f32 %v947_v41, %v246_v26  ;;  %v1827_v20 = vunpack.i.l.bf16 %v2671_v13  ;;  %v981_v49 = vld [vmem:[#allocation6 + $0xb] ss:$0 sm:$0xff] }
 0x108   :  { %v1812_v39 = vunpack.i.l.bf16 %v2576_v36  ;;  %v960_v56 = vmul.f32 %v956_v33, %v947_v41  ;;  %v973_v40 = vsel %vm245_vm5, %v1818_v62, %v2608_v16  ;;  %v1828_v11 = vunpack.i.h.bf16 %v2671_v13  ;;  %v3311_v16 = vld [vmem:[#allocation19_spill] sm:$0xff] }
 0x109   :  { %v2708_v34 = vpop.permute.xlu1 %988  ;;  %v2710_v52 = vpop.permute.xlu0 %278  ;;  %v946_v57 = vadd.f32 %v944_v12, %v919_v54  ;;  %v961_v9 = vmul.f32 %v957_v29, %v947_v41  ;;  %v267_v15 = vmul.f32 %v964_v51, %v263_v55  ;;  %v1823_v37 = vunpack.i.h.bf16 %v3309_v38 }
 0x10a   :  { %v247_v28 = vsel %vm245_vm5, %v1812_v39, %v2586_v0  ;;  %v1822_v43 = vunpack.i.l.bf16 %v3309_v38  ;;  %v235_v13 = vadd.f32 %v233_v30, %v207_v63  ;;  %v252_v47 = vadd.f32 %v250_v7, %v234_v3 }
 0x10b   :  { %537 = vrot.lane.b32.xlu1 %v2244_v10, %s2120_s27  ;;  %1241 = vrot.lane.b32.xlu0 %v2238_v5, %s2120_s27  ;;  %v977_v17 = vmul.f32 %v973_v40, %v964_v51  ;;  %v280_v61 = vsel %vm245_vm5, %v1827_v20, %v2669_v48  ;;  %v962_v25 = vadd.f32 %v960_v56, %v945_v1  ;;  %v1833_v48 = vunpack.i.h.bf16 %v2690_v45 }
 0x10c   :  { %v974_v0 = vsel %vm245_vm5, %v1823_v37, %v2636_v27  ;;  %v264_v6 = vsel %vm245_vm5, %v1822_v43, %v2638_v46  ;;  %v990_v42 = vsel %vm245_vm5, %v1828_v11, %v2692_v59  ;;  %v963_v21 = vadd.f32 %v961_v9, %v946_v57  ;;  %v3312_v46 = vld [vmem:[#allocation23_spill] sm:$0xff]  ;;  %v3313_v59 = vld [vmem:[#allocation20_spill] sm:$0xff]  ;;  %v3314_v9 = vld [vmem:[#allocation22_spill] sm:$0xff] }
 0x10d   :  { %v292_v24 = vpop.permute.xlu1 %291  ;;  %v1836_v14 = vpop.permute.xlu0 %1835  ;;  %v251_v26 = vmul.f32 %v947_v41, %v247_v28  ;;  %v269_v62 = vadd.f32 %v267_v15, %v252_v47  ;;  %v1832_v63 = vunpack.i.l.bf16 %v2690_v45  ;;  %v284_v12 = vmul.f32 %v981_v49, %v280_v61  ;;  %v1015_v11 = vld [vmem:[#allocation6 + $0x15] ss:$0 sm:$0xff] }
 0x10e   :  { %v1837_v32 = vunpack.i.l.bf16 %v1836_v14  ;;  %v1838_v36 = vunpack.i.h.bf16 %v1836_v14  ;;  %v998_v14 = vld [vmem:[#allocation6 + $0x10] ss:$0 sm:$0xff]  ;;  %v979_v33 = vadd.f32 %v977_v17, %v962_v25  ;;  %v978_v3 = vmul.f32 %v974_v0, %v964_v51 }
 0x10f   :  { %1245 = vrot.lane.b32.xlu1 %v2275_v18, %s2120_s27  ;;  %1930 = vrot.lane.b32.xlu0 %v3308_v8, %s2120_s27  ;;  %v268_v41 = vmul.f32 %v964_v51, %v264_v6  ;;  %v994_v29 = vmul.f32 %v990_v42, %v981_v49  ;;  %v281_v55 = vsel %vm245_vm5, %v1832_v63, %v2710_v52  ;;  %v3316_v6 = vld [vmem:[#allocation25_spill] sm:$0xff] }
 0x110   :  { %v297_v54 = vsel %vm245_vm5, %v1837_v32, %v292_v24  ;;  %v991_v24 = vsel %vm245_vm5, %v1833_v48, %v2708_v34  ;;  %v286_v57 = vadd.f32 %v284_v12, %v269_v62  ;;  %v980_v32 = vadd.f32 %v978_v3, %v963_v21  ;;  %v3317_v21 = vld [vmem:[#allocation16_spill] sm:$0xff]  ;;  %v1046_v48 = vld [vmem:[#allocation6 + $0xc] ss:$0 sm:$0xff]  ;;  %v3318_v12 = vld [vmem:[#allocation15_spill] sm:$0xff] }
 0x111   :  { %v1841_v2 = vpop.permute.xlu1 %1840  ;;  %v1002_v53 = vpop.permute.xlu0 %1001  ;;  %v301_v1 = vmul.f32 %v998_v14, %v297_v54  ;;  %v996_v34 = vadd.f32 %v994_v29, %v979_v33  ;;  %v995_v52 = vmul.f32 %v991_v24, %v981_v49  ;;  %v285_v28 = vmul.f32 %v981_v49, %v281_v55  ;;  %v3319_v55 = vld [vmem:[#allocation30_spill] sm:$0xff] }
 0x112   :  { %v1007_v27 = vsel %vm245_vm5, %v1838_v36, %v1002_v53  ;;  %v1843_v45 = vunpack.i.h.bf16 %v1841_v2  ;;  %v1842_v20 = vunpack.i.l.bf16 %v1841_v2  ;;  %v253_v53 = vadd.f32 %v251_v26, %v235_v13 }
 0x113   :  { %1935 = vrot.lane.b32.xlu1 %v3310_v58, %s2120_s27  ;;  %550 = vrot.lane.b32.xlu0 %v3311_v16, %s2120_s27  ;;  %v1011_v39 = vmul.f32 %v1007_v27, %v998_v14  ;;  %v303_v38 = vadd.f32 %v301_v1, %v286_v57  ;;  %v1036_v26 = vmul.f32 %v2610_v31, %v3317_v21 }
 0x114   :  { %v270_v13 = vadd.f32 %v268_v41, %v253_v53 }
 0x115   :  { %v1006_v60 = vpop.permute.xlu1 %1005  ;;  %v296_v35 = vpop.permute.xlu0 %295  ;;  %v1013_v47 = vadd.f32 %v1011_v39, %v996_v34  ;;  %v337_v39 = vmul.f32 %v1046_v48, %v2236_v4  ;;  %v1048_v34 = vmul.f32 %v1046_v48, %v2275_v18  ;;  %v3323_v18 = vld [vmem:[#allocation27_spill] sm:$0xff] }
 0x116   :  { %v1008_v51 = vsel %vm245_vm5, %v1843_v45, %v1006_v60  ;;  %v298_v15 = vsel %vm245_vm5, %v1842_v20, %v296_v35  ;;  %v997_v60 = vadd.f32 %v995_v52, %v980_v32  ;;  %v287_v62 = vadd.f32 %v285_v28, %v270_v13 }
 0x117   :  { %554 = vrot.lane.b32.xlu1 %v3312_v46, %s2120_s27  ;;  %1258 = vrot.lane.b32.xlu0 %v3313_v59, %s2120_s27  ;;  %v1012_v17 = vmul.f32 %v1008_v51, %v998_v14  ;;  %v302_v25 = vmul.f32 %v998_v14, %v298_v15  ;;  %v326_v14 = vmul.f32 %v2610_v31, %v3318_v12  ;;  %v3322_v15 = vld [vmem:[#allocation31_spill] sm:$0xff] }
 0x118   :  { %v1043_v20 = vmul.f32 %v2622_v44, %v2289_v22  ;;  %v338_v22 = vmul.f32 %v1046_v48, %v2244_v10 }
 0x119   :  { %v309_v30 = vpop.permute.xlu1 %308  ;;  %v1846_v7 = vpop.permute.xlu0 %1845  ;;  %v1014_v3 = vadd.f32 %v1012_v17, %v997_v60  ;;  %v304_v24 = vadd.f32 %v302_v25, %v287_v62  ;;  %v363_v60 = vld [vmem:[#allocation6 + $0x3] ss:$0 sm:$0xff] }
 0x11a   :  { %v1848_v56 = vunpack.i.h.bf16 %v1846_v7  ;;  %v1847_v40 = vunpack.i.l.bf16 %v1846_v7  ;;  %v3320_v7 = vld [vmem:[#allocation26_spill] sm:$0xff] }
 0x11b   :  { %1262 = vrot.lane.b32.xlu1 %v3314_v9, %s2120_s27  ;;  %1940 = vrot.lane.b32.xlu0 %v3310_v58, %s2120_s27  ;;  %v3315_v58 = vld [vmem:[#allocation24_spill] sm:$0xff] }
 0x11c   :  { %v314_v2 = vsel %vm245_vm5, %v1847_v40, %v309_v30  ;;  %v333_v40 = vmul.f32 %v2622_v44, %v2281_v19 }
 0x11d   :  { %v1851_v37 = vpop.permute.xlu1 %1850  ;;  %v1019_v43 = vpop.permute.xlu0 %1018  ;;  %v318_v36 = vmul.f32 %v1015_v11, %v314_v2 }
 0x11e   :  { %v1024_v61 = vsel %vm245_vm5, %v1848_v56, %v1019_v43  ;;  %v1853_v49 = vunpack.i.h.bf16 %v1851_v37  ;;  %v1852_v35 = vunpack.i.l.bf16 %v1851_v37  ;;  %v348_v43 = vld [vmem:[#allocation6 + $0x16] ss:$0 sm:$0xff] }
 0x11f   :  { %v1028_v0 = vmul.f32 %v1024_v61, %v1015_v11  ;;  %1945 = vrot.lane.b32.xlu1 %v3315_v58, %s2120_s27  ;;  %567 = vrot.lane.b32.xlu0 %v3316_v6, %s2120_s27  ;;  %v320_v42 = vadd.f32 %v318_v36, %v303_v38 }
 0x121   :  { %v1030_v54 = vadd.f32 %v1028_v0, %v1013_v47  ;;  %v1023_v63 = vpop.permute.xlu1 %1022  ;;  %v313_v27 = vpop.permute.xlu0 %312  ;;  %v327_v33 = vadd.f32 %v2648_v50, %v320_v42  ;;  %v3321_v50 = vld [vmem:[#allocation28_spill] sm:$0xff] }
 0x122   :  { %v1025_v41 = vsel %vm245_vm5, %v1853_v49, %v1023_v63  ;;  %v315_v29 = vsel %vm245_vm5, %v1852_v35, %v313_v27 }
 0x123   :  { %v1037_v45 = vadd.f32 %v3319_v55, %v1030_v54  ;;  %v1029_v1 = vmul.f32 %v1025_v41, %v1015_v11  ;;  %v319_v30 = vmul.f32 %v1015_v11, %v315_v29  ;;  %1275 = vrot.lane.b32.xlu0 %v3320_v7, %s2120_s27  ;;  %v334_v31 = vadd.f32 %v2644_v23, %v327_v33  ;;  %v341_v11 = vld [vmem:[#allocation6 + $0x11] ss:$0 sm:$0xff] }
 0x124   :  { %571 = vrot.lane.b32.xlu1 %v3321_v50, %s2120_s27  ;;  %v1047_v23 = vmul.f32 %v1046_v48, %v2238_v5  ;;  %v344_v44 = vmul.f32 %v341_v11, %v3311_v16  ;;  %v345_v5 = vmul.f32 %v341_v11, %v3312_v46  ;;  %v1055_v13 = vmul.f32 %v3314_v9, %v341_v11 }
 0x125   :  { %v1031_v56 = vadd.f32 %v1029_v1, %v1014_v3  ;;  %v321_v53 = vadd.f32 %v319_v30, %v304_v24  ;;  %v1856_v57 = vpop.permute.xlu1 %1855  ;;  %v381_v51 = vpop.permute.xlu0 %380  ;;  %v1044_v2 = vadd.f32 %v3322_v15, %v1037_v45  ;;  %v339_v28 = vadd.f32 %v337_v39, %v334_v31  ;;  %v397_v45 = vld [vmem:[#allocation6 + $0x8] ss:$0 sm:$0xff] }
 0x126   :  { %v1857_v52 = vunpack.i.l.bf16 %v1856_v57  ;;  %v1858_v19 = vunpack.i.h.bf16 %v1856_v57  ;;  %v1054_v17 = vmul.f32 %v3313_v59, %v341_v11  ;;  %v352_v46 = vmul.f32 %v348_v43, %v3321_v50 }
 0x127   :  { %v1038_v32 = vadd.f32 %v1036_v26, %v1031_v56  ;;  %v328_v4 = vadd.f32 %v326_v14, %v321_v53  ;;  %1950 = vrot.lane.b32.xlu0 %v3315_v58, %s2120_s27  ;;  %v1049_v0 = vadd.f32 %v1047_v23, %v1044_v2  ;;  %v351_v58 = vmul.f32 %v348_v43, %v3316_v6 }
 0x128   :  { %v389_v38 = vsel %vm388_vm6, %v381_v51, %v1857_v52  ;;  %1279 = vrot.lane.b32.xlu1 %v3323_v18, %s2120_s27  ;;  %v346_v42 = vadd.f32 %v344_v44, %v339_v28  ;;  %v1062_v9 = vmul.f32 %v3323_v18, %v348_v43  ;;  %v1061_v54 = vmul.f32 %v3320_v7, %v348_v43 }
 0x129   :  { %v1045_v10 = vadd.f32 %v1043_v20, %v1038_v32  ;;  %v335_v37 = vadd.f32 %v333_v40, %v328_v4  ;;  %v385_v36 = vpop.permute.xlu1 %384  ;;  %v1091_v47 = vpop.permute.xlu0 %1090  ;;  %v1056_v48 = vadd.f32 %v1054_v17, %v1049_v0  ;;  %v393_v6 = vmul.f32 %v389_v38, %v363_v60 }
 0x12a   :  { %v1098_v61 = vsel %vm388_vm6, %v1091_v47, %v1858_v19  ;;  %v353_v63 = vadd.f32 %v351_v58, %v346_v42 }
 0x12b   :  { %v1050_v16 = vadd.f32 %v1048_v34, %v1045_v10  ;;  %v340_v25 = vadd.f32 %v338_v22, %v335_v37  ;;  %1955 = vrot.lane.b32.xlu0 %v3308_v8, %s2121_s28  ;;  %v1063_v1 = vadd.f32 %v1061_v54, %v1056_v48  ;;  %v1102_v30 = vmul.f32 %v1098_v61, %v363_v60  ;;  %v424_v10 = vld [vmem:[#allocation6 + $0xd] ss:$0 sm:$0xff] }
 0x12c   :  { %v395_v39 = vadd.f32 %v393_v6, %v353_v63 }
 0x12d   :  { %v1095_v49 = vpop.permute.xlu1 %1094  ;;  %v1057_v35 = vadd.f32 %v1055_v13, %v1050_v16  ;;  %v1861_v59 = vpop.permute.xlu0 %1860  ;;  %v347_v21 = vadd.f32 %v345_v5, %v340_v25  ;;  %v1104_v11 = vadd.f32 %v1102_v30, %v1063_v1 }
 0x12e   :  { %v1863_v26 = vunpack.i.h.bf16 %v1861_v59  ;;  %v1862_v62 = vunpack.i.l.bf16 %v1861_v59 }
 0x12f   :  { %1960 = vrot.lane.b32.xlu0 %v3308_v8, %s2118_s26  ;;  %v1064_v27 = vadd.f32 %v1062_v9, %v1057_v35  ;;  %v354_v3 = vadd.f32 %v352_v46, %v347_v21 }
 0x130   :  { %v1099_v12 = vsel %vm388_vm6, %v1095_v49, %v1863_v26  ;;  %v390_v14 = vsel %vm388_vm6, %v385_v36, %v1862_v62 }
 0x131   :  { %v1103_v33 = vmul.f32 %v1099_v12, %v363_v60  ;;  %v394_v41 = vmul.f32 %v390_v14, %v363_v60  ;;  %v1866_v29 = vpop.permute.xlu1 %1865  ;;  %v409_v24 = vpop.permute.xlu0 %408 }
 0x132   :  { %v1867_v55 = vunpack.i.l.bf16 %v1866_v29  ;;  %v1868_v31 = vunpack.i.h.bf16 %v1866_v29 }
 0x133   :  { %v1105_v7 = vadd.f32 %v1103_v33, %v1064_v27  ;;  %v396_v20 = vadd.f32 %v394_v41, %v354_v3  ;;  %v441_v33 = vld [vmem:[#allocation6 + $0x12] ss:$0 sm:$0xff] }
 0x134   :  { %v416_v50 = vsel %vm388_vm6, %v409_v24, %v1867_v55 }
 0x135   :  { %v420_v56 = vmul.f32 %v416_v50, %v397_v45  ;;  %v413_v40 = vpop.permute.xlu1 %412  ;;  %v1118_v53 = vpop.permute.xlu0 %1117 }
 0x136   :  { %v1125_v57 = vsel %vm388_vm6, %v1118_v53, %v1868_v31 }
 0x137   :  { %v422_v51 = vadd.f32 %v420_v56, %v395_v39  ;;  %v1129_v34 = vmul.f32 %v1125_v57, %v397_v45 }
 0x139   :  { %v1131_v22 = vadd.f32 %v1129_v34, %v1104_v11  ;;  %v1122_v52 = vpop.permute.xlu1 %1121  ;;  %v1871_v23 = vpop.permute.xlu0 %1870 }
 0x13a   :  { %v1873_v15 = vunpack.i.h.bf16 %v1871_v23  ;;  %v1872_v2 = vunpack.i.l.bf16 %v1871_v23 }
 0x13c   :  { %v1126_v32 = vsel %vm388_vm6, %v1122_v52, %v1873_v15  ;;  %v417_v4 = vsel %vm388_vm6, %v413_v40, %v1872_v2 }
 0x13d   :  { %v1130_v19 = vmul.f32 %v1126_v32, %v397_v45  ;;  %v421_v44 = vmul.f32 %v417_v4, %v397_v45  ;;  %v1876_v28 = vpop.permute.xlu1 %1875  ;;  %v426_v38 = vpop.permute.xlu0 %425 }
 0x13e   :  { %v1877_v18 = vunpack.i.l.bf16 %v1876_v28  ;;  %v1878_v43 = vunpack.i.h.bf16 %v1876_v28 }
 0x13f   :  { %v423_v37 = vadd.f32 %v421_v44, %v396_v20  ;;  %v1132_v5 = vadd.f32 %v1130_v19, %v1105_v7 }
 0x140   :  { %v433_v36 = vsel %vm388_vm6, %v426_v38, %v1877_v18 }
 0x141   :  { %v437_v13 = vmul.f32 %v433_v36, %v424_v10  ;;  %v430_v47 = vpop.permute.xlu1 %429  ;;  %v1135_v17 = vpop.permute.xlu0 %1134 }
 0x142   :  { %v1142_v61 = vsel %vm388_vm6, %v1135_v17, %v1878_v43 }
 0x143   :  { %v2830_v16 = vadd.f32 %v437_v13, %v422_v51  ;;  %v1146_v25 = vmul.f32 %v1142_v61, %v424_v10  ;;  %v470_v13 = vld [vmem:[#allocation6 + $0x17] ss:$0 sm:$0xff] }
 0x145   :  { %v2832_v0 = vadd.f32 %v1146_v25, %v1131_v22  ;;  %v1139_v58 = vpop.permute.xlu1 %1138  ;;  %v1881_v42 = vpop.permute.xlu0 %1880 }
 0x146   :  { %v1883_v46 = vunpack.i.h.bf16 %v1881_v42  ;;  %v1882_v60 = vunpack.i.l.bf16 %v1881_v42 }
 0x148   :  { %v1143_v9 = vsel %vm388_vm6, %v1139_v58, %v1883_v46  ;;  %v434_v49 = vsel %vm388_vm6, %v430_v47, %v1882_v60 }
 0x149   :  { %v1147_v35 = vmul.f32 %v1143_v9, %v424_v10  ;;  %v438_v59 = vmul.f32 %v434_v49, %v424_v10  ;;  %v1886_v21 = vpop.permute.xlu1 %1885  ;;  %v455_v26 = vpop.permute.xlu0 %454 }
 0x14a   :  { %v1887_v44 = vunpack.i.l.bf16 %v1886_v21  ;;  %v1888_v10 = vunpack.i.h.bf16 %v1886_v21 }
 0x14b   :  { %v440_v62 = vadd.f32 %v438_v59, %v423_v37  ;;  %v1149_v54 = vadd.f32 %v1147_v35, %v1132_v5  ;;  %v2869_v35 = vld [vmem:[#allocation6 + $0x4] ss:$0 sm:$0xff] }
 0x14c   :  { %v462_v37 = vsel %vm388_vm6, %v455_v26, %v1887_v44 }
 0x14d   :  { %v459_v48 = vpop.permute.xlu1 %458  ;;  %v1164_v63 = vpop.permute.xlu0 %1163  ;;  %v466_v61 = vmul.f32 %v462_v37, %v441_v33 }
 0x14e   :  { %v1171_v43 = vsel %vm388_vm6, %v1164_v63, %v1888_v10 }
 0x14f   :  { %v1175_v60 = vmul.f32 %v1171_v43, %v441_v33 }
 0x151   :  { %v1168_v6 = vpop.permute.xlu1 %1167  ;;  %v1891_v12 = vpop.permute.xlu0 %1890 }
 0x152   :  { %v1893_v14 = vunpack.i.h.bf16 %v1891_v12  ;;  %v1892_v27 = vunpack.i.l.bf16 %v1891_v12 }
 0x154   :  { %v1172_v3 = vsel %vm388_vm6, %v1168_v6, %v1893_v14  ;;  %v463_v41 = vsel %vm388_vm6, %v459_v48, %v1892_v27 }
 0x155   :  { %v1176_v29 = vmul.f32 %v1172_v3, %v441_v33  ;;  %v467_v24 = vmul.f32 %v463_v41, %v441_v33  ;;  %v1896_v55 = vpop.permute.xlu1 %1895  ;;  %v482_v45 = vpop.permute.xlu0 %481  ;;  %v2879_v33 = vld [vmem:[#allocation6 + $0x9] ss:$0 sm:$0xff] }
 0x156   :  { %v1897_v28 = vunpack.i.l.bf16 %v1896_v55  ;;  %v1898_v36 = vunpack.i.h.bf16 %v1896_v55 }
 0x157   :  { %v2838_v1 = vadd.f32 %v467_v24, %v440_v62  ;;  %v2840_v30 = vadd.f32 %v1176_v29, %v1149_v54  ;;  %v468_v62 = vadd.f32 %v466_v61, %v2830_v16  ;;  %v1177_v29 = vadd.f32 %v1175_v60, %v2832_v0 }
 0x158   :  { %v489_v47 = vsel %vm388_vm6, %v482_v45, %v1897_v28 }
 0x159   :  { %v486_v7 = vpop.permute.xlu1 %485  ;;  %v1191_v20 = vpop.permute.xlu0 %1190  ;;  %v493_v9 = vmul.f32 %v489_v47, %v470_v13 }
 0x15a   :  { %v1198_v42 = vsel %vm388_vm6, %v1191_v20, %v1898_v36 }
 0x15b   :  { %v1202_v54 = vmul.f32 %v1198_v42, %v470_v13  ;;  %v495_v24 = vadd.f32 %v493_v9, %v468_v62  ;;  %v566_v9 = vld [vmem:[#allocation6 + $0x18] ss:$0 sm:$0xff] }
 0x15d   :  { %v2842_v31 = vpop.permute.xlu1 %1194  ;;  %v2844_v50 = vpop.permute.xlu0 %1900 }
 0x15e   :  { %v1902_v17 = vunpack.i.l.bf16 %v2844_v50  ;;  %v1903_v48 = vunpack.i.h.bf16 %v2844_v50  ;;  %v2886_v50 = vld [vmem:[#allocation6 + $0xe] ss:$0 sm:$0xff] }
 0x160   :  { %v490_v21 = vsel %vm388_vm6, %v486_v7, %v1902_v17 }
 0x161   :  { %v1906_v39 = vpop.permute.xlu1 %1905  ;;  %v499_v56 = vpop.permute.xlu0 %498  ;;  %v494_v16 = vmul.f32 %v490_v21, %v470_v13 }
 0x162   :  { %v1907_v5 = vunpack.i.l.bf16 %v1906_v39  ;;  %v1908_v49 = vunpack.i.h.bf16 %v1906_v39 }
 0x163   :  { %v496_v36 = vadd.f32 %v494_v16, %v2838_v1 }
 0x164   :  { %v507_v59 = vsel %vm506_vm7, %v499_v56, %v1907_v5  ;;  %v1204_v56 = vadd.f32 %v1202_v54, %v1177_v29 }
 0x165   :  { %v2846_v40 = vpop.permute.xlu1 %502  ;;  %v1208_v53 = vpop.permute.xlu0 %1207  ;;  %v511_v14 = vmul.f32 %v507_v59, %v2869_v35 }
 0x166   :  { %v1215_v63 = vsel %vm506_vm7, %v1208_v53, %v1908_v49  ;;  %v1199_v53 = vsel %vm388_vm6, %v2842_v31, %v1903_v48 }
 0x167   :  { %v1219_v45 = vmul.f32 %v1215_v63, %v2869_v35  ;;  %v513_v28 = vadd.f32 %v511_v14, %v495_v24  ;;  %v1203_v43 = vmul.f32 %v1199_v53, %v470_v13 }
 0x169   :  { %v2848_v57 = vpop.permute.xlu1 %1211  ;;  %v2850_v11 = vpop.permute.xlu0 %1910  ;;  %v1221_v47 = vadd.f32 %v1219_v45, %v1204_v56 }
 0x16a   :  { %v1912_v55 = vunpack.i.l.bf16 %v2850_v11 }
 0x16d   :  { %v1916_v51 = vpop.permute.xlu1 %1915  ;;  %v517_v34 = vpop.permute.xlu0 %516 }
 0x16e   :  { %v1917_v46 = vunpack.i.l.bf16 %v1916_v51  ;;  %v1918_v27 = vunpack.i.h.bf16 %v1916_v51  ;;  %v1913_v51 = vunpack.i.h.bf16 %v2850_v11 }
 0x170   :  { %v524_v3 = vsel %vm506_vm7, %v517_v34, %v1917_v46  ;;  %v1216_v17 = vsel %vm506_vm7, %v2848_v57, %v1913_v51 }
 0x171   :  { %v2852_v22 = vpop.permute.xlu1 %520  ;;  %v1225_v52 = vpop.permute.xlu0 %1224  ;;  %v528_v0 = vmul.f32 %v524_v3, %v2879_v33  ;;  %v1220_v63 = vmul.f32 %v1216_v17, %v2869_v35 }
 0x172   :  { %v1232_v7 = vsel %vm506_vm7, %v1225_v52, %v1918_v27  ;;  %v2894_v52 = vld [vmem:[#allocation6 + $0x13] ss:$0 sm:$0xff] }
 0x173   :  { %v1236_v5 = vmul.f32 %v1232_v7, %v2879_v33  ;;  %v530_v61 = vadd.f32 %v528_v0, %v513_v28  ;;  %v1205_v7 = vadd.f32 %v1203_v43, %v2840_v30 }
 0x175   :  { %v2854_v23 = vpop.permute.xlu1 %1228  ;;  %v2856_v15 = vpop.permute.xlu0 %1920  ;;  %v1238_v49 = vadd.f32 %v1236_v5, %v1221_v47 }
 0x176   :  { %v1922_v31 = vunpack.i.l.bf16 %v2856_v15  ;;  %v1923_v60 = vunpack.i.h.bf16 %v2856_v15 }
 0x178   :  { %v525_v59 = vsel %vm506_vm7, %v2852_v22, %v1922_v31  ;;  %v1233_v3 = vsel %vm506_vm7, %v2854_v23, %v1923_v60  ;;  %v1511_v60 = vld [vmem:[#allocation8 + $0x18] sm:$0xff] }
 0x179   :  { %v1926_v2 = vpop.permute.xlu1 %1925  ;;  %v534_v32 = vpop.permute.xlu0 %533 }
 0x17a   :  { %v1927_v26 = vunpack.i.l.bf16 %v1926_v2  ;;  %v1928_v20 = vunpack.i.h.bf16 %v1926_v2 }
 0x17c   :  { %v541_v39 = vsel %vm506_vm7, %v534_v32, %v1927_v26  ;;  %v508_v32 = vsel %vm506_vm7, %v2846_v40, %v1912_v55 }
 0x17d   :  { %v2858_v4 = vpop.permute.xlu1 %537  ;;  %v1242_v19 = vpop.permute.xlu0 %1241  ;;  %v545_v11 = vmul.f32 %v541_v39, %v2886_v50  ;;  %v512_v46 = vmul.f32 %v508_v32, %v2869_v35  ;;  %v529_v35 = vmul.f32 %v525_v59, %v2879_v33  ;;  %v1237_v39 = vmul.f32 %v1233_v3, %v2879_v33  ;;  %v1514_v59 = vld [vmem:[#allocation8 + $0x30] sm:$0xff] }
 0x17e   :  { %v1249_v10 = vsel %vm506_vm7, %v1242_v19, %v1928_v20  ;;  %v1522_v3 = vld [vmem:[#allocation8 + $0x70] sm:$0xff] }
 0x17f   :  { %v547_v57 = vadd.f32 %v545_v11, %v530_v61  ;;  %v514_v20 = vadd.f32 %v512_v46, %v496_v36  ;;  %v1510_v46 = vld [vmem:[#allocation8 + $0x10] sm:$0xff] }
 0x181   :  { %v2860_v38 = vpop.permute.xlu1 %1245  ;;  %v2862_v18 = vpop.permute.xlu0 %1930 }
 0x182   :  { %v1932_v13 = vunpack.i.l.bf16 %v2862_v18  ;;  %v1933_v26 = vunpack.i.h.bf16 %v2862_v18  ;;  %v583_v18 = vld [vmem:[%s3248_s2] ss:$0 sm:$0xff]  ;;  %s2122_s2 = smov 104  }
 0x184   :  { %v542_v22 = vsel %vm506_vm7, %v2858_v4, %v1932_v13  ;;  %v1250_v23 = vsel %vm506_vm7, %v2860_v38, %v1933_v26  ;;  %v1698_v13 = vpack.c.bf16 %v1511_v60, %v1510_v46  ;;  %v1516_v26 = vld [vmem:[#allocation8 + $0x40] sm:$0xff] }
 0x185   :  { %v1936_v25 = vpop.permute.xlu1 %1935  ;;  %v551_v58 = vpop.permute.xlu0 %550  ;;  %v546_v56 = vmul.f32 %v542_v22, %v2886_v50  ;;  %v1254_v38 = vmul.f32 %v1250_v23, %v2886_v50  ;;  %v1523_v22 = vld [vmem:[#allocation8 + $0x78] sm:$0xff] }
 0x186   :  { %v1937_v41 = vunpack.i.l.bf16 %v1936_v25  ;;  %v1938_v37 = vunpack.i.h.bf16 %v1936_v25  ;;  %v1253_v25 = vmul.f32 %v1249_v10, %v2886_v50 }
 0x188   :  { %v558_v2 = vsel %vm506_vm7, %v551_v58, %v1937_v41  ;;  %v1255_v15 = vadd.f32 %v1253_v25, %v1238_v49 }
 0x189   :  { %v2876_v6 = vpop.permute.xlu1 %554  ;;  %v1259_v12 = vpop.permute.xlu0 %1258  ;;  %v562_v40 = vmul.f32 %v558_v2, %v2894_v52  ;;  %v531_v2 = vadd.f32 %v529_v35, %v514_v20 }
 0x18a   :  { %v1266_v19 = vsel %vm506_vm7, %v1259_v12, %v1938_v37 }
 0x18b   :  { %v1270_v21 = vmul.f32 %v1266_v19, %v2894_v52  ;;  %v564_v12 = vadd.f32 %v562_v40, %v547_v57  ;;  %v548_v11 = vadd.f32 %v546_v56, %v531_v2  ;;  %v1508_v40 = vld [vmem:[#allocation8] sm:$0xff]  ;;  %v1515_v57 = vld [vmem:[#allocation8 + $0x38] sm:$0xff] }
 0x18d   :  { %v1263_v34 = vpop.permute.xlu1 %1262  ;;  %v1941_v44 = vpop.permute.xlu0 %1940  ;;  %v1272_v16 = vadd.f32 %v1270_v21, %v1255_v15  ;;  %v1706_v21 = vpack.c.bf16 %v1515_v57, %v1514_v59 }
 0x18e   :  { %v1942_v62 = vunpack.i.l.bf16 %v1941_v44  ;;  %v1943_v41 = vunpack.i.h.bf16 %v1941_v44  ;;  %v1222_v44 = vadd.f32 %v1220_v63, %v1205_v7  ;;  %v1519_v63 = vld [vmem:[#allocation8 + $0x58] sm:$0xff] }
 0x190   :  { %v559_v4 = vsel %vm506_vm7, %v2876_v6, %v1942_v62  ;;  %v1267_v28 = vsel %vm506_vm7, %v1263_v34, %v1943_v41  ;;  %v1239_v31 = vadd.f32 %v1237_v39, %v1222_v44  ;;  %v1517_v62 = vld [vmem:[#allocation8 + $0x48] sm:$0xff]  ;;  %v1722_v41 = vpack.c.bf16 %v1523_v22, %v1522_v3  ;;  %v3026_v39 = vld [vmem:[%s3249_s3 + $0x1] ss:$0 sm:$0xff] }
 0x191   :  { %v1946_v58 = vpop.permute.xlu1 %1945  ;;  %v568_v42 = vpop.permute.xlu0 %567  ;;  %v563_v32 = vmul.f32 %v559_v4, %v2894_v52  ;;  %v1271_v34 = vmul.f32 %v1267_v28, %v2894_v52  ;;  %v3021_v4 = vld [vmem:[%s3249_s3] ss:$0 sm:$0xff] }
 0x192   :  { %v1947_v1 = vunpack.i.l.bf16 %v1946_v58  ;;  %v1948_v54 = vunpack.i.h.bf16 %v1946_v58  ;;  %v1256_v36 = vadd.f32 %v1254_v38, %v1239_v31  ;;  %v1509_v58 = vld [vmem:[#allocation8 + $0x8] sm:$0xff] }
 0x193   :  { %v565_v50 = vadd.f32 %v563_v32, %v548_v11 }
 0x194   :  { %v575_v48 = vsel %vm506_vm7, %v568_v42, %v1947_v1  ;;  %v1273_v17 = vadd.f32 %v1271_v34, %v1256_v36  ;;  %v1694_v42 = vpack.c.bf16 %v1509_v58, %v1508_v40  ;;  %v1512_v1 = vld [vmem:[#allocation8 + $0x20] sm:$0xff] }
 0x195   :  { %v579_v14 = vmul.f32 %v575_v48, %v566_v9  ;;  %v1276_v27 = vpop.permute.xlu0 %1275  ;;  %v1518_v48 = vld [vmem:[#allocation8 + $0x50] sm:$0xff] }
 0x196   :  { %v1283_v29 = vsel %vm506_vm7, %v1276_v27, %v1948_v54  ;;  %v572_v24 = vpop.permute.xlu1 %571  ;;  %1695 = vmatprep.subr.bf16.mxu0 %v1694_v42  ;;  %1726 = vmatprep.subr.bf16.mxu1 %v1694_v42  ;;  %v1710_v54 = vpack.c.bf16 %v1517_v62, %v1516_v26  ;;  %v1714_v15 = vpack.c.bf16 %v1519_v63, %v1518_v48 }
 0x197   :  { %v581_v55 = vadd.f32 %v579_v14, %v564_v12  ;;  %v1287_v45 = vmul.f32 %v1283_v29, %v566_v9  ;;  %1697 = vmatpush3.bf16.msra.mxu0 %v1694_v42  ;;  %1734 = vmatpush3.bf16.msra.mxu1 %v1694_v42  ;;  %v1520_v12 = vld [vmem:[#allocation8 + $0x60] sm:$0xff]  ;;  %v1521_v14 = vld [vmem:[#allocation8 + $0x68] sm:$0xff] }
 0x198   :  { %1699 = vmatprep.subr.bf16.mxu0 %v1698_v13  ;;  %1727 = vmatprep.subr.bf16.mxu1 %v1698_v13  ;;  %v1718_v27 = vpack.c.bf16 %v1521_v14, %v1520_v12 }
 0x199   :  { %v2933_v53 = vadd.f32 %v583_v18, %v581_v55  ;;  %v1289_v51 = vadd.f32 %v1287_v45, %v1272_v16  ;;  %v1951_v0 = vpop.permute.xlu0 %1950 }
 0x19a   :  { %v1953_v10 = vunpack.i.h.bf16 %v1951_v0  ;;  %v1952_v30 = vunpack.i.l.bf16 %v1951_v0  ;;  %v1280_v37 = vpop.permute.xlu1 %1279 }
 0x19b   :  { %v2938_v6 = vadd.f32 %v1289_v51, %v583_v18  ;;  %599 = vrot.lane.b32.xlu1 %v2933_v53, %s2121_s28  ;;  %1701 = vmatpush3.bf16.msra.mxu0 %v1698_v13 }
 0x19c   :  { %v576_v33 = vsel %vm506_vm7, %v572_v24, %v1952_v30  ;;  %v1284_v5 = vsel %vm506_vm7, %v1280_v37, %v1953_v10  ;;  %1735 = vmatpush3.bf16.msra.mxu1 %v1698_v13 }
 0x19d   :  { %v580_v43 = vmul.f32 %v576_v33, %v566_v9  ;;  %1307 = vrot.lane.b32.xlu0 %v2938_v6, %s2121_s28  ;;  %v1288_v47 = vmul.f32 %v1284_v5, %v566_v9  ;;  %v1513_v9 = vld [vmem:[#allocation8 + $0x28] sm:$0xff]  ;;  %v3034_v33 = vld [vmem:[%s3249_s3 + $0x2] ss:$0 sm:$0xff] }
 0x19e   :  { %v1702_v49 = vpack.c.bf16 %v1513_v9, %v1512_v1 }
 0x19f   :  { %617 = vrot.lane.b32.xlu1 %v2933_v53, %s2118_s26  ;;  %v582_v19 = vadd.f32 %v580_v43, %v565_v50  ;;  %v1290_v61 = vadd.f32 %v1288_v47, %v1273_v17  ;;  %v3041_v43 = vld [vmem:[%s3249_s3 + $0x3] ss:$0 sm:$0xff] }
 0x1a0   :  { %1703 = vmatprep.subr.bf16.mxu0 %v1702_v49  ;;  %1728 = vmatprep.subr.bf16.mxu1 %v1702_v49  ;;  %v1356_v36 = vmul.f32 %v3041_v43, %v2938_v6 }
 0x1a1   :  { %1965 = vrot.lane.b32.xlu0 %v3308_v8, %s2121_s28  ;;  %v2953_v52 = vadd.f32 %v583_v18, %v582_v19  ;;  %v2957_v25 = vadd.f32 %v1290_v61, %v583_v18  ;;  %1705 = vmatpush3.bf16.msra.mxu0 %v1702_v49  ;;  %v1956_v18 = vpop.permute.xlu0 %1955 }
 0x1a2   :  { %1736 = vmatpush3.bf16.msra.mxu1 %v1702_v49  ;;  %1707 = vmatprep.subr.bf16.mxu0 %v1706_v21  ;;  %v1958_v55 = vunpack.i.h.bf16 %v1956_v18  ;;  %v1957_v9 = vunpack.i.l.bf16 %v1956_v18 }
 0x1a3   :  { %1324 = vrot.lane.b32.xlu1 %v2938_v6, %s2118_s26  ;;  %1729 = vmatprep.subr.bf16.mxu1 %v1706_v21 }
 0x1a5   :  { %1970 = vrot.lane.b32.xlu0 %v3308_v8, %s2118_s26  ;;  %1709 = vmatpush3.bf16.msra.mxu0 %v1706_v21  ;;  %v1961_v29 = vpop.permute.xlu0 %1960 }
 0x1a6   :  { %1737 = vmatpush3.bf16.msra.mxu1 %v1706_v21  ;;  %1711 = vmatprep.subr.bf16.mxu0 %v1710_v54  ;;  %v1963_v7 = vunpack.i.h.bf16 %v1961_v29  ;;  %v1962_v13 = vunpack.i.l.bf16 %v1961_v29 }
 0x1a7   :  { %603 = vrot.lane.b32.xlu1 %v2953_v52, %s2121_s28  ;;  %1730 = vmatprep.subr.bf16.mxu1 %v1710_v54 }
 0x1a9   :  { %1311 = vrot.lane.b32.xlu0 %v2957_v25, %s2121_s28  ;;  %1713 = vmatpush3.bf16.msra.mxu0 %v1710_v54 }
 0x1aa   :  { %1715 = vmatprep.subr.bf16.mxu0 %v1714_v15  ;;  %1738 = vmatpush3.bf16.msra.mxu1 %v1710_v54 }
 0x1ab   :  { %621 = vrot.lane.b32.xlu1 %v2953_v52, %s2118_s26  ;;  %1731 = vmatprep.subr.bf16.mxu1 %v1714_v15 }
 0x1ad   :  { %1975 = vrot.lane.b32.xlu0 %v3308_v8, %s2115_s22  ;;  %1717 = vmatpush3.bf16.msra.mxu0 %v1714_v15 }
 0x1ae   :  { %1719 = vmatprep.subr.bf16.mxu0 %v1718_v27  ;;  %1739 = vmatpush3.bf16.msra.mxu1 %v1714_v15 }
 0x1af   :  { %1328 = vrot.lane.b32.xlu1 %v2957_v25, %s2118_s26  ;;  %1732 = vmatprep.subr.bf16.mxu1 %v1718_v27 }
 0x1b1   :  { %1341 = vrot.lane.b32.xlu0 %v2938_v6, %s2115_s22  ;;  %1721 = vmatpush3.bf16.msra.mxu0 %v1718_v27 }
 0x1b2   :  { %1723 = vmatprep.subr.bf16.mxu0 %v1722_v41  ;;  %1740 = vmatpush3.bf16.msra.mxu1 %v1718_v27 }
 0x1b3   :  { %634 = vrot.lane.b32.xlu1 %v2933_v53, %s2115_s22  ;;  %1733 = vmatprep.subr.bf16.mxu1 %v1722_v41 }
 0x1b5   :  { %638 = vrot.lane.b32.xlu0 %v2953_v52, %s2115_s22  ;;  %1725 = vmatpush3.bf16.msra.mxu0 %v1722_v41 }
 0x1b6   :  { %1741 = vmatpush3.bf16.msra.mxu1 %v1722_v41 }
 0x1b7   :  { %1980 = vrot.lane.b32.xlu1 %v3308_v8, %s2115_s22 }
 0x1b9   :  { %658 = vrot.lane.b32.xlu0 %v2933_v53, %s2119_s7 }
 0x1bb   :  { %1345 = vrot.lane.b32.xlu1 %v2957_v25, %s2115_s22 }
 0x1bd   :  { %1365 = vrot.lane.b32.xlu0 %v2938_v6, %s2119_s7 }
 0x1bf   :  { %1985 = vrot.lane.b32.xlu1 %v3308_v8, %s2119_s7 }
 0x1c1   :  { %1990 = vrot.lane.b32.xlu0 %v3308_v8, %s2119_s7 }
 0x1c3   :  { %662 = vrot.lane.b32.xlu1 %v2953_v52, %s2119_s7 }
 0x1c5   :  { %675 = vrot.lane.b32.xlu0 %v2933_v53, %s2120_s27 }
 0x1c7   :  { %1369 = vrot.lane.b32.xlu1 %v2957_v25, %s2119_s7 }
 0x1c9   :  { %1382 = vrot.lane.b32.xlu0 %v2938_v6, %s2120_s27 }
 0x1cb   :  { %1995 = vrot.lane.b32.xlu1 %v3308_v8, %s2120_s27 }
 0x1cd   :  { %2000 = vrot.lane.b32.xlu0 %v3308_v8, %s2120_s27 }
 0x1cf   :  { %679 = vrot.lane.b32.xlu1 %v2953_v52, %s2120_s27 }
 0x1d1   :  { %692 = vrot.lane.b32.xlu0 %v2933_v53, %s2122_s2 }
 0x1d3   :  { %1386 = vrot.lane.b32.xlu1 %v2957_v25, %s2120_s27 }
 0x1d5   :  { %1399 = vrot.lane.b32.xlu0 %v2938_v6, %s2122_s2 }
 0x1d7   :  { %2005 = vrot.lane.b32.xlu1 %v3308_v8, %s2122_s2 }
 0x1d9   :  { %2010 = vrot.lane.b32.xlu0 %v3308_v8, %s2122_s2 }
 0x1db   :  { %696 = vrot.lane.b32.xlu1 %v2953_v52, %s2122_s2 }
 0x1df   :  { %1403 = vrot.lane.b32.xlu1 %v2957_v25, %s2122_s2 }
 0x20d   :  { %v600_v24 = vpop.permute.xlu1 %599 }
 0x20e   :  { %v606_v54 = vsel %vm605_vm8, %v1957_v9, %v600_v24 }
 0x20f   :  { %v1308_v35 = vpop.permute.xlu0 %1307  ;;  %v610_v22 = vmul.f32 %v606_v54, %v3021_v4 }
 0x210   :  { %v1313_v20 = vsel %vm605_vm8, %v1958_v55, %v1308_v35 }
 0x211   :  { %v618_v16 = vpop.permute.xlu1 %617  ;;  %v1317_v51 = vmul.f32 %v1313_v20, %v3021_v4 }
 0x212   :  { %v623_v26 = vsel %vm124_vm4, %v1962_v13, %v618_v16 }
 0x213   :  { %v3015_v45 = vpop.permute.xlu0 %1965  ;;  %v627_v12 = vmul.f32 %v623_v26, %v3026_v39 }
 0x214   :  { %v1967_v21 = vunpack.i.l.bf16 %v3015_v45  ;;  %v1968_v41 = vunpack.i.h.bf16 %v3015_v45 }
 0x215   :  { %v1325_v23 = vpop.permute.xlu1 %1324 }
 0x216   :  { %v1330_v56 = vsel %vm124_vm4, %v1963_v7, %v1325_v23  ;;  %v649_v23 = vmul.f32 %v3041_v43, %v2933_v53 }
 0x217   :  { %v1334_v0 = vmul.f32 %v1330_v56, %v3026_v39  ;;  %v1971_v44 = vpop.permute.xlu0 %1970 }
 0x218   :  { %v1972_v49 = vunpack.i.l.bf16 %v1971_v44  ;;  %v1973_v14 = vunpack.i.h.bf16 %v1971_v44 }
 0x219   :  { %v1336_v28 = vadd.f32 %v1334_v0, %v1317_v51  ;;  %v604_v10 = vpop.permute.xlu1 %603  ;;  %v629_v0 = vadd.f32 %v627_v12, %v610_v22 }
 0x21a   :  { %v607_v27 = vsel %vm605_vm8, %v1967_v21, %v604_v10 }
 0x21b   :  { %v1312_v30 = vpop.permute.xlu0 %1311  ;;  %v611_v20 = vmul.f32 %v607_v27, %v3021_v4 }
 0x21c   :  { %v1314_v44 = vsel %vm605_vm8, %v1968_v41, %v1312_v30 }
 0x21d   :  { %v622_v37 = vpop.permute.xlu1 %621 }
 0x21e   :  { %v624_v48 = vsel %vm124_vm4, %v1972_v49, %v622_v37 }
 0x21f   :  { %v1976_v2 = vpop.permute.xlu0 %1975  ;;  %v628_v18 = vmul.f32 %v624_v48, %v3026_v39 }
 0x220   :  { %v1978_v38 = vunpack.i.h.bf16 %v1976_v2  ;;  %v1977_v59 = vunpack.i.l.bf16 %v1976_v2 }
 0x221   :  { %v1329_v32 = vpop.permute.xlu1 %1328  ;;  %v630_v37 = vadd.f32 %v628_v18, %v611_v20 }
 0x222   :  { %v1331_v35 = vsel %vm124_vm4, %v1973_v14, %v1329_v32  ;;  %v655_v32 = vld [vmem:[%s3249_s3 + $0x4] ss:$0 sm:$0xff] }
 0x223   :  { %v1342_v5 = vpop.permute.xlu0 %1341  ;;  %v1335_v2 = vmul.f32 %v1331_v35, %v3026_v39  ;;  %v650_v39 = vmul.f32 %v3041_v43, %v2953_v52 }
 0x224   :  { %v1347_v31 = vsel %vm245_vm5, %v1978_v38, %v1342_v5 }
 0x225   :  { %v1351_v11 = vmul.f32 %v1347_v31, %v3034_v33  ;;  %v635_v34 = vpop.permute.xlu1 %634 }
 0x226   :  { %v640_v63 = vsel %vm245_vm5, %v1977_v59, %v635_v34 }
 0x227   :  { %v1353_v50 = vadd.f32 %v1351_v11, %v1336_v28  ;;  %v639_v47 = vpop.permute.xlu0 %638  ;;  %v644_v16 = vmul.f32 %v3034_v33, %v640_v63 }
 0x229   :  { %v3045_v19 = vadd.f32 %v1356_v36, %v1353_v50  ;;  %v1981_v17 = vpop.permute.xlu1 %1980  ;;  %v646_v31 = vadd.f32 %v644_v16, %v629_v0  ;;  %v1318_v50 = vmul.f32 %v1314_v44, %v3021_v4  ;;  %v1357_v4 = vmul.f32 %v3041_v43, %v2957_v25  ;;  %v691_v25 = vld [vmem:[%s3249_s3 + $0x6] ss:$0 sm:$0xff] }
 0x22a   :  { %v1982_v6 = vunpack.i.l.bf16 %v1981_v17  ;;  %v1983_v56 = vunpack.i.h.bf16 %v1981_v17 }
 0x22b   :  { %v659_v61 = vpop.permute.xlu0 %658  ;;  %v1337_v49 = vadd.f32 %v1335_v2, %v1318_v50  ;;  %v651_v59 = vadd.f32 %v649_v23, %v646_v31  ;;  %v3118_v50 = vld [vmem:[%s3251_s5] ss:$0 sm:$0xff] }
 0x22c   :  { %v641_v3 = vsel %vm245_vm5, %v1982_v6, %v639_v47 }
 0x22d   :  { %v1346_v40 = vpop.permute.xlu1 %1345  ;;  %v645_v51 = vmul.f32 %v3034_v33, %v641_v3 }
 0x22e   :  { %v1348_v38 = vsel %vm245_vm5, %v1983_v56, %v1346_v40 }
 0x22f   :  { %v1366_v58 = vpop.permute.xlu0 %1365  ;;  %v647_v47 = vadd.f32 %v645_v51, %v630_v37  ;;  %v1352_v40 = vmul.f32 %v1348_v38, %v3034_v33  ;;  %v3102_v38 = vrot.slane %v3308_v8, 5 }
 0x231   :  { %v1986_v42 = vpop.permute.xlu1 %1985  ;;  %v652_v21 = vadd.f32 %v650_v39, %v647_v47  ;;  %v1354_v48 = vadd.f32 %v1352_v40, %v1337_v49  ;;  %v3123_v39 = vld [vmem:[%s3251_s5 + $0x1] ss:$0 sm:$0xff] }
 0x232   :  { %v1987_v29 = vunpack.i.l.bf16 %v1986_v42  ;;  %v1988_v55 = vunpack.i.h.bf16 %v1986_v42 }
 0x233   :  { %v3047_v46 = vpop.permute.xlu0 %1990 }
 0x234   :  { %v1992_v7 = vunpack.i.l.bf16 %v3047_v46  ;;  %v666_v53 = vsel %vm388_vm6, %v659_v61, %v1987_v29  ;;  %v1373_v34 = vsel %vm388_vm6, %v1366_v58, %v1988_v55  ;;  %v1993_v36 = vunpack.i.h.bf16 %v3047_v46  ;;  %v674_v61 = vld [vmem:[%s3249_s3 + $0x5] ss:$0 sm:$0xff] }
 0x235   :  { %v663_v60 = vpop.permute.xlu1 %662  ;;  %v670_v42 = vmul.f32 %v666_v53, %v655_v32  ;;  %v1377_v46 = vmul.f32 %v1373_v34, %v655_v32 }
 0x236   :  { %v667_v11 = vsel %vm388_vm6, %v663_v60, %v1992_v7  ;;  %v1359_v7 = vadd.f32 %v1357_v4, %v1354_v48  ;;  %v3324_v4 = vld [vmem:[#allocation13_spill] sm:$0xff] }
 0x237   :  { %v676_v1 = vpop.permute.xlu0 %675  ;;  %v671_v13 = vmul.f32 %v667_v11, %v655_v32  ;;  %v1379_v12 = vadd.f32 %v1377_v46, %v3045_v19  ;;  %v709_v19 = vld [vmem:[%s3250_s4] ss:$0 sm:$0xff]  ;;  %v3113_v11 = vrot.slane %v3308_v8, 3 }
 0x239   :  { %v1370_v57 = vpop.permute.xlu1 %1369  ;;  %v673_v43 = vadd.f32 %v671_v13, %v652_v21 }
 0x23a   :  { %v1374_v6 = vsel %vm388_vm6, %v1370_v57, %v1993_v36 }
 0x23b   :  { %v1383_v62 = vpop.permute.xlu0 %1382  ;;  %v1378_v22 = vmul.f32 %v1374_v6, %v655_v32  ;;  %v3107_v32 = vld [vmem:[%s3251_s5 + $0x3] ss:$0 sm:$0xff] }
 0x23d   :  { %v1996_v15 = vpop.permute.xlu1 %1995 }
 0x23e   :  { %v1998_v28 = vunpack.i.h.bf16 %v1996_v15  ;;  %v1997_v10 = vunpack.i.l.bf16 %v1996_v15 }
 0x23f   :  { %v2001_v24 = vpop.permute.xlu0 %2000 }
 0x240   :  { %v2002_v30 = vunpack.i.l.bf16 %v2001_v24  ;;  %v683_v60 = vsel %vm506_vm7, %v676_v1, %v1997_v10  ;;  %v1390_v58 = vsel %vm506_vm7, %v1383_v62, %v1998_v28  ;;  %v2003_v9 = vunpack.i.h.bf16 %v2001_v24 }
 0x241   :  { %v680_v45 = vpop.permute.xlu1 %679  ;;  %v687_v26 = vmul.f32 %v683_v60, %v674_v61  ;;  %v1394_v54 = vmul.f32 %v1390_v58, %v674_v61  ;;  %v672_v62 = vadd.f32 %v670_v42, %v651_v59  ;;  %v1380_v28 = vadd.f32 %v1378_v22, %v1359_v7  ;;  %v3325_v59 = vld [vmem:[#allocation14_spill] sm:$0xff]  ;;  %v3157_v22 = vld [vmem:[%s3251_s5 + $0x5] ss:$0 sm:$0xff] }
 0x242   :  { %v684_v33 = vsel %vm506_vm7, %v680_v45, %v2002_v30 }
 0x243   :  { %v693_v5 = vpop.permute.xlu0 %692  ;;  %v688_v14 = vmul.f32 %v684_v33, %v674_v61  ;;  %v689_v29 = vadd.f32 %v687_v26, %v672_v62  ;;  %v1396_v24 = vadd.f32 %v1394_v54, %v1379_v12 }
 0x245   :  { %v1387_v17 = vpop.permute.xlu1 %1386  ;;  %v690_v51 = vadd.f32 %v688_v14, %v673_v43  ;;  %v3151_v43 = vld [vmem:[%s3251_s5 + $0x4] ss:$0 sm:$0xff] }
 0x246   :  { %v1391_v27 = vsel %vm506_vm7, %v1387_v17, %v2003_v9  ;;  %v3128_v17 = vld [vmem:[%s3251_s5 + $0x2] ss:$0 sm:$0xff] }
 0x247   :  { %v1400_v52 = vpop.permute.xlu0 %1399  ;;  %v1395_v20 = vmul.f32 %v1391_v27, %v674_v61 }
 0x249   :  { %v2006_v1 = vpop.permute.xlu1 %2005  ;;  %v1397_v53 = vadd.f32 %v1395_v20, %v1380_v28 }
 0x24a   :  { %v2008_v63 = vunpack.i.h.bf16 %v2006_v1  ;;  %v2007_v15 = vunpack.i.l.bf16 %v2006_v1 }
 0x24b   :  { %v2011_v3 = vpop.permute.xlu0 %2010 }
 0x24c   :  { %v2012_v57 = vunpack.i.l.bf16 %v2011_v3  ;;  %v701_v41 = vsel %vm700_vm9, %v693_v5, %v2007_v15  ;;  %v1407_v18 = vsel %vm700_vm9, %v1400_v52, %v2008_v63  ;;  %v2013_v23 = vunpack.i.h.bf16 %v2011_v3 }
 0x24d   :  { %v697_v35 = vpop.permute.xlu1 %696  ;;  %v705_v16 = vmul.f32 %v701_v41, %v691_v25  ;;  %v1411_v55 = vmul.f32 %v1407_v18, %v691_v25 }
 0x24e   :  { %v702_v56 = vsel %vm700_vm9, %v697_v35, %v2012_v57 }
 0x24f   :  { %v706_v45 = vmul.f32 %v702_v56, %v691_v25  ;;  %v707_v0 = vadd.f32 %v705_v16, %v689_v29  ;;  %v1413_v44 = vadd.f32 %v1411_v55, %v1396_v24  ;;  %v3326_v24 = vld [vmem:[#allocation17_spill] sm:$0xff] }
 0x250   :  { %v3166_v55 = vld [vmem:[%s3251_s5 + $0x6] ss:$0 sm:$0xff] }
 0x251   :  { %v708_v10 = vadd.f32 %v706_v45, %v690_v51  ;;  %v710_v37 = vadd.f32 %v709_v19, %v707_v0  ;;  %v1404_v2 = vpop.permute.xlu1 %1403  ;;  %v3110_v31 = vadd.f32 %v1413_v44, %v709_v19 }
 0x252   :  { %v1408_v5 = vsel %vm700_vm9, %v1404_v2, %v2013_v23 }
 0x253   :  { %v711_v34 = vadd.f32 %v709_v19, %v708_v10  ;;  %v1412_v30 = vmul.f32 %v1408_v5, %v691_v25  ;;  %v724_v36 = vrot.slane %v710_v37, 5  ;;  %v736_v47 = vrot.slane %v710_v37, 6 }
 0x254   :  { %v748_v8 = vrot.slane %v710_v37, 7  ;;  %v759_v40 = vmul.f32 %v3107_v32, %v710_v37  ;;  %v765_v42 = vrot.slane %v710_v37, 1  ;;  %v777_v61 = vrot.slane %v710_v37, 2 }
 0x255   :  { %v1414_v60 = vadd.f32 %v1412_v30, %v1397_v53  ;;  %v725_v58 = vsel %vm722_vm10, %v3102_v38, %v724_v36  ;;  %v726_v13 = vrot.slane %v711_v34, 5  ;;  %v737_v46 = vsel %vm105_vm1, %v3324_v4, %v736_v47 }
 0x256   :  { %v730_v9 = vmul.f32 %v725_v58, %v3118_v50  ;;  %v738_v52 = vrot.slane %v711_v34, 6  ;;  %v742_v49 = vmul.f32 %v737_v46, %v3123_v39  ;;  %v749_v33 = vsel %vm134_vm0, %v3325_v59, %v748_v8 }
 0x257   :  { %v3139_v21 = vadd.f32 %v1414_v60, %v709_v19  ;;  %v727_v6 = vsel %vm722_vm10, %v724_v36, %v726_v13  ;;  %v750_v26 = vrot.slane %v711_v34, 7  ;;  %v754_v54 = vmul.f32 %v749_v33, %v3128_v17  ;;  %v3327_v19 = vld [vmem:[#allocation21_spill] sm:$0xff] }
 0x258   :  { %v731_v1 = vmul.f32 %v727_v6, %v3118_v50  ;;  %v739_v48 = vsel %vm105_vm1, %v736_v47, %v738_v52  ;;  %v744_v62 = vadd.f32 %v742_v49, %v730_v9  ;;  %v760_v63 = vmul.f32 %v3107_v32, %v711_v34 }
 0x259   :  { %v743_v15 = vmul.f32 %v739_v48, %v3123_v39  ;;  %v751_v25 = vsel %vm134_vm0, %v748_v8, %v750_v26  ;;  %v766_v12 = vrot.slane %v711_v34, 1  ;;  %v778_v14 = vrot.slane %v711_v34, 2 }
 0x25a   :  { %v755_v27 = vmul.f32 %v751_v25, %v3128_v17  ;;  %v756_v3 = vadd.f32 %v754_v54, %v744_v62  ;;  %v790_v57 = vrot.slane %v710_v37, 3  ;;  %v791_v41 = vrot.slane %v711_v34, 3 }
 0x25b   :  { %v745_v18 = vadd.f32 %v743_v15, %v731_v1  ;;  %v767_v29 = vsel %vm181_vm2, %v765_v42, %v766_v12  ;;  %v769_v35 = vsel %vm181_vm2, %v766_v12, %v3326_v24  ;;  %v779_v16 = vsel %vm209_vm3, %v777_v61, %v778_v14  ;;  %v801_v61 = vld [vmem:[%s3252_s6] ss:$0 sm:$0xff] }
 0x25c   :  { %v761_v7 = vadd.f32 %v759_v40, %v756_v3  ;;  %v772_v20 = vmul.f32 %v767_v29, %v3151_v43  ;;  %v773_v23 = vmul.f32 %v769_v35, %v3151_v43  ;;  %v781_v56 = vsel %vm209_vm3, %v778_v14, %v3327_v19 }
 0x25d   :  { %v757_v51 = vadd.f32 %v755_v27, %v745_v18  ;;  %v784_v45 = vmul.f32 %v779_v16, %v3157_v22  ;;  %v785_v0 = vmul.f32 %v781_v56, %v3157_v22  ;;  %v792_v44 = vsel %vm789_vm11, %v790_v57, %v791_v41 }
 0x25e   :  { %v774_v28 = vadd.f32 %v772_v20, %v761_v7  ;;  %v794_v10 = vsel %vm789_vm11, %v791_v41, %v3113_v11  ;;  %v797_v37 = vmul.f32 %v792_v44, %v3166_v55  ;;  %v1429_v2 = vrot.slane %v3110_v31, 5 }
 0x25f   :  { %v762_v53 = vadd.f32 %v760_v63, %v757_v51  ;;  %v798_v5 = vmul.f32 %v794_v10, %v3166_v55  ;;  %v1431_v34 = vrot.slane %v3139_v21, 5  ;;  %v1441_v30 = vrot.slane %v3110_v31, 6 }
 0x260   :  { %v786_v36 = vadd.f32 %v784_v45, %v774_v28  ;;  %v1430_v47 = vsel %vm722_vm10, %v3102_v38, %v1429_v2  ;;  %v1443_v8 = vrot.slane %v3139_v21, 6  ;;  %v1453_v40 = vrot.slane %v3110_v31, 7 }
 0x261   :  { %v775_v42 = vadd.f32 %v773_v23, %v762_v53  ;;  %v1432_v60 = vsel %vm722_vm10, %v1429_v2, %v1431_v34  ;;  %v1435_v58 = vmul.f32 %v1430_v47, %v3118_v50  ;;  %v1442_v13 = vsel %vm105_vm1, %v3324_v4, %v1441_v30  ;;  %v2015_v47 = vld [vmem:[#allocation3] sm:$0xff] }
 0x262   :  { %v799_v46 = vadd.f32 %v797_v37, %v786_v36  ;;  %v1436_v9 = vmul.f32 %v1432_v60, %v3118_v50  ;;  %v1444_v38 = vsel %vm105_vm1, %v1441_v30, %v1443_v8  ;;  %v1447_v52 = vmul.f32 %v1442_v13, %v3123_v39  ;;  %v2014_v30 = vld [vmem:[#allocation3 + $0x8] sm:$0xff]  ;;  %v2016_v60 = vld [vmem:[#allocation3 + $0x18] sm:$0xff]  ;;  %v2017_v13 = vld [vmem:[#allocation3 + $0x10] sm:$0xff] }
 0x263   :  { %v787_v49 = vadd.f32 %v785_v0, %v775_v42  ;;  %v1448_v33 = vmul.f32 %v1444_v38, %v3123_v39  ;;  %v1454_v6 = vsel %vm134_vm0, %v3325_v59, %v1453_v40  ;;  %v1455_v26 = vrot.slane %v3139_v21, 7 }
 0x264   :  { %v802_v54 = vadd.f32 %v801_v61, %v799_v46  ;;  %v1449_v1 = vadd.f32 %v1447_v52, %v1435_v58  ;;  %v1459_v48 = vmul.f32 %v1454_v6, %v3128_v17  ;;  %v1464_v63 = vmul.f32 %v3110_v31, %v3107_v32 }
 0x265   :  { %v800_v4 = vadd.f32 %v798_v5, %v787_v49  ;;  %v1450_v62 = vadd.f32 %v1448_v33, %v1436_v9  ;;  %v1456_v50 = vsel %vm134_vm0, %v1453_v40, %v1455_v26  ;;  %v1470_v25 = vrot.slane %v3110_v31, 1 }
 0x266   :  { %1688 = vmatprep.mubr.f32.mxu0 %v802_v54  ;;  %v1460_v15 = vmul.f32 %v1456_v50, %v3128_v17  ;;  %v1461_v39 = vadd.f32 %v1459_v48, %v1449_v1  ;;  %v1471_v59 = vrot.slane %v3139_v21, 1  ;;  %v1465_v14 = vmul.f32 %v3139_v21, %v3107_v32 }
 0x267   :  { %v803_v12 = vadd.f32 %v801_v61, %v800_v4  ;;  %v1482_v27 = vrot.slane %v3110_v31, 2  ;;  %v1483_v3 = vrot.slane %v3139_v21, 2  ;;  %v1494_v20 = vrot.slane %v3110_v31, 3 }
 0x268   :  { %v1462_v57 = vadd.f32 %v1460_v15, %v1450_v62  ;;  %v1466_v41 = vadd.f32 %v1464_v63, %v1461_v39  ;;  %v1472_v18 = vsel %vm181_vm2, %v1470_v25, %v1471_v59  ;;  %v1474_v17 = vsel %vm181_vm2, %v1471_v59, %v3326_v24 }
 0x269   :  { %v1477_v29 = vmul.f32 %v1472_v18, %v3151_v43  ;;  %v1484_v35 = vsel %vm209_vm3, %v1482_v27, %v1483_v3  ;;  %v1486_v16 = vsel %vm209_vm3, %v1483_v3, %v3327_v19  ;;  %1689 = vmatmul.mubr.f32.vlgmr.msra.gmra.mrb[0].mxu0 %v803_v12  ;;  %v1478_v7 = vmul.f32 %v1474_v17, %v3151_v43 }
 0x26a   :  { %v1467_v32 = vadd.f32 %v1465_v14, %v1462_v57  ;;  %v1495_v23 = vrot.slane %v3139_v21, 3  ;;  %v1489_v51 = vmul.f32 %v1484_v35, %v3157_v22  ;;  %v1490_v24 = vmul.f32 %v1486_v16, %v3157_v22  ;;  %v1524_v22 = vld [vmem:[%s3254_s8] ss:$0 sm:$0xff]  ;;  %s2084_s8 = scalar_lea.vmem %s1624_s18, 512 }
 0x26b   :  { %v1479_v56 = vadd.f32 %v1477_v29, %v1466_v41  ;;  %p2085_p10 = scmp.ne.s32.totalorder %s1624_s18, %s2084_s8  ;;  %p2090_p12 = scmp.lt.s32.totalorder %s2084_s8, %s2084_s8 }
 0x26c   :  { %v1480_v45 = vadd.f32 %v1478_v7, %v1467_v32  ;;  %v1496_v0 = vsel %vm789_vm11, %v1494_v20, %v1495_v23  ;;  %v1498_v44 = vsel %vm789_vm11, %v1495_v23, %v3113_v11 }
 0x26d   :  { %v1491_v19 = vadd.f32 %v1489_v51, %v1479_v56  ;;  %v1501_v28 = vmul.f32 %v1496_v0, %v3166_v55  ;;  %v1502_v43 = vmul.f32 %v1498_v44, %v3166_v55  ;;  %p2091_p13 = por %p2090_p12, %p2089_p11 }
 0x26e   :  { %v1492_v10 = vadd.f32 %v1490_v24, %v1480_v45 }
 0x26f   :  { %v1503_v31 = vadd.f32 %v1501_v28, %v1491_v19  ;;  %p2092_p0 = pnand %p2091_p13, %p2085_p10 }
 0x270   :  { %v1504_v37 = vadd.f32 %v1502_v43, %v1492_v10 }
 0x271   :  { %v1506_v21 = vadd.f32 %v1503_v31, %v801_v61 }
 0x272   :  { %v1507_v2 = vadd.f32 %v1504_v37, %v801_v61 }
 0x273   :  { %1691 = vmatprep.mubr.f32.mxu1 %v1506_v21 }
 0x274   :  { %1692 = vmatmul.mubr.f32.vlgmr.msra.gmra.mrb[0].mxu1 %v1507_v2 }
 0x33c   :  { %v1690_v53 = vpop.f32.mrb[0].mxu0 }
 0x33d   :  { %v1597_v5 = vadd.f32 %v1690_v53, %v1524_v22  ;;  %v1591_v34 = vpop.f32.mrb[1].mxu0 }
 0x33e   :  { %v1592_v11 = vadd.f32 %v1591_v34, %v1524_v22 }
 0x33f   :  { %v1611_v36 = vmul.f32 %v2014_v30, %v1597_v5 }
 0x340   :  { %v1610_v8 = vmul.f32 %v2015_v47, %v1592_v11 }
 0x341   :  { %1615 = vst [vmem:[#allocation9 + $0x8] sm:$0xff] %v1611_v36 }
 0x342   :  { %1614 = vst [vmem:[#allocation9] sm:$0xff] %v1610_v8 }
 0x347   :  { %v1693_v55 = vpop.f32.mrb[0].mxu1 }
 0x348   :  { %v1607_v40 = vadd.f32 %v1693_v55, %v1524_v22  ;;  %v1601_v42 = vpop.f32.mrb[1].mxu1 }
 0x349   :  { %v1602_v61 = vadd.f32 %v1601_v42, %v1524_v22 }
 0x34a   :  { %v1613_v58 = vmul.f32 %v2016_v60, %v1607_v40 }
 0x34b   :  { %v1612_v46 = vmul.f32 %v2017_v13, %v1602_v61 }
 0x34c   :  { %1617 = vst [vmem:[#allocation9 + $0x18] sm:$0xff] %v1613_v58 }
 0x34d   :  { %1616 = vst [vmem:[#allocation9 + $0x10] sm:$0xff] %v1612_v46 }
 0x34e   :  { %2095 = shalt.err (!%p2092_p0)
}
 0x34f   :  { %s2096_s23 = scalar_lea.hbm %s3255_s9, 512 }
 0x350   :  { %p2097_p1 = scmp.ne.s32.totalorder %s3255_s9, %s2096_s23  ;;  %p2100_p2 = scmp.lt.u32.totalorder %s2096_s23, %s3255_s9 }
 0x352   :  { %p2102_p3 = pnand %p2100_p2, %p2097_p1 }
 0x354   :  { %2105 = shalt.err (!%p2102_p3)
}
 0x355   :  { %1629 = dma.vmem_to_hbm [thread:$0]  %s1624_s18, 512, %s3255_s9, [#allocation5], %s2114_s21, %s2114_s21, %s2115_s22  }
 0x356   :  { %2110 = dma.done.wait [#allocation5], 512  }
 0x357   :  { %2111 = vsyncadd [#allocation5], 4294966784 }
 0x358   :  { %1633 = vsyncpa [#allocation4], 1 }
 0x359   :  { %1634 = vsyncpa [#allocation7], 1 }
 0x35a   :  { %1635 = vsyncpa [#allocation5], 1 }

// kernel: tpu_custom_call.1
= control target key start
LH: loop header
LB: loop body
LE: loop exit
PB: predicated region body
PF: predicated region fallthrough
CT: control target
= control target key end

     0   :  { %14 = vsyncpa [#allocation4], 0  ;;  %s3924_s0 = inlined_call_operand.hbm [shape: f32[2,16,128], index: 0, kind: input, shape index: {}]   ;;  %s3925_s1 = inlined_call_operand.hbm [shape: f32[25,128], index: 1, kind: input, shape index: {}]   ;;  %s3926_s2 = inlined_call_operand.vmem [shape: f32[1,128], index: 2, kind: input, shape index: {}]   ;;  %s3927_s3 = inlined_call_operand.vmem [shape: f32[7,128], index: 3, kind: input, shape index: {}]   ;;  %s3928_s4 = inlined_call_operand.vmem [shape: f32[1,128], index: 4, kind: input, shape index: {}]   ;;  %s3929_s5 = inlined_call_operand.vmem [shape: f32[7,128], index: 5, kind: input, shape index: {}]   ;;  %s3930_s6 = inlined_call_operand.vmem [shape: f32[1,128], index: 6, kind: input, shape index: {}]   ;;  %s3931_s7 = inlined_call_operand.hbm [shape: f32[128,128], index: 7, kind: input, shape index: {}]   ;;  %s3932_s8 = inlined_call_operand.vmem [shape: f32[1,128], index: 8, kind: input, shape index: {}]   ;;  %s3933_s9 = inlined_call_operand.hbm [shape: f32[2,16,128], index: 9, kind: output, shape index: {}]  }
   0x1   :  { %15 = vsyncpa [#allocation7], 0 }
   0x2   :  { %16 = vsyncpa [#allocation5], 0  ;;  %s2706_s30 = smov [#allocation6]   ;;  %s2707_s11 = smov [#allocation3]  }
   0x3   :  { %s34_s10 = sshll.u32 %s2706_s30, 4  ;;  %s22_s12 = sshll.u32 %s2707_s11, 4  ;;  %s35_s10 = int_to_ptr.vmem [resolvable:$true] %s34_s10  ;;  %s2768_s12 = int_to_ptr.vmem [resolvable:$true] %s22_s12 }
   0x4   :  { %s2612_s15 = scalar_lea.hbm %s3925_s1, 512 }
   0x5   :  { %p2613_p0 = scmp.ne.s32.totalorder %s3925_s1, %s2612_s15  ;;  %p2616_p1 = scmp.lt.u32.totalorder %s2612_s15, %s3925_s1 }
   0x7   :  { %p2618_p2 = pnand %p2616_p1, %p2613_p0 }
   0x9   :  { %2621 = shalt.err (!%p2618_p2)
}
   0xa   :  { %s2622_s20 = scalar_lea.vmem %s35_s10, 512  ;;  %p2627_p4 = scmp.lt.s32.totalorder %s35_s10, %s35_s10 }
   0xb   :  { %p2623_p3 = scmp.ne.s32.totalorder %s35_s10, %s2622_s20  ;;  %p2628_p5 = scmp.lt.s32.totalorder %s2622_s20, %s2622_s20 }
   0xd   :  { %p2629_p6 = por %p2628_p5, %p2627_p4 }
   0xf   :  { %p2630_p7 = pnand %p2629_p6, %p2623_p3 }
  0x11   :  { %2633 = shalt.err (!%p2630_p7)
}
  0x12   :  { %s2708_s21 = smov 128   ;;  %s2709_s22 = smov 8  }
  0x13   :  { %40 = dma.hbm_to_vmem [thread:$0]  %s3925_s1, 512, %s35_s10, [#allocation7], %s2708_s21, %s2708_s21, %s2709_s22  }
  0x14   :  { %s2634_s27 = scalar_lea.hbm %s3924_s0, 512 }
  0x15   :  { %p2635_p8 = scmp.ne.s32.totalorder %s3924_s0, %s2634_s27  ;;  %p2638_p9 = scmp.lt.u32.totalorder %s2634_s27, %s3924_s0 }
  0x17   :  { %p2640_p10 = pnand %p2638_p9, %p2635_p8 }
  0x19   :  { %2643 = shalt.err (!%p2640_p10)
}
  0x1a   :  { %s2644_s13 = scalar_lea.vmem %s2768_s12, 512  ;;  %p2649_p12 = scmp.lt.s32.totalorder %s2768_s12, %s2768_s12 }
  0x1b   :  { %p2645_p11 = scmp.ne.s32.totalorder %s2768_s12, %s2644_s13  ;;  %p2650_p13 = scmp.lt.s32.totalorder %s2644_s13, %s2644_s13 }
  0x1d   :  { %p2651_p0 = por %p2650_p13, %p2649_p12 }
  0x1f   :  { %p2652_p1 = pnand %p2651_p0, %p2645_p11 }
  0x21   :  { %2655 = shalt.err (!%p2652_p1)
}
  0x22   :  { %28 = dma.hbm_to_vmem [thread:$0]  %s3924_s0, 512, %s2768_s12, [#allocation4], %s2708_s21, %s2708_s21, %s2709_s22  }
  0x23   :  { %s2710_s14 = smov [#allocation8]   ;;  %s2656_s18 = scalar_lea.hbm %s3931_s7, 2048 }
  0x24   :  { %s56_s15 = sshll.u32 %s2710_s14, 4  ;;  %p2657_p2 = scmp.ne.s32.totalorder %s3931_s7, %s2656_s18  ;;  %s57_s15 = int_to_ptr.vmem [resolvable:$true] %s56_s15 }
  0x25   :  { %p2660_p3 = scmp.lt.u32.totalorder %s2656_s18, %s3931_s7 }
  0x27   :  { %p2662_p4 = pnand %p2660_p3, %p2657_p2 }
  0x29   :  { %2665 = shalt.err (!%p2662_p4)
}
  0x2a   :  { %s2666_s25 = scalar_lea.vmem %s57_s15, 2048  ;;  %p2671_p6 = scmp.lt.s32.totalorder %s57_s15, %s57_s15 }
  0x2b   :  { %p2667_p5 = scmp.ne.s32.totalorder %s57_s15, %s2666_s25  ;;  %p2672_p7 = scmp.lt.s32.totalorder %s2666_s25, %s2666_s25 }
  0x2d   :  { %p2673_p8 = por %p2672_p7, %p2671_p6 }
  0x2f   :  { %p2674_p9 = pnand %p2673_p8, %p2667_p5 }
  0x31   :  { %2677 = shalt.err (!%p2674_p9)
}
  0x32   :  { %62 = dma.hbm_to_vmem [thread:$0]  %s3931_s7, 2048, %s57_s15, [#allocation7], %s2708_s21, %s2708_s21, %s2709_s22  }
  0x33   :  { %2700 = dma.done.wait [#allocation4], 512  }
  0x34   :  { %2701 = vsyncadd [#allocation4], 4294966784 }
  0x35   :  { %2702 = dma.done.wait [#allocation7], 2560  }
  0x36   :  { %2703 = vsyncadd [#allocation7], 4294964736  ;;  %v3934_v0 = vmov 0.0   ;;  %s2712_s26 = smov 16   ;;  %v2830_v5 = vld [vmem:[#allocation3] sm:$0xff]  ;;  %v2832_v6 = vld [vmem:[#allocation3 + $0x8] sm:$0xff] }
  0x37   :  { %v143_v1 = vrot.slane %v3934_v0, 7  ;;  %v110_v2 = vrot.slane %v3934_v0, 6  ;;  %vm109_vm0 = vcmask 1041408   ;;  %v114_v7 = vrot.slane %v2830_v5, 6  ;;  %v2838_v11 = vld [vmem:[#allocation3 + $0x10] sm:$0xff]  ;;  %v2857_v17 = vld [vmem:[#allocation3 + $0x18] sm:$0xff] }
  0x38   :  { %v118_v8 = vrot.slane %v2832_v6, 6  ;;  %v147_v9 = vrot.slane %v2830_v5, 7  ;;  %v151_v10 = vrot.slane %v2832_v6, 7  ;;  %vm142_vm1 = vcmask 1040384   ;;  %s2713_s7 = smov 120   ;;  %s2714_s27 = smov 112  }
  0x39   :  { %v2822_v3 = vpack.i.bf16 %v143_v1, %v143_v1  ;;  %v2824_v4 = vpack.i.bf16 %v110_v2, %v110_v2  ;;  %v2844_v13 = vsel %vm109_vm0, %v110_v2, %v114_v7  ;;  %v1071_v16 = vrot.slane %v2838_v11, 6  ;;  %s2715_s28 = smov 24   ;;  %s2717_s17 = smov [#allocation9]  }
  0x3a   :  { %v2841_v12 = vsel %vm109_vm0, %v114_v7, %v118_v8  ;;  %v2851_v14 = vsel %vm142_vm1, %v147_v9, %v151_v10  ;;  %v2854_v15 = vsel %vm142_vm1, %v143_v1, %v147_v9  ;;  %v1075_v19 = vrot.slane %v2857_v17, 6  ;;  %s2132_s18 = sshll.u32 %s2717_s17, 4  ;;  %s2133_s18 = int_to_ptr.vmem [resolvable:$true] %s2132_s18 }
  0x3b   :  { %2354 = vrot.lane.b32.xlu1 %v2822_v3, %s2712_s26  ;;  %2349 = vrot.lane.b32.xlu0 %v2824_v4, %s2712_s26  ;;  %v2864_v18 = vsel %vm109_vm0, %v110_v2, %v1071_v16  ;;  %v1102_v21 = vrot.slane %v2838_v11, 7  ;;  %v1106_v22 = vrot.slane %v2857_v17, 7  ;;  %v198_v25 = vrot.slane %v3934_v0, 1  ;;  %p2683_p11 = scmp.lt.s32.totalorder %s2133_s18, %s2133_s18 }
  0x3c   :  { %v2872_v20 = vsel %vm109_vm0, %v1071_v16, %v1075_v19  ;;  %v201_v26 = vrot.slane %v2830_v5, 1  ;;  %v202_v27 = vrot.slane %v2832_v6, 1  ;;  %vm197_vm2 = vcmask 1046528  }
  0x3d   :  { %v2881_v23 = vsel %vm142_vm1, %v1102_v21, %v1106_v22  ;;  %v2884_v24 = vsel %vm142_vm1, %v143_v1, %v1102_v21  ;;  %v2905_v28 = vpack.i.bf16 %v198_v25, %v198_v25  ;;  %v1156_v31 = vrot.slane %v2857_v17, 1 }
  0x3e   :  { %v2908_v29 = vsel %vm197_vm2, %v201_v26, %v202_v27  ;;  %v2915_v30 = vsel %vm197_vm2, %v202_v27, %v198_v25  ;;  %v1155_v32 = vrot.slane %v2838_v11, 1  ;;  %v230_v33 = vrot.slane %v3934_v0, 2 }
  0x3f   :  { %126 = vrot.lane.b32.xlu1 %v2841_v12, %s2712_s26  ;;  %122 = vrot.lane.b32.xlu0 %v2844_v13, %s2712_s26  ;;  %3951 = vst [vmem:[#allocation13_spill] sm:$0xff] %v2905_v28  ;;  %3952 = vst [vmem:[#allocation14_spill] sm:$0xff] %v2908_v29  ;;  %v2925_v34 = vsel %vm197_vm2, %v1156_v31, %v198_v25  ;;  %v233_v36 = vrot.slane %v2830_v5, 2  ;;  %v234_v37 = vrot.slane %v2832_v6, 2  ;;  %vm229_vm3 = vcmask 1045504  }
  0x40   :  { %3953 = vst [vmem:[#allocation15_spill] sm:$0xff] %v2915_v30  ;;  %3954 = vst [vmem:[#allocation16_spill] sm:$0xff] %v2925_v34  ;;  %v2928_v35 = vsel %vm197_vm2, %v1155_v32, %v1156_v31  ;;  %v2936_v38 = vpack.i.bf16 %v230_v33, %v230_v33  ;;  %v1187_v41 = vrot.slane %v2857_v17, 2  ;;  %v1186_v42 = vrot.slane %v2838_v11, 2  ;;  %v2155_v31 = vld [vmem:[#allocation6 + $0x2] ss:$0 sm:$0xff] }
  0x41   :  { %3955 = vst [vmem:[#allocation17_spill] sm:$0xff] %v2928_v35  ;;  %v2939_v39 = vsel %vm229_vm3, %v233_v36, %v234_v37  ;;  %v2946_v40 = vsel %vm229_vm3, %v234_v37, %v230_v33  ;;  %v2156_v36 = vld [vmem:[#allocation6 + $0x7] ss:$0 sm:$0xff]  ;;  %v367_v37 = vmul.f32 0.0, %v2155_v31  ;;  %vm128_vm4 = vcmask 130048  }
  0x42   :  { %3956 = vst [vmem:[#allocation18_spill] sm:$0xff] %v2936_v38  ;;  %3957 = vst [vmem:[#allocation19_spill] sm:$0xff] %v2939_v39  ;;  %v2955_v43 = vsel %vm229_vm3, %v1187_v41, %v230_v33  ;;  %v2958_v44 = vsel %vm229_vm3, %v1186_v42, %v1187_v41  ;;  %v368_v41 = vmul.f32 %v2155_v31, %v2830_v5  ;;  %vm269_vm5 = vcmask 64512  }
  0x43   :  { %159 = vrot.lane.b32.xlu1 %v2851_v14, %s2712_s26  ;;  %155 = vrot.lane.b32.xlu0 %v2854_v15, %s2712_s26  ;;  %3958 = vst [vmem:[#allocation20_spill] sm:$0xff] %v2946_v40  ;;  %3959 = vst [vmem:[#allocation21_spill] sm:$0xff] %v2955_v43  ;;  %v369_v42 = vmul.f32 %v2155_v31, %v2832_v6  ;;  %vm488_vm6 = vcmask 982016   ;;  %vm626_vm7 = vcmask 916480   ;;  %vm751_vm8 = vcmask 195584  }
  0x44   :  { %3960 = vst [vmem:[#allocation22_spill] sm:$0xff] %v2958_v44  ;;  %vm870_vm9 = vcmask 850944   ;;  %vm958_vm10 = vcmask 1044480   ;;  %vm979_vm11 = vcmask 1043456   ;;  %vm1002_vm12 = vcmask 1042432  }
  0x47   :  { %1079 = vrot.lane.b32.xlu1 %v2864_v18, %s2712_s26  ;;  %2359 = vrot.lane.b32.xlu0 %v2824_v4, %s2712_s26 }
  0x4b   :  { %2364 = vrot.lane.b32.xlu1 %v2822_v3, %s2712_s26  ;;  %1083 = vrot.lane.b32.xlu0 %v2872_v20, %s2712_s26 }
  0x4f   :  { %1114 = vrot.lane.b32.xlu1 %v2881_v23, %s2712_s26  ;;  %1110 = vrot.lane.b32.xlu0 %v2884_v24, %s2712_s26 }
  0x53   :  { %176 = vrot.lane.b32.xlu1 %v2830_v5, %s2712_s26  ;;  %2369 = vrot.lane.b32.xlu0 %v3934_v0, %s2712_s26 }
  0x57   :  { %2374 = vrot.lane.b32.xlu1 %v3934_v0, %s2712_s26  ;;  %180 = vrot.lane.b32.xlu0 %v2832_v6, %s2712_s26 }
  0x5b   :  { %1135 = vrot.lane.b32.xlu1 %v2857_v17, %s2712_s26  ;;  %1131 = vrot.lane.b32.xlu0 %v2838_v11, %s2712_s26 }
  0x5f   :  { %210 = vrot.lane.b32.xlu1 %v2908_v29, %s2712_s26  ;;  %2379 = vrot.lane.b32.xlu0 %v2905_v28, %s2712_s26 }
  0x63   :  { %2384 = vrot.lane.b32.xlu1 %v2905_v28, %s2712_s26  ;;  %214 = vrot.lane.b32.xlu0 %v2915_v30, %s2712_s26 }
  0x67   :  { %1168 = vrot.lane.b32.xlu1 %v2925_v34, %s2712_s26  ;;  %1164 = vrot.lane.b32.xlu0 %v2928_v35, %s2712_s26 }
  0x6b   :  { %242 = vrot.lane.b32.xlu1 %v2939_v39, %s2712_s26  ;;  %2389 = vrot.lane.b32.xlu0 %v2936_v38, %s2712_s26 }
  0x6f   :  { %2394 = vrot.lane.b32.xlu1 %v2936_v38, %s2712_s26  ;;  %246 = vrot.lane.b32.xlu0 %v2946_v40, %s2712_s26 }
  0x73   :  { %1199 = vrot.lane.b32.xlu1 %v2955_v43, %s2712_s26  ;;  %1195 = vrot.lane.b32.xlu0 %v2958_v44, %s2712_s26 }
  0x77   :  { %263 = vrot.lane.b32.xlu1 %v2844_v13, %s2709_s22  ;;  %2399 = vrot.lane.b32.xlu0 %v2824_v4, %s2709_s22 }
  0x7b   :  { %2404 = vrot.lane.b32.xlu1 %v2824_v4, %s2709_s22  ;;  %267 = vrot.lane.b32.xlu0 %v2841_v12, %s2709_s22 }
  0x7f   :  { %1220 = vrot.lane.b32.xlu1 %v2872_v20, %s2709_s22  ;;  %1216 = vrot.lane.b32.xlu0 %v2864_v18, %s2709_s22 }
  0x83   :  { %285 = vrot.lane.b32.xlu1 %v2854_v15, %s2709_s22  ;;  %2409 = vrot.lane.b32.xlu0 %v2822_v3, %s2709_s22 }
  0x87   :  { %2414 = vrot.lane.b32.xlu1 %v2822_v3, %s2709_s22  ;;  %289 = vrot.lane.b32.xlu0 %v2851_v14, %s2709_s22 }
  0x8b   :  { %1241 = vrot.lane.b32.xlu1 %v2881_v23, %s2709_s22  ;;  %1237 = vrot.lane.b32.xlu0 %v2884_v24, %s2709_s22 }
  0x8f   :  { %306 = vrot.lane.b32.xlu1 %v2830_v5, %s2709_s22  ;;  %2419 = vrot.lane.b32.xlu0 %v3934_v0, %s2709_s22 }
  0x93   :  { %2424 = vrot.lane.b32.xlu1 %v3934_v0, %s2709_s22  ;;  %310 = vrot.lane.b32.xlu0 %v2832_v6, %s2709_s22 }
  0x97   :  { %1262 = vrot.lane.b32.xlu1 %v2857_v17, %s2709_s22  ;;  %1258 = vrot.lane.b32.xlu0 %v2838_v11, %s2709_s22 }
  0x9b   :  { %327 = vrot.lane.b32.xlu1 %v2908_v29, %s2709_s22  ;;  %2429 = vrot.lane.b32.xlu0 %v2905_v28, %s2709_s22 }
  0x9f   :  { %2434 = vrot.lane.b32.xlu1 %v2905_v28, %s2709_s22  ;;  %331 = vrot.lane.b32.xlu0 %v2915_v30, %s2709_s22 }
  0xa3   :  { %1283 = vrot.lane.b32.xlu1 %v2925_v34, %s2709_s22  ;;  %1279 = vrot.lane.b32.xlu0 %v2928_v35, %s2709_s22 }
  0xa7   :  { %348 = vrot.lane.b32.xlu1 %v2939_v39, %s2709_s22  ;;  %2439 = vrot.lane.b32.xlu0 %v2936_v38, %s2709_s22 }
  0xab   :  { %2444 = vrot.lane.b32.xlu1 %v2936_v38, %s2709_s22  ;;  %352 = vrot.lane.b32.xlu0 %v2946_v40, %s2709_s22 }
  0xad   :  { %v3020_v45 = vpop.permute.xlu1 %2354  ;;  %v3022_v46 = vpop.permute.xlu0 %2349 }
  0xaf   :  { %1304 = vrot.lane.b32.xlu1 %v2955_v43, %s2709_s22  ;;  %1300 = vrot.lane.b32.xlu0 %v2958_v44, %s2709_s22 }
  0xb1   :  { %v3028_v47 = vpop.permute.xlu1 %126  ;;  %v3030_v48 = vpop.permute.xlu0 %122 }
  0xb3   :  { %2449 = vrot.lane.b32.xlu1 %v2824_v4, %s2713_s7  ;;  %480 = vrot.lane.b32.xlu0 %v2844_v13, %s2713_s7 }
  0xb5   :  { %v3036_v49 = vpop.permute.xlu1 %159  ;;  %v3038_v50 = vpop.permute.xlu0 %155 }
  0xb7   :  { %1432 = vrot.lane.b32.xlu1 %v2864_v18, %s2713_s7  ;;  %484 = vrot.lane.b32.xlu0 %v2841_v12, %s2713_s7 }
  0xb9   :  { %v3044_v51 = vpop.permute.xlu1 %1079  ;;  %v3046_v52 = vpop.permute.xlu0 %2359 }
  0xbb   :  { %1436 = vrot.lane.b32.xlu1 %v2872_v20, %s2713_s7  ;;  %2454 = vrot.lane.b32.xlu0 %v2824_v4, %s2713_s7 }
  0xbd   :  { %v3052_v53 = vpop.permute.xlu1 %2364  ;;  %v3054_v54 = vpop.permute.xlu0 %1083 }
  0xbf   :  { %2459 = vrot.lane.b32.xlu1 %v2822_v3, %s2713_s7  ;;  %512 = vrot.lane.b32.xlu0 %v2854_v15, %s2713_s7 }
  0xc1   :  { %v3060_v55 = vpop.permute.xlu1 %1114  ;;  %v3062_v56 = vpop.permute.xlu0 %1110 }
  0xc3   :  { %1463 = vrot.lane.b32.xlu1 %v2884_v24, %s2713_s7  ;;  %516 = vrot.lane.b32.xlu0 %v2851_v14, %s2713_s7 }
  0xc5   :  { %v3068_v57 = vpop.permute.xlu1 %176  ;;  %v3070_v58 = vpop.permute.xlu0 %2369 }
  0xc7   :  { %1467 = vrot.lane.b32.xlu1 %v2881_v23, %s2713_s7  ;;  %2464 = vrot.lane.b32.xlu0 %v2822_v3, %s2713_s7 }
  0xc9   :  { %v3076_v59 = vpop.permute.xlu1 %2374  ;;  %v3078_v60 = vpop.permute.xlu0 %180 }
  0xcb   :  { %2469 = vrot.lane.b32.xlu1 %v3934_v0, %s2713_s7  ;;  %533 = vrot.lane.b32.xlu0 %v2830_v5, %s2713_s7 }
  0xcd   :  { %v3084_v61 = vpop.permute.xlu1 %1135  ;;  %v3086_v62 = vpop.permute.xlu0 %1131 }
  0xcf   :  { %1484 = vrot.lane.b32.xlu1 %v2838_v11, %s2713_s7  ;;  %537 = vrot.lane.b32.xlu0 %v2832_v6, %s2713_s7 }
  0xd1   :  { %v3092_v63 = vpop.permute.xlu1 %210  ;;  %v3094_v1 = vpop.permute.xlu0 %2379 }
  0xd3   :  { %1488 = vrot.lane.b32.xlu1 %v2857_v17, %s2713_s7  ;;  %2474 = vrot.lane.b32.xlu0 %v3934_v0, %s2713_s7  ;;  %v387_v0 = vmul.f32 0.0, %v2156_v36 }
  0xd5   :  { %v3100_v2 = vpop.permute.xlu1 %2384  ;;  %v3102_v7 = vpop.permute.xlu0 %214 }
  0xd7   :  { %2479 = vrot.lane.b32.xlu1 %v2905_v28, %s2713_s7  ;;  %566 = vrot.lane.b32.xlu0 %v2908_v29, %s2713_s7  ;;  %v1340_v29 = vmul.f32 %v2156_v36, %v2838_v11 }
  0xd9   :  { %v3108_v8 = vpop.permute.xlu1 %1168  ;;  %v3110_v9 = vpop.permute.xlu0 %1164 }
  0xdb   :  { %1517 = vrot.lane.b32.xlu1 %v2928_v35, %s2713_s7  ;;  %570 = vrot.lane.b32.xlu0 %v2915_v30, %s2713_s7  ;;  %v1321_v30 = vmul.f32 %v2155_v31, %v2857_v17  ;;  %v376_v35 = vrot.slane %v369_v42, 6 }
  0xdd   :  { %v3116_v10 = vpop.permute.xlu1 %242  ;;  %v3118_v16 = vpop.permute.xlu0 %2389 }
  0xdf   :  { %1521 = vrot.lane.b32.xlu1 %v2925_v34, %s2713_s7  ;;  %2484 = vrot.lane.b32.xlu0 %v2905_v28, %s2713_s7  ;;  %v1320_v34 = vmul.f32 %v2155_v31, %v2838_v11  ;;  %v1341_v28 = vmul.f32 %v2156_v36, %v2857_v17  ;;  %v3176_v31 = vld [vmem:[#allocation6 + $0x11] ss:$0 sm:$0xff] }
  0xe1   :  { %v3124_v19 = vpop.permute.xlu1 %2394  ;;  %v3126_v21 = vpop.permute.xlu0 %246 }
  0xe3   :  { %2489 = vrot.lane.b32.xlu1 %v2936_v38, %s2713_s7  ;;  %597 = vrot.lane.b32.xlu0 %v2939_v39, %s2713_s7 }
  0xe5   :  { %v3132_v22 = vpop.permute.xlu1 %1199  ;;  %v3134_v25 = vpop.permute.xlu0 %1195 }
  0xe6   :  { %3961 = vst [vmem:[#allocation23_spill] sm:$0xff] %v3134_v25  ;;  %v3178_v25 = vld [vmem:[#allocation6 + $0xc] ss:$0 sm:$0xff] }
  0xe7   :  { %1548 = vrot.lane.b32.xlu1 %v2958_v44, %s2713_s7  ;;  %601 = vrot.lane.b32.xlu0 %v2946_v40, %s2713_s7  ;;  %v389_v44 = vmul.f32 %v2156_v36, %v2832_v6  ;;  %3967 = vst [vmem:[#allocation29_spill] sm:$0xff] %v3178_v25 }
  0xe9   :  { %v3140_v26 = vpop.permute.xlu1 %263  ;;  %v3142_v27 = vpop.permute.xlu0 %2399 }
  0xea   :  { %3962 = vst [vmem:[#allocation24_spill] sm:$0xff] %v3140_v26 }
  0xeb   :  { %1552 = vrot.lane.b32.xlu1 %v2955_v43, %s2713_s7  ;;  %2494 = vrot.lane.b32.xlu0 %v2936_v38, %s2713_s7  ;;  %v388_v43 = vmul.f32 %v2156_v36, %v2830_v5  ;;  %v373_v38 = vrot.slane %v367_v37, 6  ;;  %v2352_v36 = vunpack.i.h.bf16 %v3022_v46 }
  0xed   :  { %v3148_v32 = vpop.permute.xlu1 %2404  ;;  %v3150_v33 = vpop.permute.xlu0 %267  ;;  %v130_v42 = vsel %vm128_vm4, %v2352_v36, %v3028_v47  ;;  %v2356_v36 = vunpack.i.l.bf16 %v3020_v45 }
  0xee   :  { %3963 = vst [vmem:[#allocation25_spill] sm:$0xff] %v3148_v32  ;;  %3964 = vst [vmem:[#allocation26_spill] sm:$0xff] %v3150_v33  ;;  %v394_v33 = vrot.slane %v388_v43, 7  ;;  %v1326_v32 = vrot.slane %v1320_v34, 6  ;;  %v1346_v43 = vrot.slane %v1340_v29, 7  ;;  %v3212_v29 = vmul.f32 %v3176_v31, %v2857_v17 }
  0xef   :  { %2499 = vrot.lane.b32.xlu1 %v2824_v4, %s2714_s27  ;;  %618 = vrot.lane.b32.xlu0 %v2844_v13, %s2714_s27  ;;  %v374_v13 = vrot.slane %v368_v41, 6 }
  0xf1   :  { %v3160_v40 = vpop.permute.xlu1 %1220  ;;  %v3162_v39 = vpop.permute.xlu0 %1216 }
  0xf2   :  { %3965 = vst [vmem:[#allocation27_spill] sm:$0xff] %v3160_v40  ;;  %3966 = vst [vmem:[#allocation28_spill] sm:$0xff] %v3162_v39  ;;  %v393_v40 = vrot.slane %v387_v0, 7  ;;  %v396_v39 = vrot.slane %v389_v44, 7  ;;  %v3185_v0 = vsel %vm109_vm0, %v373_v38, %v374_v13  ;;  %v1348_v44 = vrot.slane %v1341_v28, 7 }
  0xf3   :  { %1569 = vrot.lane.b32.xlu1 %v2864_v18, %s2714_s27  ;;  %622 = vrot.lane.b32.xlu0 %v2841_v12, %s2714_s27  ;;  %v1328_v18 = vrot.slane %v1321_v30, 6  ;;  %v3188_v12 = vsel %vm109_vm0, %v374_v13, %v376_v35  ;;  %v3208_v28 = vmul.f32 %v3178_v25, %v2857_v17  ;;  %v2361_v13 = vunpack.i.l.bf16 %v3046_v52 }
  0xf4   :  { %3968 = vst [vmem:[#allocation30_spill] sm:$0xff] %v3188_v12  ;;  %v3192_v30 = vsel %vm142_vm1, %v393_v40, %v394_v33  ;;  %v3195_v34 = vsel %vm142_vm1, %v394_v33, %v396_v39  ;;  %v3216_v39 = vmul.f32 %v3178_v25, %v2830_v5  ;;  %v2145_v33 = vld [vmem:[#allocation6] ss:$0 sm:$0xff]  ;;  %v2146_v12 = vld [vmem:[#allocation6 + $0x5] ss:$0 sm:$0xff]  ;;  %v3236_v47 = vsel %vm142_vm1, %v1346_v43, %v1348_v44 }
  0xf5   :  { %v3172_v37 = vpop.permute.xlu1 %285  ;;  %v3174_v26 = vpop.permute.xlu0 %2409  ;;  %3969 = vst [vmem:[#allocation31_spill] sm:$0xff] %v3192_v30  ;;  %3970 = vst [vmem:[#allocation32_spill] sm:$0xff] %v3195_v34  ;;  %v3222_v34 = vsel %vm109_vm0, %v1326_v32, %v1328_v18  ;;  %v2351_v30 = vunpack.i.l.bf16 %v3022_v46  ;;  %v3239_v18 = vsel %vm109_vm0, %v373_v38, %v1326_v32  ;;  %v2371_v46 = vunpack.i.l.bf16 %v3070_v58 }
  0xf6   :  { %3971 = vst [vmem:[#allocation33_spill] sm:$0xff] %v3208_v28  ;;  %3972 = vst [vmem:[#allocation34_spill] sm:$0xff] %v3216_v39  ;;  %v3226_v28 = vmul.f32 %v3176_v31, %v2832_v6  ;;  %v3244_v39 = vsel %vm142_vm1, %v393_v40, %v1346_v43  ;;  %v2367_v44 = vunpack.i.h.bf16 %v3052_v53  ;;  %v2366_v38 = vunpack.i.l.bf16 %v3052_v53 }
  0xf7   :  { %1573 = vrot.lane.b32.xlu1 %v2872_v20, %s2714_s27  ;;  %2504 = vrot.lane.b32.xlu0 %v2824_v4, %s2714_s27  ;;  %v3199_v20 = vmul.f32 %v3176_v31, %v2830_v5  ;;  %v2357_v4 = vunpack.i.h.bf16 %v3020_v45  ;;  %3973 = vst [vmem:[#allocation35_spill] sm:$0xff] %v3236_v47  ;;  %3974 = vst [vmem:[#allocation36_spill] sm:$0xff] %v3244_v39  ;;  %v161_v40 = vsel %vm128_vm4, %v2356_v36, %v3038_v50 }
  0xf8   :  { %v2362_v43 = vunpack.i.h.bf16 %v3046_v52  ;;  %v2372_v53 = vunpack.i.h.bf16 %v3070_v58  ;;  %v2377_v39 = vunpack.i.h.bf16 %v3076_v59  ;;  %v2147_v52 = vld [vmem:[#allocation6 + $0xa] ss:$0 sm:$0xff] }
  0xf9   :  { %v3202_v41 = vpop.permute.xlu1 %2414  ;;  %v3204_v35 = vpop.permute.xlu0 %289  ;;  %v162_v25 = vsel %vm128_vm4, %v2357_v4, %v3036_v49  ;;  %v3248_v49 = vmul.f32 %v3176_v31, %v2838_v11  ;;  %v134_v4 = vmul.f32 %v2145_v33, %v130_v42  ;;  %v1085_v42 = vsel %vm128_vm4, %v2361_v13, %v3044_v51 }
  0xfa   :  { %v166_v47 = vmul.f32 %v2146_v12, %v162_v25  ;;  %v1086_v50 = vsel %vm128_vm4, %v2362_v43, %v3054_v54  ;;  %v2376_v51 = vunpack.i.l.bf16 %v3076_v59  ;;  %v165_v25 = vmul.f32 %v2146_v12, %v161_v40 }
  0xfb   :  { %2509 = vrot.lane.b32.xlu1 %v2822_v3, %s2714_s27  ;;  %640 = vrot.lane.b32.xlu0 %v2854_v15, %s2714_s27  ;;  %v129_v15 = vsel %vm128_vm4, %v2351_v30, %v3030_v48  ;;  %v1117_v48 = vsel %vm128_vm4, %v2367_v44, %v3060_v55  ;;  %v1116_v30 = vsel %vm128_vm4, %v2366_v38, %v3062_v56  ;;  %v2381_v56 = vunpack.i.l.bf16 %v3094_v1 }
  0xfc   :  { %v182_v55 = vsel %vm128_vm4, %v2371_v46, %v3068_v57  ;;  %v133_v58 = vmul.f32 %v2145_v33, %v129_v15  ;;  %v183_v13 = vsel %vm128_vm4, %v2372_v53, %v3078_v60  ;;  %v168_v54 = vadd.f32 %v166_v47, %v134_v4  ;;  %v2148_v47 = vld [vmem:[#allocation6 + $0xf] ss:$0 sm:$0xff] }
  0xfd   :  { %v3254_v32 = vpop.permute.xlu1 %1241  ;;  %v3256_v45 = vpop.permute.xlu0 %1237  ;;  %v1121_v59 = vmul.f32 %v2146_v12, %v1117_v48  ;;  %v1120_v44 = vmul.f32 %v2146_v12, %v1116_v30  ;;  %v1137_v57 = vsel %vm128_vm4, %v2376_v51, %v3086_v62  ;;  %v1089_v46 = vmul.f32 %v2145_v33, %v1085_v42 }
  0xfe   :  { %v1090_v38 = vmul.f32 %v2145_v33, %v1086_v50  ;;  %v186_v15 = vmul.f32 %v2147_v52, %v182_v55  ;;  %v3294_v60 = vmul.f32 0.0, %v3176_v31  ;;  %v2382_v12 = vunpack.i.h.bf16 %v3094_v1 }
  0xff   :  { %1590 = vrot.lane.b32.xlu1 %v2884_v24, %s2714_s27  ;;  %644 = vrot.lane.b32.xlu0 %v2851_v14, %s2714_s27  ;;  %v1138_v24 = vsel %vm128_vm4, %v2377_v39, %v3084_v61  ;;  %v187_v61 = vmul.f32 %v2147_v52, %v183_v13  ;;  %v216_v62 = vsel %vm128_vm4, %v2381_v56, %v3092_v63  ;;  %v2387_v40 = vunpack.i.h.bf16 %v3100_v2 }
 0x100   :  { %v1142_v39 = vmul.f32 %v2147_v52, %v1138_v24  ;;  %v167_v33 = vadd.f32 %v165_v25, %v133_v58  ;;  %v1141_v4 = vmul.f32 %v2147_v52, %v1137_v57  ;;  %v1123_v31 = vadd.f32 %v1121_v59, %v1090_v38 }
 0x101   :  { %v3283_v14 = vpop.permute.xlu1 %306  ;;  %v3285_v36 = vpop.permute.xlu0 %2419  ;;  %v1122_v42 = vadd.f32 %v1120_v44, %v1089_v46  ;;  %v2386_v48 = vunpack.i.l.bf16 %v3100_v2  ;;  %v217_v1 = vsel %vm128_vm4, %v2382_v12, %v3102_v7  ;;  %v220_v53 = vmul.f32 %v2148_v47, %v216_v62  ;;  %v3977_v62 = vld [vmem:[#allocation25_spill] sm:$0xff] }
 0x102   :  { %v188_v30 = vadd.f32 %v186_v15, %v167_v33  ;;  %v1171_v63 = vsel %vm128_vm4, %v2387_v40, %v3108_v8  ;;  %v3975_v50 = vmov 0.0   ;;  %v1375_v51 = vrot.slane %v3212_v29, 1  ;;  %v2149_v8 = vld [vmem:[#allocation6 + $0x14] ss:$0 sm:$0xff] }
 0x103   :  { %1594 = vrot.lane.b32.xlu1 %v2881_v23, %s2714_s27  ;;  %2514 = vrot.lane.b32.xlu0 %v2822_v3, %s2714_s27  ;;  %v2391_v23 = vunpack.i.l.bf16 %v3118_v16  ;;  %v189_v52 = vadd.f32 %v187_v61, %v168_v54  ;;  %v1144_v55 = vadd.f32 %v1142_v39, %v1123_v31  ;;  %v1170_v2 = vsel %vm128_vm4, %v2386_v48, %v3110_v9  ;;  %v3978_v48 = vld [vmem:[#allocation24_spill] sm:$0xff] }
 0x104   :  { %v2392_v7 = vunpack.i.h.bf16 %v3118_v16  ;;  %v1143_v56 = vadd.f32 %v1141_v4, %v1122_v42  ;;  %v221_v58 = vmul.f32 %v2148_v47, %v217_v1  ;;  %v2397_v25 = vunpack.i.h.bf16 %v3124_v19  ;;  %v2150_v42 = vld [vmem:[#allocation6 + $0x1] ss:$0 sm:$0xff] }
 0x105   :  { %v3301_v43 = vpop.permute.xlu1 %2424  ;;  %v3303_v3 = vpop.permute.xlu0 %310  ;;  %v248_v13 = vsel %vm128_vm4, %v2391_v23, %v3116_v10  ;;  %v1175_v44 = vmul.f32 %v2148_v47, %v1171_v63  ;;  %v2396_v54 = vunpack.i.l.bf16 %v3124_v19  ;;  %v2401_v16 = vunpack.i.l.bf16 %v3142_v27  ;;  %v3976_v19 = vld [vmem:[#allocation23_spill] sm:$0xff] }
 0x106   :  { %v249_v9 = vsel %vm128_vm4, %v2392_v7, %v3126_v21  ;;  %v222_v57 = vadd.f32 %v220_v53, %v188_v30  ;;  %v1174_v46 = vmul.f32 %v2148_v47, %v1170_v2  ;;  %v1202_v38 = vsel %vm128_vm4, %v2397_v25, %v3132_v22  ;;  %v3979_v30 = vld [vmem:[#allocation26_spill] sm:$0xff]  ;;  %v3980_v63 = vld [vmem:[#allocation27_spill] sm:$0xff]  ;;  %v3981_v2 = vld [vmem:[#allocation28_spill] sm:$0xff] }
 0x107   :  { %2519 = vrot.lane.b32.xlu1 %v3975_v50, %s2714_s27  ;;  %661 = vrot.lane.b32.xlu0 %v2830_v5, %s2714_s27  ;;  %v1377_v10 = vrot.slane %v3294_v60, 1  ;;  %v252_v15 = vmul.f32 %v2149_v8, %v248_v13  ;;  %v1201_v61 = vsel %vm128_vm4, %v2396_v54, %v3976_v19  ;;  %v2402_v21 = vunpack.i.h.bf16 %v3142_v27  ;;  %v2151_v13 = vld [vmem:[#allocation6 + $0x6] ss:$0 sm:$0xff] }
 0x108   :  { %v2411_v39 = vunpack.i.l.bf16 %v3174_v26  ;;  %v223_v12 = vadd.f32 %v221_v58, %v189_v52  ;;  %v253_v47 = vmul.f32 %v2149_v8, %v249_v9  ;;  %v2407_v22 = vunpack.i.h.bf16 %v3977_v62 }
 0x109   :  { %v3321_v24 = vpop.permute.xlu1 %1262  ;;  %v3323_v59 = vpop.permute.xlu0 %1258  ;;  %v2406_v33 = vunpack.i.l.bf16 %v3977_v62  ;;  %v1177_v23 = vadd.f32 %v1175_v44, %v1144_v55  ;;  %v1206_v31 = vmul.f32 %v2149_v8, %v1202_v38  ;;  %v270_v1 = vsel %vm269_vm5, %v2401_v16, %v3978_v48 }
 0x10a   :  { %v271_v53 = vsel %vm269_vm5, %v2402_v21, %v3979_v30  ;;  %v1205_v27 = vmul.f32 %v2149_v8, %v1201_v61  ;;  %v1223_v52 = vsel %vm269_vm5, %v2407_v22, %v3980_v63  ;;  %v2412_v58 = vunpack.i.h.bf16 %v3174_v26  ;;  %v2152_v22 = vld [vmem:[#allocation6 + $0xb] ss:$0 sm:$0xff]  ;;  %v2153_v63 = vld [vmem:[#allocation6 + $0x10] ss:$0 sm:$0xff] }
 0x10b   :  { %1611 = vrot.lane.b32.xlu1 %v2838_v11, %s2714_s27  ;;  %665 = vrot.lane.b32.xlu0 %v2832_v6, %s2714_s27  ;;  %v1222_v7 = vsel %vm269_vm5, %v2406_v33, %v3981_v2  ;;  %v1176_v55 = vadd.f32 %v1174_v46, %v1143_v56  ;;  %v254_v25 = vadd.f32 %v252_v15, %v222_v57  ;;  %v2421_v44 = vunpack.i.l.bf16 %v3285_v36 }
 0x10c   :  { %v291_v8 = vsel %vm269_vm5, %v2411_v39, %v3172_v37  ;;  %v255_v54 = vadd.f32 %v253_v47, %v223_v12  ;;  %v274_v9 = vmul.f32 %v2150_v42, %v270_v1  ;;  %v275_v16 = vmul.f32 %v2150_v42, %v271_v53  ;;  %v3982_v39 = vld [vmem:[#allocation13_spill] sm:$0xff]  ;;  %v3983_v12 = vld [vmem:[#allocation14_spill] sm:$0xff] }
 0x10d   :  { %v328_v4 = vpop.permute.xlu1 %327  ;;  %v2430_v40 = vpop.permute.xlu0 %2429  ;;  %v292_v26 = vsel %vm269_vm5, %v2412_v58, %v3204_v35  ;;  %v1227_v61 = vmul.f32 %v2150_v42, %v1223_v52  ;;  %v1226_v21 = vmul.f32 %v2150_v42, %v1222_v7  ;;  %v2422_v62 = vunpack.i.h.bf16 %v3285_v36  ;;  %v3984_v58 = vld [vmem:[#allocation17_spill] sm:$0xff] }
 0x10e   :  { %v2431_v56 = vunpack.i.l.bf16 %v2430_v40  ;;  %v1208_v57 = vadd.f32 %v1206_v31, %v1177_v23  ;;  %v1207_v46 = vadd.f32 %v1205_v27, %v1176_v55  ;;  %v2417_v15 = vunpack.i.h.bf16 %v3202_v41 }
 0x10f   :  { %1615 = vrot.lane.b32.xlu1 %v2857_v17, %s2714_s27  ;;  %2524 = vrot.lane.b32.xlu0 %v3975_v50, %s2714_s27  ;;  %v295_v37 = vmul.f32 %v2151_v13, %v291_v8  ;;  %v2416_v35 = vunpack.i.l.bf16 %v3202_v41  ;;  %v296_v47 = vmul.f32 %v2151_v13, %v292_v26  ;;  %v312_v33 = vsel %vm269_vm5, %v2421_v44, %v3283_v14 }
 0x110   :  { %v313_v36 = vsel %vm269_vm5, %v2422_v62, %v3303_v3  ;;  %v276_v23 = vadd.f32 %v274_v9, %v254_v25  ;;  %v277_v31 = vadd.f32 %v275_v16, %v255_v54  ;;  %v1244_v42 = vsel %vm269_vm5, %v2417_v15, %v3254_v32  ;;  %v3985_v32 = vld [vmem:[#allocation15_spill] sm:$0xff] }
 0x111   :  { %v2435_v38 = vpop.permute.xlu1 %2434  ;;  %v332_v19 = vpop.permute.xlu0 %331  ;;  %v2432_v48 = vunpack.i.h.bf16 %v2430_v40  ;;  %v1229_v53 = vadd.f32 %v1227_v61, %v1208_v57  ;;  %v1228_v27 = vadd.f32 %v1226_v21, %v1207_v46  ;;  %v1243_v41 = vsel %vm269_vm5, %v2416_v35, %v3256_v45  ;;  %v2154_v62 = vld [vmem:[#allocation6 + $0x15] ss:$0 sm:$0xff] }
 0x112   :  { %v333_v52 = vsel %vm269_vm5, %v2431_v56, %v328_v4  ;;  %v2427_v14 = vunpack.i.h.bf16 %v3301_v43  ;;  %v316_v2 = vmul.f32 %v2152_v22, %v312_v33  ;;  %v317_v3 = vmul.f32 %v2152_v22, %v313_v36 }
 0x113   :  { %2529 = vrot.lane.b32.xlu1 %v3982_v39, %s2714_s27  ;;  %682 = vrot.lane.b32.xlu0 %v3983_v12, %s2714_s27  ;;  %v334_v7 = vsel %vm269_vm5, %v2432_v48, %v332_v19  ;;  %v297_v40 = vadd.f32 %v295_v37, %v276_v23  ;;  %v298_v55 = vadd.f32 %v296_v47, %v277_v31  ;;  %v2426_v45 = vunpack.i.l.bf16 %v3301_v43  ;;  %v3986_v43 = vld [vmem:[#allocation16_spill] sm:$0xff]  ;;  %v2159_v23 = vld [vmem:[#allocation6 + $0x16] ss:$0 sm:$0xff] }
 0x114   :  { %v1248_v25 = vmul.f32 %v2151_v13, %v1244_v42  ;;  %v1247_v8 = vmul.f32 %v2151_v13, %v1243_v41  ;;  %v1265_v4 = vsel %vm269_vm5, %v2427_v14, %v3321_v24  ;;  %v2437_v44 = vunpack.i.h.bf16 %v2435_v38 }
 0x115   :  { %v1284_v1 = vpop.permute.xlu1 %1283  ;;  %v1280_v30 = vpop.permute.xlu0 %1279  ;;  %v337_v54 = vmul.f32 %v2153_v63, %v333_v52  ;;  %v1264_v26 = vsel %vm269_vm5, %v2426_v45, %v3323_v59  ;;  %v2436_v19 = vunpack.i.l.bf16 %v2435_v38  ;;  %v338_v61 = vmul.f32 %v2153_v63, %v334_v7  ;;  %v3988_v52 = vld [vmem:[#allocation19_spill] sm:$0xff] }
 0x116   :  { %v318_v56 = vadd.f32 %v316_v2, %v297_v40  ;;  %v319_v57 = vadd.f32 %v317_v3, %v298_v55  ;;  %v1286_v46 = vsel %vm269_vm5, %v2437_v44, %v1284_v1  ;;  %v422_v24 = vrot.slane %v3199_v20, 1 }
 0x117   :  { %1632 = vrot.lane.b32.xlu1 %v3984_v58, %s2714_s27  ;;  %686 = vrot.lane.b32.xlu0 %v3985_v32, %s2714_s27  ;;  %v1269_v13 = vmul.f32 %v2152_v22, %v1265_v4  ;;  %v1285_v15 = vsel %vm269_vm5, %v2436_v19, %v1280_v30  ;;  %v1250_v37 = vadd.f32 %v1248_v25, %v1229_v53  ;;  %v3987_v30 = vld [vmem:[#allocation18_spill] sm:$0xff]  ;;  %v1374_v19 = vrot.slane %v3248_v49, 1  ;;  %v3994_v49 = vld [vmem:[#allocation32_spill] sm:$0xff] }
 0x118   :  { %v1268_v12 = vmul.f32 %v2152_v22, %v1264_v26  ;;  %v339_v35 = vadd.f32 %v337_v54, %v318_v56  ;;  %v1249_v31 = vadd.f32 %v1247_v8, %v1228_v27  ;;  %v340_v42 = vadd.f32 %v338_v61, %v319_v57  ;;  %v3989_v8 = vld [vmem:[#allocation30_spill] sm:$0xff]  ;;  %v3991_v54 = vld [vmem:[#allocation31_spill] sm:$0xff] }
 0x119   :  { %v349_v9 = vpop.permute.xlu1 %348  ;;  %v2440_v16 = vpop.permute.xlu0 %2439  ;;  %v1290_v48 = vmul.f32 %v2153_v63, %v1286_v46  ;;  %v1289_v1 = vmul.f32 %v2153_v63, %v1285_v15  ;;  %v423_v22 = vrot.slane %v3226_v28, 1  ;;  %v1271_v53 = vadd.f32 %v1269_v13, %v1250_v37  ;;  %v3993_v61 = vld [vmem:[#allocation22_spill] sm:$0xff] }
 0x11a   :  { %v2441_v21 = vunpack.i.l.bf16 %v2440_v16  ;;  %v2442_v59 = vunpack.i.h.bf16 %v2440_v16  ;;  %v436_v27 = vmul.f32 %v2159_v23, %v2830_v5  ;;  %v1270_v3 = vadd.f32 %v1268_v12, %v1249_v31  ;;  %v3992_v16 = vld [vmem:[#allocation29_spill] sm:$0xff] }
 0x11b   :  { %1636 = vrot.lane.b32.xlu1 %v3986_v43, %s2714_s27  ;;  %2534 = vrot.lane.b32.xlu0 %v3982_v39, %s2714_s27  ;;  %v1378_v63 = vsel %vm197_vm2, %v1375_v51, %v1377_v10  ;;  %v1292_v55 = vadd.f32 %v1290_v48, %v1271_v53  ;;  %v1359_v26 = vmul.f32 %v3992_v16, %v2838_v11  ;;  %v438_v15 = vmul.f32 0.0, %v2159_v23 }
 0x11c   :  { %v354_v38 = vsel %vm269_vm5, %v2441_v21, %v349_v9  ;;  %v1291_v45 = vadd.f32 %v1289_v1, %v1270_v3  ;;  %v437_v21 = vmul.f32 %v2159_v23, %v2832_v6  ;;  %v408_v43 = vmul.f32 %v3992_v16, %v2832_v6 }
 0x11d   :  { %v2445_v47 = vpop.permute.xlu1 %2444  ;;  %v353_v33 = vpop.permute.xlu0 %352  ;;  %v358_v36 = vmul.f32 %v2154_v62, %v354_v38  ;;  %v1389_v38 = vmul.f32 %v2159_v23, %v2857_v17  ;;  %v3997_v17 = vld [vmem:[#allocation35_spill] sm:$0xff]  ;;  %v426_v29 = vsel %vm197_vm2, %v423_v22, %v1377_v10 }
 0x11e   :  { %v355_v39 = vsel %vm269_vm5, %v2442_v59, %v353_v33  ;;  %v2447_v14 = vunpack.i.h.bf16 %v2445_v47  ;;  %v2446_v2 = vunpack.i.l.bf16 %v2445_v47  ;;  %v1388_v59 = vmul.f32 %v2159_v23, %v2838_v11  ;;  %v3996_v11 = vld [vmem:[#allocation21_spill] sm:$0xff] }
 0x11f   :  { %v359_v20 = vmul.f32 %v2154_v62, %v355_v39  ;;  %v360_v41 = vadd.f32 %v358_v36, %v339_v35  ;;  %2539 = vrot.lane.b32.xlu1 %v3987_v30, %s2714_s27  ;;  %703 = vrot.lane.b32.xlu0 %v3988_v52, %s2714_s27  ;;  %v424_v33 = vsel %vm197_vm2, %v422_v24, %v423_v22  ;;  %v3995_v36 = vld [vmem:[#allocation34_spill] sm:$0xff]  ;;  %v443_v39 = vrot.slane %v437_v21, 2  ;;  %v3999_v52 = vld [vmem:[#allocation33_spill] sm:$0xff] }
 0x121   :  { %v361_v7 = vadd.f32 %v359_v20, %v340_v42  ;;  %v380_v58 = vadd.f32 %v3185_v0, %v360_v41  ;;  %v1305_v32 = vpop.permute.xlu1 %1304  ;;  %v1301_v40 = vpop.permute.xlu0 %1300  ;;  %v3990_v0 = vld [vmem:[#allocation20_spill] sm:$0xff]  ;;  %v1376_v20 = vsel %vm197_vm2, %v1374_v19, %v1375_v51  ;;  %v1394_v41 = vrot.slane %v1388_v59, 2 }
 0x122   :  { %v1307_v28 = vsel %vm269_vm5, %v2447_v14, %v1305_v32  ;;  %v1306_v25 = vsel %vm269_vm5, %v2446_v2, %v1301_v40  ;;  %v3998_v42 = vld [vmem:[#allocation36_spill] sm:$0xff]  ;;  %v445_v2 = vrot.slane %v438_v15, 2  ;;  %v2160_v32 = vld [vmem:[#allocation6 + $0x3] ss:$0 sm:$0xff] }
 0x123   :  { %v381_v5 = vadd.f32 %v3989_v8, %v361_v7  ;;  %v1311_v4 = vmul.f32 %v2154_v62, %v1307_v28  ;;  %v1310_v44 = vmul.f32 %v2154_v62, %v1306_v25  ;;  %707 = vrot.lane.b32.xlu0 %v3990_v0, %s2714_s27  ;;  %v400_v9 = vadd.f32 %v3991_v54, %v380_v58 }
 0x124   :  { %1653 = vrot.lane.b32.xlu1 %v3993_v61, %s2714_s27  ;;  %v2161_v61 = vld [vmem:[#allocation6 + $0x8] ss:$0 sm:$0xff] }
 0x125   :  { %v1313_v56 = vadd.f32 %v1311_v4, %v1292_v55  ;;  %v1312_v57 = vadd.f32 %v1310_v44, %v1291_v45  ;;  %v2450_v46 = vpop.permute.xlu1 %2449  ;;  %v481_v62 = vpop.permute.xlu0 %480  ;;  %v401_v37 = vadd.f32 %v3994_v49, %v381_v5  ;;  %v409_v6 = vadd.f32 %v3995_v36, %v400_v9 }
 0x126   :  { %v2451_v13 = vunpack.i.l.bf16 %v2450_v46  ;;  %v2452_v47 = vunpack.i.h.bf16 %v2450_v46  ;;  %v446_v5 = vsel %vm229_vm3, %v443_v39, %v445_v2 }
 0x127   :  { %v1333_v12 = vadd.f32 %v3222_v34, %v1313_v56  ;;  %v1332_v35 = vadd.f32 %v3239_v18, %v1312_v57  ;;  %2544 = vrot.lane.b32.xlu0 %v3987_v30, %s2714_s27  ;;  %v442_v34 = vrot.slane %v436_v27, 2  ;;  %v1395_v30 = vrot.slane %v1389_v38, 2 }
 0x128   :  { %v489_v31 = vsel %vm488_vm6, %v481_v62, %v2451_v13  ;;  %1657 = vrot.lane.b32.xlu1 %v3996_v11, %s2714_s27  ;;  %v410_v3 = vadd.f32 %v408_v43, %v401_v37  ;;  %v429_v27 = vadd.f32 %v424_v33, %v409_v6 }
 0x129   :  { %v1353_v23 = vadd.f32 %v3997_v17, %v1333_v12  ;;  %v1352_v48 = vadd.f32 %v3998_v42, %v1332_v35  ;;  %v1433_v18 = vpop.permute.xlu1 %1432  ;;  %v485_v1 = vpop.permute.xlu0 %484  ;;  %v444_v58 = vsel %vm229_vm3, %v442_v34, %v443_v39  ;;  %v1396_v28 = vsel %vm229_vm3, %v1394_v41, %v1395_v30 }
 0x12a   :  { %v490_v24 = vsel %vm488_vm6, %v485_v1, %v2452_v47  ;;  %v1398_v25 = vsel %vm229_vm3, %v1395_v30, %v445_v2  ;;  %v430_v4 = vadd.f32 %v426_v29, %v410_v3  ;;  %v449_v44 = vadd.f32 %v444_v58, %v429_v27 }
 0x12b   :  { %v1362_v53 = vadd.f32 %v3999_v52, %v1353_v23  ;;  %v1361_v14 = vadd.f32 %v1359_v26, %v1352_v48  ;;  %2549 = vrot.lane.b32.xlu0 %v3975_v50, %s2715_s28  ;;  %v493_v60 = vmul.f32 %v2160_v32, %v489_v31  ;;  %v494_v56 = vmul.f32 %v2160_v32, %v490_v24 }
 0x12c   :  { %v450_v21 = vadd.f32 %v446_v5, %v430_v4 }
 0x12d   :  { %v1382_v7 = vadd.f32 %v1378_v63, %v1362_v53  ;;  %v1381_v51 = vadd.f32 %v1376_v20, %v1361_v14  ;;  %v1437_v40 = vpop.permute.xlu1 %1436  ;;  %v2455_v55 = vpop.permute.xlu0 %2454  ;;  %v495_v13 = vadd.f32 %v493_v60, %v449_v44 }
 0x12e   :  { %v2457_v45 = vunpack.i.h.bf16 %v2455_v55  ;;  %v2456_v8 = vunpack.i.l.bf16 %v2455_v55  ;;  %v496_v37 = vadd.f32 %v494_v56, %v450_v21 }
 0x12f   :  { %v1401_v0 = vadd.f32 %v1396_v28, %v1381_v51  ;;  %v1402_v54 = vadd.f32 %v1398_v25, %v1382_v7 }
 0x130   :  { %v1441_v10 = vsel %vm488_vm6, %v1437_v40, %v2457_v45  ;;  %v1440_v22 = vsel %vm488_vm6, %v1433_v18, %v2456_v8  ;;  %v2162_v18 = vld [vmem:[#allocation6 + $0xd] ss:$0 sm:$0xff] }
 0x131   :  { %v1445_v63 = vmul.f32 %v2160_v32, %v1441_v10  ;;  %v1444_v9 = vmul.f32 %v2160_v32, %v1440_v22  ;;  %v2460_v16 = vpop.permute.xlu1 %2459  ;;  %v513_v26 = vpop.permute.xlu0 %512 }
 0x132   :  { %v2461_v19 = vunpack.i.l.bf16 %v2460_v16  ;;  %v2462_v62 = vunpack.i.h.bf16 %v2460_v16 }
 0x133   :  { %v1446_v57 = vadd.f32 %v1444_v9, %v1401_v0  ;;  %v1447_v46 = vadd.f32 %v1445_v63, %v1402_v54  ;;  %v2163_v0 = vld [vmem:[#allocation6 + $0x12] ss:$0 sm:$0xff] }
 0x134   :  { %v520_v43 = vsel %vm488_vm6, %v513_v26, %v2461_v19 }
 0x135   :  { %v524_v15 = vmul.f32 %v2161_v61, %v520_v43  ;;  %v1464_v59 = vpop.permute.xlu1 %1463  ;;  %v517_v38 = vpop.permute.xlu0 %516 }
 0x136   :  { %v521_v49 = vsel %vm488_vm6, %v517_v38, %v2462_v62 }
 0x137   :  { %v526_v12 = vadd.f32 %v524_v15, %v495_v13  ;;  %v525_v35 = vmul.f32 %v2161_v61, %v521_v49 }
 0x139   :  { %v527_v47 = vadd.f32 %v525_v35, %v496_v37  ;;  %v1468_v33 = vpop.permute.xlu1 %1467  ;;  %v2465_v36 = vpop.permute.xlu0 %2464 }
 0x13a   :  { %v2467_v6 = vunpack.i.h.bf16 %v2465_v36  ;;  %v2466_v31 = vunpack.i.l.bf16 %v2465_v36 }
 0x13c   :  { %v1472_v11 = vsel %vm488_vm6, %v1468_v33, %v2467_v6  ;;  %v1471_v17 = vsel %vm488_vm6, %v1464_v59, %v2466_v31 }
 0x13d   :  { %v1476_v23 = vmul.f32 %v2161_v61, %v1472_v11  ;;  %v1475_v42 = vmul.f32 %v2161_v61, %v1471_v17  ;;  %v2470_v48 = vpop.permute.xlu1 %2469  ;;  %v534_v34 = vpop.permute.xlu0 %533 }
 0x13e   :  { %v2471_v39 = vunpack.i.l.bf16 %v2470_v48  ;;  %v2472_v24 = vunpack.i.h.bf16 %v2470_v48 }
 0x13f   :  { %v1477_v1 = vadd.f32 %v1475_v42, %v1446_v57  ;;  %v1478_v20 = vadd.f32 %v1476_v23, %v1447_v46 }
 0x140   :  { %v541_v41 = vsel %vm488_vm6, %v534_v34, %v2471_v39 }
 0x141   :  { %v545_v30 = vmul.f32 %v2162_v18, %v541_v41  ;;  %v1485_v52 = vpop.permute.xlu1 %1484  ;;  %v538_v53 = vpop.permute.xlu0 %537 }
 0x142   :  { %v542_v14 = vsel %vm488_vm6, %v538_v53, %v2472_v24 }
 0x143   :  { %v3458_v2 = vadd.f32 %v545_v30, %v526_v12  ;;  %v546_v3 = vmul.f32 %v2162_v18, %v542_v14  ;;  %v2164_v30 = vld [vmem:[#allocation6 + $0x17] ss:$0 sm:$0xff] }
 0x145   :  { %v3460_v27 = vadd.f32 %v546_v3, %v527_v47  ;;  %v1489_v29 = vpop.permute.xlu1 %1488  ;;  %v2475_v7 = vpop.permute.xlu0 %2474 }
 0x146   :  { %v2477_v51 = vunpack.i.h.bf16 %v2475_v7  ;;  %v2476_v58 = vunpack.i.l.bf16 %v2475_v7 }
 0x148   :  { %v1493_v32 = vsel %vm488_vm6, %v1489_v29, %v2477_v51  ;;  %v1492_v40 = vsel %vm488_vm6, %v1485_v52, %v2476_v58 }
 0x149   :  { %v1497_v55 = vmul.f32 %v2162_v18, %v1493_v32  ;;  %v1496_v28 = vmul.f32 %v2162_v18, %v1492_v40  ;;  %v2480_v25 = vpop.permute.xlu1 %2479  ;;  %v567_v45 = vpop.permute.xlu0 %566 }
 0x14a   :  { %v2481_v42 = vunpack.i.l.bf16 %v2480_v25  ;;  %v2482_v18 = vunpack.i.h.bf16 %v2480_v25 }
 0x14b   :  { %v1498_v8 = vadd.f32 %v1496_v28, %v1477_v1  ;;  %v1499_v5 = vadd.f32 %v1497_v55, %v1478_v20  ;;  %v3497_v55 = vld [vmem:[#allocation6 + $0x4] ss:$0 sm:$0xff] }
 0x14c   :  { %v574_v1 = vsel %vm488_vm6, %v567_v45, %v2481_v42 }
 0x14d   :  { %v1518_v4 = vpop.permute.xlu1 %1517  ;;  %v571_v44 = vpop.permute.xlu0 %570  ;;  %v578_v14 = vmul.f32 %v2163_v0, %v574_v1 }
 0x14e   :  { %v575_v24 = vsel %vm488_vm6, %v571_v44, %v2482_v18 }
 0x14f   :  { %v579_v58 = vmul.f32 %v2163_v0, %v575_v24 }
 0x151   :  { %v1522_v60 = vpop.permute.xlu1 %1521  ;;  %v2485_v10 = vpop.permute.xlu0 %2484 }
 0x152   :  { %v2487_v22 = vunpack.i.h.bf16 %v2485_v10  ;;  %v2486_v63 = vunpack.i.l.bf16 %v2485_v10 }
 0x154   :  { %v1526_v54 = vsel %vm488_vm6, %v1522_v60, %v2487_v22  ;;  %v1525_v9 = vsel %vm488_vm6, %v1518_v4, %v2486_v63 }
 0x155   :  { %v1530_v16 = vmul.f32 %v2163_v0, %v1526_v54  ;;  %v1529_v26 = vmul.f32 %v2163_v0, %v1525_v9  ;;  %v2490_v19 = vpop.permute.xlu1 %2489  ;;  %v598_v61 = vpop.permute.xlu0 %597  ;;  %v3507_v0 = vld [vmem:[#allocation6 + $0x9] ss:$0 sm:$0xff] }
 0x156   :  { %v2491_v48 = vunpack.i.l.bf16 %v2490_v19  ;;  %v2492_v41 = vunpack.i.h.bf16 %v2490_v19 }
 0x157   :  { %v3466_v21 = vadd.f32 %v1529_v26, %v1498_v8  ;;  %v3468_v56 = vadd.f32 %v1530_v16, %v1499_v5  ;;  %v580_v8 = vadd.f32 %v578_v14, %v3458_v2  ;;  %v581_v16 = vadd.f32 %v579_v58, %v3460_v27 }
 0x158   :  { %v605_v52 = vsel %vm488_vm6, %v598_v61, %v2491_v48 }
 0x159   :  { %v1549_v57 = vpop.permute.xlu1 %1548  ;;  %v602_v46 = vpop.permute.xlu0 %601  ;;  %v609_v32 = vmul.f32 %v2164_v30, %v605_v52 }
 0x15a   :  { %v606_v7 = vsel %vm488_vm6, %v602_v46, %v2492_v41 }
 0x15b   :  { %v610_v5 = vmul.f32 %v2164_v30, %v606_v7  ;;  %v611_v26 = vadd.f32 %v609_v32, %v580_v8  ;;  %v2169_v32 = vld [vmem:[#allocation6 + $0x18] ss:$0 sm:$0xff] }
 0x15d   :  { %v3470_v62 = vpop.permute.xlu1 %1552  ;;  %v3472_v43 = vpop.permute.xlu0 %2494 }
 0x15e   :  { %v2496_v53 = vunpack.i.l.bf16 %v3472_v43  ;;  %v2497_v4 = vunpack.i.h.bf16 %v3472_v43  ;;  %v3514_v43 = vld [vmem:[#allocation6 + $0xe] ss:$0 sm:$0xff] }
 0x160   :  { %v1556_v25 = vsel %vm488_vm6, %v1549_v57, %v2496_v53 }
 0x161   :  { %v2500_v13 = vpop.permute.xlu1 %2499  ;;  %v619_v15 = vpop.permute.xlu0 %618  ;;  %v1560_v2 = vmul.f32 %v2164_v30, %v1556_v25 }
 0x162   :  { %v2501_v20 = vunpack.i.l.bf16 %v2500_v13  ;;  %v2502_v40 = vunpack.i.h.bf16 %v2500_v13 }
 0x163   :  { %v1562_v41 = vadd.f32 %v1560_v2, %v3466_v21 }
 0x164   :  { %v627_v28 = vsel %vm626_vm7, %v619_v15, %v2501_v20  ;;  %v612_v15 = vadd.f32 %v610_v5, %v581_v16 }
 0x165   :  { %v3474_v59 = vpop.permute.xlu1 %1569  ;;  %v623_v38 = vpop.permute.xlu0 %622  ;;  %v631_v22 = vmul.f32 %v3497_v55, %v627_v28 }
 0x166   :  { %v628_v44 = vsel %vm626_vm7, %v623_v38, %v2502_v40  ;;  %v1557_v38 = vsel %vm488_vm6, %v3470_v62, %v2497_v4 }
 0x167   :  { %v632_v61 = vmul.f32 %v3497_v55, %v628_v44  ;;  %v633_v48 = vadd.f32 %v631_v22, %v611_v26  ;;  %v1561_v24 = vmul.f32 %v2164_v30, %v1557_v38 }
 0x169   :  { %v3476_v49 = vpop.permute.xlu1 %1573  ;;  %v3478_v37 = vpop.permute.xlu0 %2504  ;;  %v634_v52 = vadd.f32 %v632_v61, %v612_v15 }
 0x16a   :  { %v2506_v19 = vunpack.i.l.bf16 %v3478_v37 }
 0x16d   :  { %v2510_v12 = vpop.permute.xlu1 %2509  ;;  %v641_v35 = vpop.permute.xlu0 %640 }
 0x16e   :  { %v2511_v51 = vunpack.i.l.bf16 %v2510_v12  ;;  %v2512_v63 = vunpack.i.h.bf16 %v2510_v12  ;;  %v2507_v12 = vunpack.i.h.bf16 %v3478_v37 }
 0x170   :  { %v648_v54 = vsel %vm626_vm7, %v641_v35, %v2511_v51  ;;  %v1578_v53 = vsel %vm626_vm7, %v3476_v49, %v2507_v12 }
 0x171   :  { %v3480_v47 = vpop.permute.xlu1 %1590  ;;  %v645_v33 = vpop.permute.xlu0 %644  ;;  %v652_v27 = vmul.f32 %v3507_v0, %v648_v54  ;;  %v1582_v44 = vmul.f32 %v3497_v55, %v1578_v53 }
 0x172   :  { %v649_v57 = vsel %vm626_vm7, %v645_v33, %v2512_v63  ;;  %v3522_v33 = vld [vmem:[#allocation6 + $0x13] ss:$0 sm:$0xff] }
 0x173   :  { %v653_v20 = vmul.f32 %v3507_v0, %v649_v57  ;;  %v654_v14 = vadd.f32 %v652_v27, %v633_v48  ;;  %v1563_v57 = vadd.f32 %v1561_v24, %v3468_v56 }
 0x175   :  { %v3482_v36 = vpop.permute.xlu1 %1594  ;;  %v3484_v6 = vpop.permute.xlu0 %2514  ;;  %v655_v40 = vadd.f32 %v653_v20, %v634_v52 }
 0x176   :  { %v2516_v62 = vunpack.i.l.bf16 %v3484_v6  ;;  %v2517_v58 = vunpack.i.h.bf16 %v3484_v6 }
 0x178   :  { %v1598_v28 = vsel %vm626_vm7, %v3480_v47, %v2516_v62  ;;  %v1599_v54 = vsel %vm626_vm7, %v3482_v36, %v2517_v58  ;;  %v2014_v58 = vld [vmem:[#allocation8 + $0x18] sm:$0xff] }
 0x179   :  { %v2520_v31 = vpop.permute.xlu1 %2519  ;;  %v662_v11 = vpop.permute.xlu0 %661 }
 0x17a   :  { %v2521_v45 = vunpack.i.l.bf16 %v2520_v31  ;;  %v2522_v46 = vunpack.i.h.bf16 %v2520_v31 }
 0x17c   :  { %v669_v13 = vsel %vm626_vm7, %v662_v11, %v2521_v45  ;;  %v1577_v11 = vsel %vm626_vm7, %v3474_v59, %v2506_v19 }
 0x17d   :  { %v3486_v17 = vpop.permute.xlu1 %1611  ;;  %v666_v23 = vpop.permute.xlu0 %665  ;;  %v673_v37 = vmul.f32 %v3514_v43, %v669_v13  ;;  %v1581_v51 = vmul.f32 %v3497_v55, %v1577_v11  ;;  %v1602_v55 = vmul.f32 %v3507_v0, %v1598_v28  ;;  %v1603_v13 = vmul.f32 %v3507_v0, %v1599_v54  ;;  %v2017_v28 = vld [vmem:[#allocation8 + $0x30] sm:$0xff] }
 0x17e   :  { %v670_v18 = vsel %vm626_vm7, %v666_v23, %v2522_v46  ;;  %v2025_v54 = vld [vmem:[#allocation8 + $0x70] sm:$0xff] }
 0x17f   :  { %v675_v49 = vadd.f32 %v673_v37, %v654_v14  ;;  %v1583_v46 = vadd.f32 %v1581_v51, %v1562_v41  ;;  %v2013_v51 = vld [vmem:[#allocation8 + $0x10] sm:$0xff] }
 0x181   :  { %v3488_v34 = vpop.permute.xlu1 %1615  ;;  %v3490_v39 = vpop.permute.xlu0 %2524 }
 0x182   :  { %v2526_v30 = vunpack.i.l.bf16 %v3490_v39  ;;  %v2527_v45 = vunpack.i.h.bf16 %v3490_v39  ;;  %v2170_v39 = vld [vmem:[%s3926_s2] ss:$0 sm:$0xff]  ;;  %s2716_s2 = smov 104  }
 0x184   :  { %v1619_v47 = vsel %vm626_vm7, %v3486_v17, %v2526_v30  ;;  %v1620_v36 = vsel %vm626_vm7, %v3488_v34, %v2527_v45  ;;  %v2292_v30 = vpack.c.bf16 %v2014_v58, %v2013_v51  ;;  %v2019_v45 = vld [vmem:[#allocation8 + $0x40] sm:$0xff] }
 0x185   :  { %v2530_v3 = vpop.permute.xlu1 %2529  ;;  %v683_v29 = vpop.permute.xlu0 %682  ;;  %v1623_v15 = vmul.f32 %v3514_v43, %v1619_v47  ;;  %v1624_v34 = vmul.f32 %v3514_v43, %v1620_v36  ;;  %v2026_v47 = vld [vmem:[#allocation8 + $0x78] sm:$0xff] }
 0x186   :  { %v2531_v9 = vunpack.i.l.bf16 %v2530_v3  ;;  %v2532_v1 = vunpack.i.h.bf16 %v2530_v3  ;;  %v674_v3 = vmul.f32 %v3514_v43, %v670_v18 }
 0x188   :  { %v690_v31 = vsel %vm626_vm7, %v683_v29, %v2531_v9  ;;  %v676_v6 = vadd.f32 %v674_v3, %v655_v40 }
 0x189   :  { %v3504_v60 = vpop.permute.xlu1 %1632  ;;  %v687_v10 = vpop.permute.xlu0 %686  ;;  %v694_v59 = vmul.f32 %v3522_v33, %v690_v31  ;;  %v1604_v31 = vadd.f32 %v1602_v55, %v1583_v46 }
 0x18a   :  { %v691_v23 = vsel %vm626_vm7, %v687_v10, %v2532_v1 }
 0x18b   :  { %v695_v25 = vmul.f32 %v3522_v33, %v691_v23  ;;  %v696_v10 = vadd.f32 %v694_v59, %v675_v49  ;;  %v1625_v37 = vadd.f32 %v1623_v15, %v1604_v31  ;;  %v2011_v59 = vld [vmem:[#allocation8] sm:$0xff]  ;;  %v2018_v49 = vld [vmem:[#allocation8 + $0x38] sm:$0xff] }
 0x18c   :  { %v3660_v31 = vld [vmem:[%s3929_s5 + $0x1] ss:$0 sm:$0xff] }
 0x18d   :  { %v1637_v35 = vpop.permute.xlu1 %1636  ;;  %v2535_v42 = vpop.permute.xlu0 %2534  ;;  %v697_v2 = vadd.f32 %v695_v25, %v676_v6  ;;  %v2300_v25 = vpack.c.bf16 %v2018_v49, %v2017_v28 }
 0x18e   :  { %v2536_v8 = vunpack.i.l.bf16 %v2535_v42  ;;  %v2537_v9 = vunpack.i.h.bf16 %v2535_v42  ;;  %v1584_v42 = vadd.f32 %v1582_v44, %v1563_v57  ;;  %v2022_v44 = vld [vmem:[#allocation8 + $0x58] sm:$0xff] }
 0x190   :  { %v1640_v17 = vsel %vm626_vm7, %v3504_v60, %v2536_v8  ;;  %v1641_v48 = vsel %vm626_vm7, %v1637_v35, %v2537_v9  ;;  %v1605_v62 = vadd.f32 %v1603_v13, %v1584_v42  ;;  %v2020_v8 = vld [vmem:[#allocation8 + $0x48] sm:$0xff]  ;;  %v2316_v9 = vpack.c.bf16 %v2026_v47, %v2025_v54 }
 0x191   :  { %v2540_v29 = vpop.permute.xlu1 %2539  ;;  %v704_v7 = vpop.permute.xlu0 %703  ;;  %v1644_v11 = vmul.f32 %v3522_v33, %v1640_v17  ;;  %v1645_v35 = vmul.f32 %v3522_v33, %v1641_v48 }
 0x192   :  { %v2541_v21 = vunpack.i.l.bf16 %v2540_v29  ;;  %v2542_v5 = vunpack.i.h.bf16 %v2540_v29  ;;  %v1626_v43 = vadd.f32 %v1624_v34, %v1605_v62  ;;  %v2012_v29 = vld [vmem:[#allocation8 + $0x8] sm:$0xff]  ;;  %v3673_v62 = vmul.f32 0.0, %v3660_v31 }
 0x193   :  { %v1646_v41 = vadd.f32 %v1644_v11, %v1625_v37  ;;  %v2174_v11 = vld [vmem:[%s3927_s3 + $0x3] ss:$0 sm:$0xff] }
 0x194   :  { %v711_v4 = vsel %vm626_vm7, %v704_v7, %v2541_v21  ;;  %v1647_v23 = vadd.f32 %v1645_v35, %v1626_v43  ;;  %v2288_v7 = vpack.c.bf16 %v2012_v29, %v2011_v59  ;;  %v2015_v21 = vld [vmem:[#allocation8 + $0x20] sm:$0xff] }
 0x195   :  { %v715_v22 = vmul.f32 %v2169_v32, %v711_v4  ;;  %v708_v63 = vpop.permute.xlu0 %707  ;;  %v2304_v4 = vpack.c.bf16 %v2020_v8, %v2019_v45 }
 0x196   :  { %v712_v16 = vsel %vm626_vm7, %v708_v63, %v2542_v5  ;;  %v1654_v26 = vpop.permute.xlu1 %1653  ;;  %2289 = vmatprep.subr.bf16.mxu0 %v2288_v7  ;;  %2320 = vmatprep.subr.bf16.mxu1 %v2288_v7  ;;  %v2021_v5 = vld [vmem:[#allocation8 + $0x50] sm:$0xff] }
 0x197   :  { %v717_v19 = vadd.f32 %v715_v22, %v696_v10  ;;  %v716_v61 = vmul.f32 %v2169_v32, %v712_v16  ;;  %2291 = vmatpush3.bf16.msra.mxu0 %v2288_v7  ;;  %2328 = vmatpush3.bf16.msra.mxu1 %v2288_v7  ;;  %v2308_v6 = vpack.c.bf16 %v2022_v44, %v2021_v5  ;;  %v2023_v10 = vld [vmem:[#allocation8 + $0x60] sm:$0xff]  ;;  %v2024_v22 = vld [vmem:[#allocation8 + $0x68] sm:$0xff] }
 0x198   :  { %2293 = vmatprep.subr.bf16.mxu0 %v2292_v30  ;;  %2321 = vmatprep.subr.bf16.mxu1 %v2292_v30  ;;  %v2312_v63 = vpack.c.bf16 %v2024_v22, %v2023_v10 }
 0x199   :  { %v3561_v38 = vadd.f32 %v2170_v39, %v717_v19  ;;  %v718_v12 = vadd.f32 %v716_v61, %v697_v2  ;;  %v2545_v27 = vpop.permute.xlu0 %2544 }
 0x19a   :  { %v2547_v18 = vunpack.i.h.bf16 %v2545_v27  ;;  %v2546_v56 = vunpack.i.l.bf16 %v2545_v27  ;;  %v1658_v1 = vpop.permute.xlu1 %1657 }
 0x19b   :  { %v3566_v60 = vadd.f32 %v2170_v39, %v718_v12  ;;  %745 = vrot.lane.b32.xlu1 %v3561_v38, %s2715_s28  ;;  %2295 = vmatpush3.bf16.msra.mxu0 %v2292_v30  ;;  %v3678_v43 = vmul.f32 %v2174_v11, %v3561_v38 }
 0x19c   :  { %v1661_v0 = vsel %vm626_vm7, %v1654_v26, %v2546_v56  ;;  %v1662_v20 = vsel %vm626_vm7, %v1658_v1, %v2547_v18  ;;  %2329 = vmatpush3.bf16.msra.mxu1 %v2292_v30  ;;  %v916_v30 = vrot.slane %v3673_v62, 1 }
 0x19d   :  { %v1665_v24 = vmul.f32 %v2169_v32, %v1661_v0  ;;  %749 = vrot.lane.b32.xlu0 %v3566_v60, %s2715_s28  ;;  %v1666_v52 = vmul.f32 %v2169_v32, %v1662_v20  ;;  %v2016_v32 = vld [vmem:[#allocation8 + $0x28] sm:$0xff]  ;;  %v3670_v20 = vld [vmem:[%s3929_s5 + $0x2] ss:$0 sm:$0xff]  ;;  %v3688_v59 = vmul.f32 %v2174_v11, %v3566_v60 }
 0x19e   :  { %v2296_v40 = vpack.c.bf16 %v2016_v32, %v2015_v21 }
 0x19f   :  { %2554 = vrot.lane.b32.xlu1 %v3975_v50, %s2712_s26  ;;  %v1667_v53 = vadd.f32 %v1665_v24, %v1646_v41  ;;  %v1668_v14 = vadd.f32 %v1666_v52, %v1647_v23  ;;  %v3681_v41 = vmul.f32 0.0, %v3670_v20  ;;  %v2172_v23 = vld [vmem:[%s3927_s3 + $0x1] ss:$0 sm:$0xff] }
 0x1a0   :  { %2297 = vmatprep.subr.bf16.mxu0 %v2296_v40  ;;  %2322 = vmatprep.subr.bf16.mxu1 %v2296_v40 }
 0x1a1   :  { %767 = vrot.lane.b32.xlu0 %v3561_v38, %s2712_s26  ;;  %v3581_v33 = vadd.f32 %v2170_v39, %v1667_v53  ;;  %v3585_v3 = vadd.f32 %v2170_v39, %v1668_v14  ;;  %2299 = vmatpush3.bf16.msra.mxu0 %v2296_v40  ;;  %v938_v8 = vrot.slane %v3681_v41, 2 }
 0x1a2   :  { %2330 = vmatpush3.bf16.msra.mxu1 %v2296_v40  ;;  %2301 = vmatprep.subr.bf16.mxu0 %v2300_v25 }
 0x1a3   :  { %771 = vrot.lane.b32.xlu1 %v3566_v60, %s2712_s26  ;;  %2323 = vmatprep.subr.bf16.mxu1 %v2300_v25  ;;  %v3699_v51 = vmul.f32 %v2174_v11, %v3581_v33  ;;  %v3702_v58 = vmul.f32 %v2174_v11, %v3585_v3 }
 0x1a5   :  { %2559 = vrot.lane.b32.xlu0 %v3975_v50, %s2715_s28  ;;  %2303 = vmatpush3.bf16.msra.mxu0 %v2300_v25 }
 0x1a6   :  { %2331 = vmatpush3.bf16.msra.mxu1 %v2300_v25  ;;  %2305 = vmatprep.subr.bf16.mxu0 %v2304_v4 }
 0x1a7   :  { %1695 = vrot.lane.b32.xlu1 %v3581_v33, %s2715_s28  ;;  %2324 = vmatprep.subr.bf16.mxu1 %v2304_v4 }
 0x1a9   :  { %1699 = vrot.lane.b32.xlu0 %v3585_v3, %s2715_s28  ;;  %2307 = vmatpush3.bf16.msra.mxu0 %v2304_v4 }
 0x1aa   :  { %2309 = vmatprep.subr.bf16.mxu0 %v2308_v6  ;;  %2332 = vmatpush3.bf16.msra.mxu1 %v2304_v4 }
 0x1ab   :  { %2564 = vrot.lane.b32.xlu1 %v3975_v50, %s2712_s26  ;;  %2325 = vmatprep.subr.bf16.mxu1 %v2308_v6 }
 0x1ad   :  { %1716 = vrot.lane.b32.xlu0 %v3581_v33, %s2712_s26  ;;  %2311 = vmatpush3.bf16.msra.mxu0 %v2308_v6 }
 0x1ae   :  { %2313 = vmatprep.subr.bf16.mxu0 %v2312_v63  ;;  %2333 = vmatpush3.bf16.msra.mxu1 %v2308_v6  ;;  %v2173_v6 = vld [vmem:[%s3927_s3 + $0x2] ss:$0 sm:$0xff] }
 0x1af   :  { %1720 = vrot.lane.b32.xlu1 %v3585_v3, %s2712_s26  ;;  %2326 = vmatprep.subr.bf16.mxu1 %v2312_v63 }
 0x1b1   :  { %2569 = vrot.lane.b32.xlu0 %v3975_v50, %s2709_s22  ;;  %2315 = vmatpush3.bf16.msra.mxu0 %v2312_v63 }
 0x1b2   :  { %2317 = vmatprep.subr.bf16.mxu0 %v2316_v9  ;;  %2334 = vmatpush3.bf16.msra.mxu1 %v2312_v63 }
 0x1b3   :  { %788 = vrot.lane.b32.xlu1 %v3561_v38, %s2709_s22  ;;  %2327 = vmatprep.subr.bf16.mxu1 %v2316_v9 }
 0x1b5   :  { %792 = vrot.lane.b32.xlu0 %v3566_v60, %s2709_s22  ;;  %2319 = vmatpush3.bf16.msra.mxu0 %v2316_v9 }
 0x1b6   :  { %2335 = vmatpush3.bf16.msra.mxu1 %v2316_v9 }
 0x1b7   :  { %2574 = vrot.lane.b32.xlu1 %v3975_v50, %s2709_s22 }
 0x1b9   :  { %1737 = vrot.lane.b32.xlu0 %v3581_v33, %s2709_s22 }
 0x1bb   :  { %1741 = vrot.lane.b32.xlu1 %v3585_v3, %s2709_s22 }
 0x1bd   :  { %820 = vrot.lane.b32.xlu0 %v3561_v38, %s2713_s7 }
 0x1bf   :  { %2579 = vrot.lane.b32.xlu1 %v3975_v50, %s2713_s7 }
 0x1c1   :  { %824 = vrot.lane.b32.xlu0 %v3566_v60, %s2713_s7 }
 0x1c3   :  { %1769 = vrot.lane.b32.xlu1 %v3581_v33, %s2713_s7 }
 0x1c5   :  { %2584 = vrot.lane.b32.xlu0 %v3975_v50, %s2713_s7 }
 0x1c7   :  { %1773 = vrot.lane.b32.xlu1 %v3585_v3, %s2713_s7 }
 0x1c9   :  { %841 = vrot.lane.b32.xlu0 %v3561_v38, %s2714_s27 }
 0x1cb   :  { %2589 = vrot.lane.b32.xlu1 %v3975_v50, %s2714_s27 }
 0x1cd   :  { %845 = vrot.lane.b32.xlu0 %v3566_v60, %s2714_s27 }
 0x1cf   :  { %1790 = vrot.lane.b32.xlu1 %v3581_v33, %s2714_s27 }
 0x1d1   :  { %2594 = vrot.lane.b32.xlu0 %v3975_v50, %s2714_s27 }
 0x1d3   :  { %1794 = vrot.lane.b32.xlu1 %v3585_v3, %s2714_s27 }
 0x1d5   :  { %862 = vrot.lane.b32.xlu0 %v3561_v38, %s2716_s2  ;;  %v3695_v38 = vld [vmem:[%s3929_s5 + $0x4] ss:$0 sm:$0xff] }
 0x1d6   :  { %v3725_v5 = vmul.f32 0.0, %v3695_v38 }
 0x1d7   :  { %2599 = vrot.lane.b32.xlu1 %v3975_v50, %s2716_s2 }
 0x1d9   :  { %866 = vrot.lane.b32.xlu0 %v3566_v60, %s2716_s2  ;;  %v2171_v60 = vld [vmem:[%s3927_s3] ss:$0 sm:$0xff] }
 0x1db   :  { %1811 = vrot.lane.b32.xlu1 %v3581_v33, %s2716_s2  ;;  %v3713_v33 = vld [vmem:[%s3929_s5] ss:$0 sm:$0xff] }
 0x1dc   :  { %v3721_v45 = vmul.f32 0.0, %v3713_v33 }
 0x1dd   :  { %2604 = vrot.lane.b32.xlu0 %v3975_v50, %s2716_s2  ;;  %v2550_v50 = vpop.permute.xlu0 %2549 }
 0x1de   :  { %v2551_v37 = vunpack.i.l.bf16 %v2550_v50  ;;  %v2552_v52 = vunpack.i.h.bf16 %v2550_v50 }
 0x1df   :  { %1815 = vrot.lane.b32.xlu1 %v3585_v3, %s2716_s2  ;;  %v3718_v3 = vld [vmem:[%s3929_s5 + $0x5] ss:$0 sm:$0xff] }
 0x1e0   :  { %v3734_v50 = vmul.f32 0.0, %v3718_v3 }
 0x20d   :  { %v746_v39 = vpop.permute.xlu1 %745 }
 0x20e   :  { %v752_v21 = vsel %vm751_vm8, %v2551_v37, %v746_v39  ;;  %v3739_v39 = vld [vmem:[%s3929_s5 + $0x6] ss:$0 sm:$0xff] }
 0x20f   :  { %v750_v16 = vpop.permute.xlu0 %749  ;;  %v756_v54 = vmul.f32 %v2171_v60, %v752_v21 }
 0x210   :  { %v753_v32 = vsel %vm751_vm8, %v2552_v52, %v750_v16 }
 0x211   :  { %v2555_v26 = vpop.permute.xlu1 %2554  ;;  %v757_v47 = vmul.f32 %v2171_v60, %v753_v32 }
 0x212   :  { %v2556_v34 = vunpack.i.l.bf16 %v2555_v26  ;;  %v2557_v24 = vunpack.i.h.bf16 %v2555_v26 }
 0x213   :  { %v768_v55 = vpop.permute.xlu0 %767 }
 0x214   :  { %v773_v53 = vsel %vm128_vm4, %v2556_v34, %v768_v55 }
 0x215   :  { %v772_v2 = vpop.permute.xlu1 %771  ;;  %v777_v25 = vmul.f32 %v2172_v23, %v773_v53 }
 0x216   :  { %v774_v7 = vsel %vm128_vm4, %v2557_v24, %v772_v2 }
 0x217   :  { %v3639_v19 = vpop.permute.xlu0 %2559  ;;  %v778_v4 = vmul.f32 %v2172_v23, %v774_v7  ;;  %v779_v11 = vadd.f32 %v777_v25, %v756_v54 }
 0x218   :  { %v2561_v9 = vunpack.i.l.bf16 %v3639_v19  ;;  %v2562_v16 = vunpack.i.h.bf16 %v3639_v19  ;;  %v3749_v19 = vmul.f32 0.0, %v3739_v39 }
 0x219   :  { %v3641_v61 = vpop.permute.xlu1 %1695  ;;  %v780_v37 = vadd.f32 %v778_v4, %v757_v47 }
 0x21b   :  { %v3643_v57 = vpop.permute.xlu0 %1699 }
 0x21d   :  { %v2565_v46 = vpop.permute.xlu1 %2564 }
 0x21e   :  { %v2566_v40 = vunpack.i.l.bf16 %v2565_v46  ;;  %v2567_v44 = vunpack.i.h.bf16 %v2565_v46 }
 0x21f   :  { %v1717_v36 = vpop.permute.xlu0 %1716 }
 0x220   :  { %v1722_v26 = vsel %vm128_vm4, %v2566_v40, %v1717_v36  ;;  %v1701_v36 = vsel %vm751_vm8, %v2561_v9, %v3641_v61  ;;  %v2175_v61 = vld [vmem:[%s3927_s3 + $0x4] ss:$0 sm:$0xff] }
 0x221   :  { %v1721_v17 = vpop.permute.xlu1 %1720  ;;  %v1726_v7 = vmul.f32 %v2172_v23, %v1722_v26 }
 0x222   :  { %v1723_v55 = vsel %vm128_vm4, %v2567_v44, %v1721_v17  ;;  %v1702_v17 = vsel %vm751_vm8, %v2562_v16, %v3643_v57 }
 0x223   :  { %v2570_v13 = vpop.permute.xlu0 %2569  ;;  %v1727_v21 = vmul.f32 %v2172_v23, %v1723_v55  ;;  %v1705_v23 = vmul.f32 %v2171_v60, %v1701_v36  ;;  %v1706_v4 = vmul.f32 %v2171_v60, %v1702_v17 }
 0x224   :  { %v2571_v14 = vunpack.i.l.bf16 %v2570_v13  ;;  %v2572_v28 = vunpack.i.h.bf16 %v2570_v13 }
 0x225   :  { %v789_v15 = vpop.permute.xlu1 %788  ;;  %v1728_v26 = vadd.f32 %v1726_v7, %v1705_v23  ;;  %v1729_v55 = vadd.f32 %v1727_v21, %v1706_v4  ;;  %v2178_v23 = vld [vmem:[%s3928_s4] ss:$0 sm:$0xff] }
 0x226   :  { %v794_v10 = vsel %vm269_vm5, %v2571_v14, %v789_v15 }
 0x227   :  { %v793_v12 = vpop.permute.xlu0 %792  ;;  %v798_v13 = vmul.f32 %v2173_v6, %v794_v10 }
 0x228   :  { %v795_v22 = vsel %vm269_vm5, %v2572_v28, %v793_v12 }
 0x229   :  { %v3645_v27 = vpop.permute.xlu1 %2574  ;;  %v799_v15 = vmul.f32 %v2173_v6, %v795_v22  ;;  %v800_v40 = vadd.f32 %v798_v13, %v779_v11 }
 0x22a   :  { %v2576_v2 = vunpack.i.l.bf16 %v3645_v27  ;;  %v2577_v24 = vunpack.i.h.bf16 %v3645_v27 }
 0x22b   :  { %v3647_v42 = vpop.permute.xlu0 %1737  ;;  %v801_v28 = vadd.f32 %v799_v15, %v780_v37 }
 0x22d   :  { %v3649_v48 = vpop.permute.xlu1 %1741 }
 0x22e   :  { %v1744_v27 = vsel %vm269_vm5, %v2577_v24, %v3649_v48  ;;  %v2177_v24 = vld [vmem:[%s3927_s3 + $0x6] ss:$0 sm:$0xff] }
 0x22f   :  { %v3651_v18 = vpop.permute.xlu0 %820  ;;  %v1748_v22 = vmul.f32 %v2173_v6, %v1744_v27 }
 0x231   :  { %v3653_v56 = vpop.permute.xlu1 %2579 }
 0x232   :  { %v2582_v12 = vunpack.i.h.bf16 %v3653_v56  ;;  %v2581_v34 = vunpack.i.l.bf16 %v3653_v56  ;;  %v1743_v56 = vsel %vm269_vm5, %v2576_v2, %v3647_v42  ;;  %v810_v2 = vadd.f32 %v3688_v59, %v801_v28 }
 0x233   :  { %v3655_v1 = vpop.permute.xlu0 %824  ;;  %v1747_v10 = vmul.f32 %v2173_v6, %v1743_v56 }
 0x234   :  { %v828_v57 = vsel %vm488_vm6, %v3651_v18, %v2581_v34  ;;  %v829_v25 = vsel %vm488_vm6, %v3655_v1, %v2582_v12  ;;  %v1750_v34 = vadd.f32 %v1748_v22, %v1729_v55 }
 0x235   :  { %v3665_v0 = vpop.permute.xlu1 %1769  ;;  %v832_v47 = vmul.f32 %v2175_v61, %v828_v57  ;;  %v833_v9 = vmul.f32 %v2175_v61, %v829_v25  ;;  %v1749_v12 = vadd.f32 %v1747_v10, %v1728_v26 }
 0x236   :  { %v1759_v57 = vadd.f32 %v3702_v58, %v1750_v34  ;;  %v3795_v58 = vld [vmem:[%s3929_s5 + $0x3] ss:$0 sm:$0xff] }
 0x237   :  { %v3675_v35 = vpop.permute.xlu0 %2584  ;;  %v835_v36 = vadd.f32 %v833_v9, %v810_v2  ;;  %v1758_v28 = vadd.f32 %v3699_v51, %v1749_v12  ;;  %v1028_v9 = vrot.slane %v3749_v19, 6 }
 0x238   :  { %v2587_v42 = vunpack.i.h.bf16 %v3675_v35  ;;  %v2586_v44 = vunpack.i.l.bf16 %v3675_v35  ;;  %v809_v35 = vadd.f32 %v3678_v43, %v800_v40 }
 0x239   :  { %v3690_v29 = vpop.permute.xlu1 %1773 }
 0x23a   :  { %v1777_v6 = vsel %vm488_vm6, %v3665_v0, %v2586_v44  ;;  %v1778_v13 = vsel %vm488_vm6, %v3690_v29, %v2587_v42  ;;  %v834_v43 = vadd.f32 %v832_v47, %v809_v35  ;;  %v983_v44 = vrot.slane %v3725_v5, 4 }
 0x23b   :  { %v842_v49 = vpop.permute.xlu0 %841  ;;  %v1782_v29 = vmul.f32 %v2175_v61, %v1778_v13 }
 0x23d   :  { %v2590_v63 = vpop.permute.xlu1 %2589  ;;  %v1784_v10 = vadd.f32 %v1782_v29, %v1759_v57 }
 0x23e   :  { %v2592_v53 = vunpack.i.h.bf16 %v2590_v63  ;;  %v2591_v14 = vunpack.i.l.bf16 %v2590_v63  ;;  %v2176_v63 = vld [vmem:[%s3927_s3 + $0x5] ss:$0 sm:$0xff] }
 0x23f   :  { %v846_v46 = vpop.permute.xlu0 %845 }
 0x240   :  { %v849_v54 = vsel %vm626_vm7, %v842_v49, %v2591_v14  ;;  %v850_v18 = vsel %vm626_vm7, %v846_v46, %v2592_v53  ;;  %v1781_v53 = vmul.f32 %v2175_v61, %v1777_v6 }
 0x241   :  { %v1791_v52 = vpop.permute.xlu1 %1790  ;;  %v853_v49 = vmul.f32 %v2176_v63, %v849_v54  ;;  %v854_v15 = vmul.f32 %v2176_v63, %v850_v18 }
 0x243   :  { %v2595_v32 = vpop.permute.xlu0 %2594  ;;  %v855_v21 = vadd.f32 %v853_v49, %v834_v43  ;;  %v856_v56 = vadd.f32 %v854_v15, %v835_v36 }
 0x244   :  { %v2597_v1 = vunpack.i.h.bf16 %v2595_v32  ;;  %v2596_v16 = vunpack.i.l.bf16 %v2595_v32 }
 0x245   :  { %v1795_v48 = vpop.permute.xlu1 %1794 }
 0x246   :  { %v1798_v59 = vsel %vm626_vm7, %v1791_v52, %v2596_v16  ;;  %v1799_v0 = vsel %vm626_vm7, %v1795_v48, %v2597_v1  ;;  %v1783_v48 = vadd.f32 %v1781_v53, %v1758_v28 }
 0x247   :  { %v863_v60 = vpop.permute.xlu0 %862  ;;  %v1802_v25 = vmul.f32 %v2176_v63, %v1798_v59  ;;  %v1803_v52 = vmul.f32 %v2176_v63, %v1799_v0  ;;  %v1006_v63 = vrot.slane %v3734_v50, 5  ;;  %v2229_v50 = vld [vmem:[%s3932_s8] ss:$0 sm:$0xff]  ;;  %s2678_s8 = scalar_lea.vmem %s2133_s18, 512 }
 0x248   :  { %p2679_p10 = scmp.ne.s32.totalorder %s2133_s18, %s2678_s8  ;;  %p2684_p12 = scmp.lt.s32.totalorder %s2678_s8, %s2678_s8 }
 0x249   :  { %v2600_v46 = vpop.permute.xlu1 %2599  ;;  %v1804_v1 = vadd.f32 %v1802_v25, %v1783_v48  ;;  %v1805_v16 = vadd.f32 %v1803_v52, %v1784_v10 }
 0x24a   :  { %v2602_v11 = vunpack.i.h.bf16 %v2600_v46  ;;  %v2601_v37 = vunpack.i.l.bf16 %v2600_v46  ;;  %p2685_p13 = por %p2684_p12, %p2683_p11 }
 0x24b   :  { %v867_v17 = vpop.permute.xlu0 %866 }
 0x24c   :  { %v871_v14 = vsel %vm870_vm9, %v863_v60, %v2601_v37  ;;  %v872_v7 = vsel %vm870_vm9, %v867_v17, %v2602_v11  ;;  %p2686_p0 = pnand %p2685_p13, %p2679_p10 }
 0x24d   :  { %v875_v27 = vmul.f32 %v2177_v24, %v871_v14  ;;  %v876_v32 = vmul.f32 %v2177_v24, %v872_v7  ;;  %v1812_v40 = vpop.permute.xlu1 %1811 }
 0x24f   :  { %v877_v61 = vadd.f32 %v875_v27, %v855_v21  ;;  %v878_v4 = vadd.f32 %v876_v32, %v856_v56  ;;  %v2605_v42 = vpop.permute.xlu0 %2604 }
 0x250   :  { %v2607_v22 = vunpack.i.h.bf16 %v2605_v42  ;;  %v2606_v54 = vunpack.i.l.bf16 %v2605_v42 }
 0x251   :  { %v886_v18 = vadd.f32 %v2178_v23, %v877_v61  ;;  %v887_v51 = vadd.f32 %v2178_v23, %v878_v4  ;;  %v1816_v47 = vpop.permute.xlu1 %1815 }
 0x252   :  { %v1819_v60 = vsel %vm870_vm9, %v1812_v40, %v2606_v54  ;;  %v1820_v26 = vsel %vm870_vm9, %v1816_v47, %v2607_v22 }
 0x253   :  { %v1823_v55 = vmul.f32 %v2177_v24, %v1819_v60  ;;  %v1824_v35 = vmul.f32 %v2177_v24, %v1820_v26  ;;  %v900_v2 = vmul.f32 %v3713_v33, %v886_v18  ;;  %v911_v6 = vmul.f32 %v3660_v31, %v886_v18 }
 0x254   :  { %v912_v13 = vmul.f32 %v3660_v31, %v887_v51  ;;  %v933_v49 = vmul.f32 %v3670_v20, %v886_v18  ;;  %v934_v15 = vmul.f32 %v3670_v20, %v887_v51  ;;  %v954_v46 = vmul.f32 %v3795_v58, %v886_v18 }
 0x255   :  { %v1825_v12 = vadd.f32 %v1823_v55, %v1804_v1  ;;  %v1826_v34 = vadd.f32 %v1824_v35, %v1805_v16  ;;  %v917_v11 = vrot.slane %v911_v6, 1  ;;  %v955_v37 = vmul.f32 %v3795_v58, %v887_v51 }
 0x256   :  { %v919_v43 = vrot.slane %v912_v13, 1  ;;  %v939_v24 = vrot.slane %v933_v49, 2  ;;  %v941_v36 = vrot.slane %v934_v15, 2  ;;  %v959_v59 = vrot.slane %v954_v46, 3 }
 0x257   :  { %v3808_v0 = vadd.f32 %v2178_v23, %v1825_v12  ;;  %v3810_v17 = vadd.f32 %v2178_v23, %v1826_v34  ;;  %v918_v53 = vsel %vm197_vm2, %v916_v30, %v917_v11  ;;  %v960_v29 = vrot.slane %v955_v37, 3  ;;  %v3850_v37 = vld [vmem:[%s3930_s6] ss:$0 sm:$0xff] }
 0x258   :  { %v920_v14 = vsel %vm197_vm2, %v917_v11, %v919_v43  ;;  %v924_v7 = vadd.f32 %v918_v53, %v3721_v45  ;;  %v940_v21 = vsel %vm229_vm3, %v938_v8, %v939_v24  ;;  %v942_v56 = vsel %vm229_vm3, %v939_v24, %v941_v36 }
 0x259   :  { %v925_v27 = vadd.f32 %v920_v14, %v900_v2  ;;  %v961_v32 = vsel %vm958_vm10, %v959_v59, %v960_v29  ;;  %v973_v40 = vmul.f32 %v3695_v38, %v886_v18  ;;  %v974_v28 = vmul.f32 %v3695_v38, %v887_v51 }
 0x25a   :  { %v946_v57 = vadd.f32 %v940_v21, %v924_v7  ;;  %v996_v25 = vmul.f32 %v3718_v3, %v886_v18  ;;  %v997_v52 = vmul.f32 %v3718_v3, %v887_v51  ;;  %v1019_v23 = vmul.f32 %v3739_v39, %v886_v18 }
 0x25b   :  { %v947_v61 = vadd.f32 %v942_v56, %v925_v27  ;;  %v980_v4 = vrot.slane %v973_v40, 4  ;;  %v981_v42 = vrot.slane %v974_v28, 4  ;;  %v1020_v48 = vmul.f32 %v3739_v39, %v887_v51 }
 0x25c   :  { %v965_v10 = vadd.f32 %v959_v59, %v946_v57  ;;  %v1003_v22 = vrot.slane %v996_v25, 5  ;;  %v1004_v54 = vrot.slane %v997_v52, 5  ;;  %v1025_v47 = vrot.slane %v1019_v23, 6 }
 0x25d   :  { %v966_v1 = vadd.f32 %v961_v32, %v947_v61  ;;  %v982_v16 = vsel %vm979_vm11, %v980_v4, %v981_v42  ;;  %v1026_v60 = vrot.slane %v1020_v48, 6  ;;  %v901_v26 = vmul.f32 %v3713_v33, %v887_v51 }
 0x25e   :  { %v988_v55 = vadd.f32 %v980_v4, %v965_v10  ;;  %v1005_v35 = vsel %vm1002_vm12, %v1003_v22, %v1004_v54  ;;  %v984_v18 = vsel %vm979_vm11, %v981_v42, %v983_v44  ;;  %v1007_v2 = vsel %vm1002_vm12, %v1004_v54, %v1006_v63 }
 0x25f   :  { %v989_v6 = vadd.f32 %v982_v16, %v966_v1  ;;  %v1027_v13 = vsel %vm109_vm0, %v1025_v47, %v1026_v60  ;;  %v926_v49 = vadd.f32 %v919_v43, %v901_v26  ;;  %v1029_v15 = vsel %vm109_vm0, %v1026_v60, %v1028_v9 }
 0x260   :  { %v1011_v51 = vadd.f32 %v1003_v22, %v988_v55  ;;  %v1848_v46 = vmul.f32 %v3713_v33, %v3808_v0  ;;  %v1859_v12 = vmul.f32 %v3660_v31, %v3808_v0  ;;  %v1860_v34 = vmul.f32 %v3660_v31, %v3810_v17 }
 0x261   :  { %v1012_v11 = vadd.f32 %v1005_v35, %v989_v6  ;;  %v948_v43 = vadd.f32 %v941_v36, %v926_v49  ;;  %v1881_v24 = vmul.f32 %v3670_v20, %v3808_v0  ;;  %v1882_v59 = vmul.f32 %v3670_v20, %v3810_v17 }
 0x262   :  { %v1033_v53 = vadd.f32 %v1025_v47, %v1011_v51  ;;  %v1865_v14 = vrot.slane %v1859_v12, 1  ;;  %v1867_v7 = vrot.slane %v1860_v34, 1  ;;  %v1902_v21 = vmul.f32 %v3795_v58, %v3808_v0 }
 0x263   :  { %v1034_v31 = vadd.f32 %v1027_v13, %v1012_v11  ;;  %v967_v56 = vadd.f32 %v960_v29, %v948_v43  ;;  %v1887_v27 = vrot.slane %v1881_v24, 2  ;;  %v1889_v32 = vrot.slane %v1882_v59, 2 }
 0x264   :  { %v1043_v40 = vadd.f32 %v3850_v37, %v1033_v53  ;;  %v1866_v36 = vsel %vm197_vm2, %v916_v30, %v1865_v14  ;;  %v1868_v28 = vsel %vm197_vm2, %v1865_v14, %v1867_v7  ;;  %v1903_v20 = vmul.f32 %v3795_v58, %v3810_v17 }
 0x265   :  { %v1044_v57 = vadd.f32 %v3850_v37, %v1034_v31  ;;  %v990_v25 = vadd.f32 %v984_v18, %v967_v56  ;;  %v1872_v52 = vadd.f32 %v1866_v36, %v3721_v45  ;;  %v1873_v23 = vadd.f32 %v1868_v28, %v1848_v46 }
 0x266   :  { %v1994_v29 = vrot.slane %v1043_v40, 5  ;;  %v1888_v61 = vsel %vm229_vm3, %v938_v8, %v1887_v27  ;;  %v1890_v62 = vsel %vm229_vm3, %v1887_v27, %v1889_v32  ;;  %v1906_v4 = vrot.slane %v1902_v21, 3 }
 0x267   :  { %v1995_v30 = vrot.slane %v1044_v57, 5  ;;  %v1013_v42 = vadd.f32 %v1007_v2, %v990_v25  ;;  %v1894_v48 = vadd.f32 %v1888_v61, %v1872_v52  ;;  %v1895_v10 = vadd.f32 %v1890_v62, %v1873_v23  ;;  %v2609_v61 = vld [vmem:[#allocation3] sm:$0xff] }
 0x268   :  { %v1907_v22 = vrot.slane %v1903_v20, 3  ;;  %v1920_v58 = vmul.f32 %v3695_v38, %v3808_v0  ;;  %v1921_v45 = vmul.f32 %v3695_v38, %v3810_v17  ;;  %v1942_v54 = vmul.f32 %v3718_v3, %v3808_v0 }
 0x269   :  { %v1996_v41 = vsel %vm1002_vm12, %v1994_v29, %v1995_v30  ;;  %v1035_v8 = vadd.f32 %v1029_v15, %v1013_v42  ;;  %v1912_v47 = vadd.f32 %v1906_v4, %v1894_v48  ;;  %v1943_v1 = vmul.f32 %v3718_v3, %v3810_v17  ;;  %v2608_v29 = vld [vmem:[#allocation3 + $0x8] sm:$0xff]  ;;  %v2610_v42 = vld [vmem:[#allocation3 + $0x18] sm:$0xff] }
 0x26a   :  { %2282 = vmatprep.mubr.f32.mxu0 %v1996_v41  ;;  %v1908_v16 = vsel %vm958_vm10, %v1906_v4, %v1907_v22  ;;  %v1926_v60 = vrot.slane %v1920_v58, 4  ;;  %v1927_v26 = vrot.slane %v1921_v45, 4  ;;  %v1948_v55 = vrot.slane %v1942_v54, 5 }
 0x26b   :  { %v1045_v35 = vadd.f32 %v3850_v37, %v1035_v8  ;;  %v1913_v18 = vadd.f32 %v1908_v16, %v1895_v10  ;;  %v1949_v38 = vrot.slane %v1943_v1, 5  ;;  %v1964_v2 = vmul.f32 %v3739_v39, %v3808_v0  ;;  %v2611_v10 = vld [vmem:[#allocation3 + $0x10] sm:$0xff] }
 0x26c   :  { %v1928_v6 = vsel %vm979_vm11, %v1926_v60, %v1927_v26  ;;  %v1934_v13 = vadd.f32 %v1926_v60, %v1912_v47  ;;  %v1965_v49 = vmul.f32 %v3739_v39, %v3810_v17  ;;  %v1849_v3 = vmul.f32 %v3713_v33, %v3810_v17 }
 0x26d   :  { %v1997_v15 = vrot.slane %v1045_v35, 5  ;;  %v1935_v51 = vadd.f32 %v1928_v6, %v1913_v18  ;;  %v1950_v46 = vsel %vm1002_vm12, %v1948_v55, %v1949_v38  ;;  %v1970_v12 = vrot.slane %v1964_v2, 6 }
 0x26e   :  { %v1956_v34 = vadd.f32 %v1948_v55, %v1934_v13  ;;  %v1971_v11 = vrot.slane %v1965_v49, 6  ;;  %v1874_v43 = vadd.f32 %v1867_v7, %v1849_v3  ;;  %v1930_v31 = vsel %vm979_vm11, %v1927_v26, %v983_v44 }
 0x26f   :  { %v1998_v24 = vsel %vm1002_vm12, %v1995_v30, %v1997_v15  ;;  %v1957_v0 = vadd.f32 %v1950_v46, %v1935_v51  ;;  %v1952_v40 = vsel %vm1002_vm12, %v1949_v38, %v1006_v63 }
 0x270   :  { %2283 = vmatmul.mubr.f32.vlgmr.msra.gmra.mrb[0].mxu0 %v1998_v24  ;;  %v1972_v59 = vsel %vm109_vm0, %v1970_v12, %v1971_v11  ;;  %v1978_v53 = vadd.f32 %v1970_v12, %v1956_v34  ;;  %v1896_v14 = vadd.f32 %v1889_v32, %v1874_v43  ;;  %v1974_v28 = vsel %vm109_vm0, %v1971_v11, %v1028_v9 }
 0x271   :  { %v1979_v39 = vadd.f32 %v1972_v59, %v1957_v0 }
 0x272   :  { %v1988_v21 = vadd.f32 %v3850_v37, %v1978_v53  ;;  %v1914_v33 = vadd.f32 %v1907_v22, %v1896_v14 }
 0x273   :  { %v1989_v17 = vadd.f32 %v3850_v37, %v1979_v39 }
 0x274   :  { %v2004_v56 = vrot.slane %v1988_v21, 5  ;;  %v1936_v7 = vadd.f32 %v1930_v31, %v1914_v33 }
 0x275   :  { %v2005_v27 = vrot.slane %v1989_v17, 5 }
 0x276   :  { %v1958_v36 = vadd.f32 %v1952_v40, %v1936_v7 }
 0x277   :  { %v2006_v32 = vsel %vm1002_vm12, %v2004_v56, %v2005_v27 }
 0x278   :  { %2285 = vmatprep.mubr.f32.mxu1 %v2006_v32  ;;  %v1980_v20 = vadd.f32 %v1974_v28, %v1958_v36 }
 0x27a   :  { %v1990_v5 = vadd.f32 %v3850_v37, %v1980_v20 }
 0x27c   :  { %v2007_v57 = vrot.slane %v1990_v5, 5 }
 0x27e   :  { %v2008_v44 = vsel %vm1002_vm12, %v2005_v27, %v2007_v57 }
 0x27f   :  { %2286 = vmatmul.mubr.f32.vlgmr.msra.gmra.mrb[0].mxu1 %v2008_v44 }
 0x343   :  { %v2284_v63 = vpop.f32.mrb[0].mxu0 }
 0x344   :  { %v2106_v25 = vadd.f32 %v2284_v63, %v2229_v50  ;;  %v2100_v52 = vpop.f32.mrb[1].mxu0 }
 0x345   :  { %v2101_v23 = vadd.f32 %v2229_v50, %v2100_v52 }
 0x346   :  { %v2120_v19 = vmul.f32 %v2608_v29, %v2106_v25 }
 0x347   :  { %v2119_v9 = vmul.f32 %v2609_v61, %v2101_v23 }
 0x348   :  { %2124 = vst [vmem:[#allocation9 + $0x8] sm:$0xff] %v2120_v19 }
 0x349   :  { %2123 = vst [vmem:[#allocation9] sm:$0xff] %v2119_v9 }
 0x352   :  { %v2287_v62 = vpop.f32.mrb[0].mxu1 }
 0x353   :  { %v2116_v37 = vadd.f32 %v2287_v62, %v2229_v50  ;;  %v2110_v4 = vpop.f32.mrb[1].mxu1 }
 0x354   :  { %v2111_v30 = vadd.f32 %v2229_v50, %v2110_v4 }
 0x355   :  { %v2122_v48 = vmul.f32 %v2610_v42, %v2116_v37 }
 0x356   :  { %v2121_v22 = vmul.f32 %v2611_v10, %v2111_v30 }
 0x357   :  { %2126 = vst [vmem:[#allocation9 + $0x18] sm:$0xff] %v2122_v48 }
 0x358   :  { %2125 = vst [vmem:[#allocation9 + $0x10] sm:$0xff] %v2121_v22 }
 0x359   :  { %2689 = shalt.err (!%p2686_p0)
}
 0x35a   :  { %s2690_s23 = scalar_lea.hbm %s3933_s9, 512 }
 0x35b   :  { %p2691_p1 = scmp.ne.s32.totalorder %s3933_s9, %s2690_s23  ;;  %p2694_p2 = scmp.lt.u32.totalorder %s2690_s23, %s3933_s9 }
 0x35d   :  { %p2696_p3 = pnand %p2694_p2, %p2691_p1 }
 0x35f   :  { %2699 = shalt.err (!%p2696_p3)
}
 0x360   :  { %2138 = dma.vmem_to_hbm [thread:$0]  %s2133_s18, 512, %s3933_s9, [#allocation5], %s2708_s21, %s2708_s21, %s2709_s22  }
 0x361   :  { %2704 = dma.done.wait [#allocation5], 512  }
 0x362   :  { %2705 = vsyncadd [#allocation5], 4294966784 }
 0x363   :  { %2142 = vsyncpa [#allocation4], 1 }
 0x364   :  { %2143 = vsyncpa [#allocation7], 1 }
 0x365   :  { %2144 = vsyncpa [#allocation5], 1 }

</bundles_post_ra>
